<compile_context>
chip_gen: v6e
topology: v6e:2x2x1
jax: 0.10.0
libtpu: 0.0.40
codegen_flags: <defaults>
</compile_context>

<pallas_src>
import jax
import jax.numpy as jnp
from jax.experimental import pallas as pl
from jax.experimental.pallas import tpu as pltpu


# --------------------------------------------------------------------------
# Fused kernel. All activations are feature-major: (features, nodes).
# --------------------------------------------------------------------------
def gcn_kernel(xt_ref, at_ref,
               wih_ref, whh_ref, blstm_ref,
               wself_ref, wneigh_ref, bsage_ref,
               wgc_ref, bgc_ref,
               wgru_ref, bih_ref, bhh_ref,
               wcls_ref, bcls_ref,
               o_ref):
    f32 = jnp.float32
    Fin, N = xt_ref.shape                      # in_dim, num nodes
    HG = wgru_ref.shape[0] // 3                # GRU hidden (=32)

    xt = xt_ref[...]                           # (Fin, N)        node features^T
    at = at_ref[...]                           # (N_src, N_dst)  = A^T

    # ---------------- conv4: SAGEConv(aggregator='lstm') + ReLU ----------------
    # Per-neighbor input-gate pre-activations; gates stacked on the SUBLANE
    # axis so each gate block below is an aligned sublane-block view.
    whh = whh_ref[...]                         # (4*Fin, Fin)
    xg = (jnp.dot(wih_ref[...], xt, preferred_element_type=f32)
          + blstm_ref[...])                    # (4*Fin, N_src)

    hT = jnp.zeros((Fin, N), f32)              # LSTM hidden, carried in vregs
    cT = jnp.zeros((Fin, N), f32)              # LSTM cell,   carried in vregs

    # Fully unrolled static loop over source-node ids (N is a trace-time const).
    # NOTE: the per-step W_hh matmul is a tiny MXU op inside a serial chain;
    # accepted (MXU <1% utilized here), everything else is VPU/EUP/XLU filler.
    for j in range(N):
        gates = (jnp.dot(whh, hT, preferred_element_type=f32)
                 + xg[:, j:j + 1])             # (4*Fin, N_dst)
        i_g = jax.nn.sigmoid(gates[0 * Fin:1 * Fin, :])
        f_g = jax.nn.sigmoid(gates[1 * Fin:2 * Fin, :])
        g_g = jnp.tanh(gates[2 * Fin:3 * Fin, :])
        o_g = jax.nn.sigmoid(gates[3 * Fin:4 * Fin, :])
        c_new = f_g * cT + i_g * g_g
        h_new = o_g * jnp.tanh(c_new)
        # Row j of A^T: 1.0 iff edge j -> dst.  Static sublane row slice,
        # broadcast over the feature sublanes; delta-blend masked update.
        msk = at[j:j + 1, :]                   # (1, N_dst)
        cT = cT + msk * (c_new - cT)
        hT = hT + msk * (h_new - hT)

    # out = relu(W_self x + W_neigh h_neigh + b)   (transposed: (hidden, N))
    h1 = jnp.maximum(
        jnp.dot(wself_ref[...], xt, preferred_element_type=f32)
        + jnp.dot(wneigh_ref[...], hT, preferred_element_type=f32)
        + bsage_ref[...], 0.0)                 # (H, N)

    # ---------------- conv2: GraphConv(norm='both') + ReLU ----------------
    # deg_out[j] = sum_i A[i,j]  (row-sum of A^T, column vector  -> src norm)
    # deg_in[i]  = sum_j A[i,j]  (col-sum of A^T, row vector     -> dst norm)
    deg_out = jnp.sum(at, axis=1, keepdims=True)   # (N_src, 1)
    deg_in = jnp.sum(at, axis=0, keepdims=True)    # (1, N_dst)
    ninv_out = jnp.where(deg_out > 0, jax.lax.rsqrt(deg_out), 0.0)
    ninv_in = jnp.where(deg_in > 0, jax.lax.rsqrt(deg_in), 0.0)
    # m^T = h1 @ (n_out * A^T) * n_in  -- norms folded, A_norm never built,
    # no transposes needed.
    mT = jnp.dot(h1, at * ninv_out, preferred_element_type=f32) * ninv_in
    h2 = jnp.maximum(
        jnp.dot(wgc_ref[...], mT, preferred_element_type=f32) + bgc_ref[...],
        0.0)                                   # (H, N)

    # ------------- GRU (seq_len=1, h0=0) -> mean_nodes -> Linear -------------
    # PyTorch gate order (r, z, n); with h0 = 0 the hidden matmul vanishes and
    # only b_hh contributes.  Gate slices are sublane-block views.
    gi = (jnp.dot(wgru_ref[...], h2, preferred_element_type=f32)
          + bih_ref[...])                      # (3*HG, N)
    gh = bhh_ref[...]                          # (3*HG, 1)
    r = jax.nn.sigmoid(gi[0 * HG:1 * HG, :] + gh[0 * HG:1 * HG, :])
    z = jax.nn.sigmoid(gi[1 * HG:2 * HG, :] + gh[1 * HG:2 * HG, :])
    n = jnp.tanh(gi[2 * HG:3 * HG, :] + r * gh[2 * HG:3 * HG, :])
    h_gru = (1.0 - z) * n                      # (HG, N); "+ z*h0" with h0 = 0

    hg = jnp.mean(h_gru, axis=1, keepdims=True)    # (HG, 1) mean over nodes
    # Dropout(p=0.7) is identity in eval/inference mode.
    o_ref[...] = (jnp.dot(wcls_ref[...], hg, preferred_element_type=f32)
                  + bcls_ref[...])             # (n_classes, 1)


# --------------------------------------------------------------------------
# Wrapper: layout plumbing only (transposes), one pallas_call for the whole net.
# --------------------------------------------------------------------------
def gcn_forward(x, a, params):
    p = params
    n_classes = p["cls_w"].shape[0]
    xt = x.T                                   # (Fin, N)  features on sublanes
    at = a.T                                   # (N_src, N_dst)

    y_col = pl.pallas_call(
        gcn_kernel,
        out_shape=jax.ShapeDtypeStruct((n_classes, 1), jnp.float32),
        in_specs=[pl.BlockSpec(memory_space=pltpu.MemorySpace.VMEM)] * 15,
        out_specs=pl.BlockSpec(memory_space=pltpu.MemorySpace.VMEM),
    )(xt, at,
      p["lstm_wih"], p["lstm_whh"], p["lstm_b"],
      p["sage_wself"], p["sage_wneigh"], p["sage_b"],
      p["gc_w"], p["gc_b"],
      p["gru_wih"], p["gru_bih"], p["gru_bhh"],
      p["cls_w"], p["cls_b"])
    return y_col.reshape(1, n_classes)


def init_params(key, in_dim, hidden_dim, n_classes):
    ks = jax.random.split(key, 12)
    s = 0.1

    def w(k, shape):
        return (s * jax.random.normal(k, shape)).astype(jnp.float32)

    return {
        # SAGEConv-lstm aggregator: LSTM(in_dim, in_dim); gate order i, f, g, o.
        # Weights in native PyTorch (out, in) layout; biases as columns.
        "lstm_wih": w(ks[0], (4 * in_dim, in_dim)),
        "lstm_whh": w(ks[1], (4 * in_dim, in_dim)),
        "lstm_b": w(ks[2], (4 * in_dim, 1)),           # b_ih + b_hh combined
        "sage_wself": w(ks[3], (hidden_dim, in_dim)),
        "sage_wneigh": w(ks[4], (hidden_dim, in_dim)),
        "sage_b": w(ks[5], (hidden_dim, 1)),
        # GraphConv weight in (out, in) layout (h2^T = W @ m^T + b).
        "gc_w": w(ks[6], (hidden_dim, hidden_dim)),
        "gc_b": w(ks[7], (hidden_dim, 1)),
        # GRU(hidden_dim, 32); gate order r, z, n.  W_hh unused because h0 = 0.
        "gru_wih": w(ks[8], (3 * 32, hidden_dim)),
        "gru_bih": w(ks[9], (3 * 32, 1)),
        "gru_bhh": w(ks[10], (3 * 32, 1)),
        # classify: Linear(32, n_classes)
        "cls_w": w(ks[11], (n_classes, 32)),
        "cls_b": jnp.zeros((n_classes, 1), jnp.float32),
    }


if __name__ == "__main__":
    N, IN_DIM, HIDDEN, N_CLASSES = 16, 8, 32, 4

    key = jax.random.PRNGKey(0)
    k_x, k_a, k_p = jax.random.split(key, 3)

    # node features (N, in_dim) and dense adjacency A[dst, src]
    x = jax.random.normal(k_x, (N, IN_DIM), dtype=jnp.float32)
    a = (jax.random.uniform(k_a, (N, N)) < 0.35).astype(jnp.float32)
    a = a * (1.0 - jnp.eye(N, dtype=jnp.float32))   # no self loops

    params = init_params(k_p, IN_DIM, HIDDEN, N_CLASSES)

    y = jax.jit(gcn_forward)(x, a, params)
    y = jax.block_until_ready(y)
    assert y.shape == (1, N_CLASSES) and y.dtype == jnp.float32
    print("KERNEL_OK")
</pallas_src>

<mosaic_0001>
module attributes {stable_mosaic.version = 11 : i64} {
  func.func @gcn_kernel(%arg0: memref<8x16xf32, #tpu.memory_space<vmem>>, %arg1: memref<16x16xf32, #tpu.memory_space<vmem>>, %arg2: memref<32x8xf32, #tpu.memory_space<vmem>>, %arg3: memref<32x8xf32, #tpu.memory_space<vmem>>, %arg4: memref<32x1xf32, #tpu.memory_space<vmem>>, %arg5: memref<32x8xf32, #tpu.memory_space<vmem>>, %arg6: memref<32x8xf32, #tpu.memory_space<vmem>>, %arg7: memref<32x1xf32, #tpu.memory_space<vmem>>, %arg8: memref<32x32xf32, #tpu.memory_space<vmem>>, %arg9: memref<32x1xf32, #tpu.memory_space<vmem>>, %arg10: memref<96x32xf32, #tpu.memory_space<vmem>>, %arg11: memref<96x1xf32, #tpu.memory_space<vmem>>, %arg12: memref<96x1xf32, #tpu.memory_space<vmem>>, %arg13: memref<4x32xf32, #tpu.memory_space<vmem>>, %arg14: memref<4x1xf32, #tpu.memory_space<vmem>>, %arg15: memref<4x1xf32, #tpu.memory_space<vmem>>) attributes {dimension_semantics = [], scalar_prefetch = 0 : i64, scratch_operands = 0 : i64, tpu.core_type = #tpu.core_type<tc>} {
    %c0 = arith.constant 0 : index
    %c0_0 = arith.constant 0 : index
    %0 = vector.load %arg0[%c0, %c0_0] : memref<8x16xf32, #tpu.memory_space<vmem>>, vector<8x16xf32>
    %c0_1 = arith.constant 0 : index
    %c0_2 = arith.constant 0 : index
    %1 = vector.load %arg1[%c0_1, %c0_2] : memref<16x16xf32, #tpu.memory_space<vmem>>, vector<16x16xf32>
    %c0_3 = arith.constant 0 : index
    %c0_4 = arith.constant 0 : index
    %2 = vector.load %arg3[%c0_3, %c0_4] : memref<32x8xf32, #tpu.memory_space<vmem>>, vector<32x8xf32>
    %c0_5 = arith.constant 0 : index
    %c0_6 = arith.constant 0 : index
    %3 = vector.load %arg2[%c0_5, %c0_6] : memref<32x8xf32, #tpu.memory_space<vmem>>, vector<32x8xf32>
    %cst = arith.constant dense<0.000000e+00> : vector<32x16xf32>
    %4 = tpu.matmul %3, %0, %cst {dimension_numbers = #tpu.dot_dimension_numbers<[1], [0], [0], [1], [0, 0, 1, 1], [], []>} : vector<32x8xf32>, vector<8x16xf32>, vector<32x16xf32> -> vector<32x16xf32>
    %c0_7 = arith.constant 0 : index
    %c0_8 = arith.constant 0 : index
    %5 = vector.load %arg4[%c0_7, %c0_8] : memref<32x1xf32, #tpu.memory_space<vmem>>, vector<32x1xf32>
    %6 = vector.broadcast %5 : vector<32x1xf32> to vector<32x16xf32>
    %7 = arith.addf %4, %6 : vector<32x16xf32>
    %cst_9 = arith.constant 0.000000e+00 : f32
    %8 = vector.broadcast %cst_9 : f32 to vector<8x16xf32>
    %cst_10 = arith.constant 0.000000e+00 : f32
    %9 = vector.broadcast %cst_10 : f32 to vector<8x16xf32>
    %cst_11 = arith.constant dense<0.000000e+00> : vector<32x16xf32>
    %10 = tpu.matmul %2, %8, %cst_11 {dimension_numbers = #tpu.dot_dimension_numbers<[1], [0], [0], [1], [0, 0, 1, 1], [], []>} : vector<32x8xf32>, vector<8x16xf32>, vector<32x16xf32> -> vector<32x16xf32>
    %11 = vector.extract_strided_slice %7 {offsets = [0, 0], sizes = [32, 1], strides = [1, 1]} : vector<32x16xf32> to vector<32x1xf32>
    %12 = vector.broadcast %11 : vector<32x1xf32> to vector<32x16xf32>
    %13 = arith.addf %10, %12 : vector<32x16xf32>
    %14 = vector.extract_strided_slice %13 {offsets = [0, 0], sizes = [8, 16], strides = [1, 1]} : vector<32x16xf32> to vector<8x16xf32>
    %15 = arith.negf %14 : vector<8x16xf32>
    %16 = math.exp %15 : vector<8x16xf32>
    %cst_12 = arith.constant 1.000000e+00 : f32
    %17 = vector.broadcast %cst_12 : f32 to vector<8x16xf32>
    %18 = arith.addf %17, %16 : vector<8x16xf32>
    %19 = arith.divf %17, %18 : vector<8x16xf32>
    %20 = vector.extract_strided_slice %13 {offsets = [8, 0], sizes = [8, 16], strides = [1, 1]} : vector<32x16xf32> to vector<8x16xf32>
    %21 = arith.negf %20 : vector<8x16xf32>
    %22 = math.exp %21 : vector<8x16xf32>
    %cst_13 = arith.constant 1.000000e+00 : f32
    %23 = vector.broadcast %cst_13 : f32 to vector<8x16xf32>
    %24 = arith.addf %23, %22 : vector<8x16xf32>
    %25 = arith.divf %23, %24 : vector<8x16xf32>
    %26 = vector.extract_strided_slice %13 {offsets = [16, 0], sizes = [8, 16], strides = [1, 1]} : vector<32x16xf32> to vector<8x16xf32>
    %27 = math.tanh %26 : vector<8x16xf32>
    %28 = vector.extract_strided_slice %13 {offsets = [24, 0], sizes = [8, 16], strides = [1, 1]} : vector<32x16xf32> to vector<8x16xf32>
    %29 = arith.negf %28 : vector<8x16xf32>
    %30 = math.exp %29 : vector<8x16xf32>
    %cst_14 = arith.constant 1.000000e+00 : f32
    %31 = vector.broadcast %cst_14 : f32 to vector<8x16xf32>
    %32 = arith.addf %31, %30 : vector<8x16xf32>
    %33 = arith.divf %31, %32 : vector<8x16xf32>
    %34 = arith.mulf %25, %9 : vector<8x16xf32>
    %35 = arith.mulf %19, %27 : vector<8x16xf32>
    %36 = arith.addf %34, %35 : vector<8x16xf32>
    %37 = math.tanh %36 : vector<8x16xf32>
    %38 = arith.mulf %33, %37 : vector<8x16xf32>
    %39 = vector.extract_strided_slice %1 {offsets = [0, 0], sizes = [1, 16], strides = [1, 1]} : vector<16x16xf32> to vector<1x16xf32>
    %40 = arith.subf %36, %9 : vector<8x16xf32>
    %41 = vector.broadcast %39 : vector<1x16xf32> to vector<8x16xf32>
    %42 = arith.mulf %41, %40 : vector<8x16xf32>
    %43 = arith.addf %9, %42 : vector<8x16xf32>
    %44 = arith.subf %38, %8 : vector<8x16xf32>
    %45 = vector.broadcast %39 : vector<1x16xf32> to vector<8x16xf32>
    %46 = arith.mulf %45, %44 : vector<8x16xf32>
    %47 = arith.addf %8, %46 : vector<8x16xf32>
    %cst_15 = arith.constant dense<0.000000e+00> : vector<32x16xf32>
    %48 = tpu.matmul %2, %47, %cst_15 {dimension_numbers = #tpu.dot_dimension_numbers<[1], [0], [0], [1], [0, 0, 1, 1], [], []>} : vector<32x8xf32>, vector<8x16xf32>, vector<32x16xf32> -> vector<32x16xf32>
    %49 = vector.extract_strided_slice %7 {offsets = [0, 1], sizes = [32, 1], strides = [1, 1]} : vector<32x16xf32> to vector<32x1xf32>
    %50 = vector.broadcast %49 : vector<32x1xf32> to vector<32x16xf32>
    %51 = arith.addf %48, %50 : vector<32x16xf32>
    %52 = vector.extract_strided_slice %51 {offsets = [0, 0], sizes = [8, 16], strides = [1, 1]} : vector<32x16xf32> to vector<8x16xf32>
    %53 = arith.negf %52 : vector<8x16xf32>
    %54 = math.exp %53 : vector<8x16xf32>
    %cst_16 = arith.constant 1.000000e+00 : f32
    %55 = vector.broadcast %cst_16 : f32 to vector<8x16xf32>
    %56 = arith.addf %55, %54 : vector<8x16xf32>
    %57 = arith.divf %55, %56 : vector<8x16xf32>
    %58 = vector.extract_strided_slice %51 {offsets = [8, 0], sizes = [8, 16], strides = [1, 1]} : vector<32x16xf32> to vector<8x16xf32>
    %59 = arith.negf %58 : vector<8x16xf32>
    %60 = math.exp %59 : vector<8x16xf32>
    %cst_17 = arith.constant 1.000000e+00 : f32
    %61 = vector.broadcast %cst_17 : f32 to vector<8x16xf32>
    %62 = arith.addf %61, %60 : vector<8x16xf32>
    %63 = arith.divf %61, %62 : vector<8x16xf32>
    %64 = vector.extract_strided_slice %51 {offsets = [16, 0], sizes = [8, 16], strides = [1, 1]} : vector<32x16xf32> to vector<8x16xf32>
    %65 = math.tanh %64 : vector<8x16xf32>
    %66 = vector.extract_strided_slice %51 {offsets = [24, 0], sizes = [8, 16], strides = [1, 1]} : vector<32x16xf32> to vector<8x16xf32>
    %67 = arith.negf %66 : vector<8x16xf32>
    %68 = math.exp %67 : vector<8x16xf32>
    %cst_18 = arith.constant 1.000000e+00 : f32
    %69 = vector.broadcast %cst_18 : f32 to vector<8x16xf32>
    %70 = arith.addf %69, %68 : vector<8x16xf32>
    %71 = arith.divf %69, %70 : vector<8x16xf32>
    %72 = arith.mulf %63, %43 : vector<8x16xf32>
    %73 = arith.mulf %57, %65 : vector<8x16xf32>
    %74 = arith.addf %72, %73 : vector<8x16xf32>
    %75 = math.tanh %74 : vector<8x16xf32>
    %76 = arith.mulf %71, %75 : vector<8x16xf32>
    %77 = vector.extract_strided_slice %1 {offsets = [1, 0], sizes = [1, 16], strides = [1, 1]} : vector<16x16xf32> to vector<1x16xf32>
    %78 = arith.subf %74, %43 : vector<8x16xf32>
    %79 = vector.broadcast %77 : vector<1x16xf32> to vector<8x16xf32>
    %80 = arith.mulf %79, %78 : vector<8x16xf32>
    %81 = arith.addf %43, %80 : vector<8x16xf32>
    %82 = arith.subf %76, %47 : vector<8x16xf32>
    %83 = vector.broadcast %77 : vector<1x16xf32> to vector<8x16xf32>
    %84 = arith.mulf %83, %82 : vector<8x16xf32>
    %85 = arith.addf %47, %84 : vector<8x16xf32>
    %cst_19 = arith.constant dense<0.000000e+00> : vector<32x16xf32>
    %86 = tpu.matmul %2, %85, %cst_19 {dimension_numbers = #tpu.dot_dimension_numbers<[1], [0], [0], [1], [0, 0, 1, 1], [], []>} : vector<32x8xf32>, vector<8x16xf32>, vector<32x16xf32> -> vector<32x16xf32>
    %87 = vector.extract_strided_slice %7 {offsets = [0, 2], sizes = [32, 1], strides = [1, 1]} : vector<32x16xf32> to vector<32x1xf32>
    %88 = vector.broadcast %87 : vector<32x1xf32> to vector<32x16xf32>
    %89 = arith.addf %86, %88 : vector<32x16xf32>
    %90 = vector.extract_strided_slice %89 {offsets = [0, 0], sizes = [8, 16], strides = [1, 1]} : vector<32x16xf32> to vector<8x16xf32>
    %91 = arith.negf %90 : vector<8x16xf32>
    %92 = math.exp %91 : vector<8x16xf32>
    %cst_20 = arith.constant 1.000000e+00 : f32
    %93 = vector.broadcast %cst_20 : f32 to vector<8x16xf32>
    %94 = arith.addf %93, %92 : vector<8x16xf32>
    %95 = arith.divf %93, %94 : vector<8x16xf32>
    %96 = vector.extract_strided_slice %89 {offsets = [8, 0], sizes = [8, 16], strides = [1, 1]} : vector<32x16xf32> to vector<8x16xf32>
    %97 = arith.negf %96 : vector<8x16xf32>
    %98 = math.exp %97 : vector<8x16xf32>
    %cst_21 = arith.constant 1.000000e+00 : f32
    %99 = vector.broadcast %cst_21 : f32 to vector<8x16xf32>
    %100 = arith.addf %99, %98 : vector<8x16xf32>
    %101 = arith.divf %99, %100 : vector<8x16xf32>
    %102 = vector.extract_strided_slice %89 {offsets = [16, 0], sizes = [8, 16], strides = [1, 1]} : vector<32x16xf32> to vector<8x16xf32>
    %103 = math.tanh %102 : vector<8x16xf32>
    %104 = vector.extract_strided_slice %89 {offsets = [24, 0], sizes = [8, 16], strides = [1, 1]} : vector<32x16xf32> to vector<8x16xf32>
    %105 = arith.negf %104 : vector<8x16xf32>
    %106 = math.exp %105 : vector<8x16xf32>
    %cst_22 = arith.constant 1.000000e+00 : f32
    %107 = vector.broadcast %cst_22 : f32 to vector<8x16xf32>
    %108 = arith.addf %107, %106 : vector<8x16xf32>
    %109 = arith.divf %107, %108 : vector<8x16xf32>
    %110 = arith.mulf %101, %81 : vector<8x16xf32>
    %111 = arith.mulf %95, %103 : vector<8x16xf32>
    %112 = arith.addf %110, %111 : vector<8x16xf32>
    %113 = math.tanh %112 : vector<8x16xf32>
    %114 = arith.mulf %109, %113 : vector<8x16xf32>
    %115 = vector.extract_strided_slice %1 {offsets = [2, 0], sizes = [1, 16], strides = [1, 1]} : vector<16x16xf32> to vector<1x16xf32>
    %116 = arith.subf %112, %81 : vector<8x16xf32>
    %117 = vector.broadcast %115 : vector<1x16xf32> to vector<8x16xf32>
    %118 = arith.mulf %117, %116 : vector<8x16xf32>
    %119 = arith.addf %81, %118 : vector<8x16xf32>
    %120 = arith.subf %114, %85 : vector<8x16xf32>
    %121 = vector.broadcast %115 : vector<1x16xf32> to vector<8x16xf32>
    %122 = arith.mulf %121, %120 : vector<8x16xf32>
    %123 = arith.addf %85, %122 : vector<8x16xf32>
    %cst_23 = arith.constant dense<0.000000e+00> : vector<32x16xf32>
    %124 = tpu.matmul %2, %123, %cst_23 {dimension_numbers = #tpu.dot_dimension_numbers<[1], [0], [0], [1], [0, 0, 1, 1], [], []>} : vector<32x8xf32>, vector<8x16xf32>, vector<32x16xf32> -> vector<32x16xf32>
    %125 = vector.extract_strided_slice %7 {offsets = [0, 3], sizes = [32, 1], strides = [1, 1]} : vector<32x16xf32> to vector<32x1xf32>
    %126 = vector.broadcast %125 : vector<32x1xf32> to vector<32x16xf32>
    %127 = arith.addf %124, %126 : vector<32x16xf32>
    %128 = vector.extract_strided_slice %127 {offsets = [0, 0], sizes = [8, 16], strides = [1, 1]} : vector<32x16xf32> to vector<8x16xf32>
    %129 = arith.negf %128 : vector<8x16xf32>
    %130 = math.exp %129 : vector<8x16xf32>
    %cst_24 = arith.constant 1.000000e+00 : f32
    %131 = vector.broadcast %cst_24 : f32 to vector<8x16xf32>
    %132 = arith.addf %131, %130 : vector<8x16xf32>
    %133 = arith.divf %131, %132 : vector<8x16xf32>
    %134 = vector.extract_strided_slice %127 {offsets = [8, 0], sizes = [8, 16], strides = [1, 1]} : vector<32x16xf32> to vector<8x16xf32>
    %135 = arith.negf %134 : vector<8x16xf32>
    %136 = math.exp %135 : vector<8x16xf32>
    %cst_25 = arith.constant 1.000000e+00 : f32
    %137 = vector.broadcast %cst_25 : f32 to vector<8x16xf32>
    %138 = arith.addf %137, %136 : vector<8x16xf32>
    %139 = arith.divf %137, %138 : vector<8x16xf32>
    %140 = vector.extract_strided_slice %127 {offsets = [16, 0], sizes = [8, 16], strides = [1, 1]} : vector<32x16xf32> to vector<8x16xf32>
    %141 = math.tanh %140 : vector<8x16xf32>
    %142 = vector.extract_strided_slice %127 {offsets = [24, 0], sizes = [8, 16], strides = [1, 1]} : vector<32x16xf32> to vector<8x16xf32>
    %143 = arith.negf %142 : vector<8x16xf32>
    %144 = math.exp %143 : vector<8x16xf32>
    %cst_26 = arith.constant 1.000000e+00 : f32
    %145 = vector.broadcast %cst_26 : f32 to vector<8x16xf32>
    %146 = arith.addf %145, %144 : vector<8x16xf32>
    %147 = arith.divf %145, %146 : vector<8x16xf32>
    %148 = arith.mulf %139, %119 : vector<8x16xf32>
    %149 = arith.mulf %133, %141 : vector<8x16xf32>
    %150 = arith.addf %148, %149 : vector<8x16xf32>
    %151 = math.tanh %150 : vector<8x16xf32>
    %152 = arith.mulf %147, %151 : vector<8x16xf32>
    %153 = vector.extract_strided_slice %1 {offsets = [3, 0], sizes = [1, 16], strides = [1, 1]} : vector<16x16xf32> to vector<1x16xf32>
    %154 = arith.subf %150, %119 : vector<8x16xf32>
    %155 = vector.broadcast %153 : vector<1x16xf32> to vector<8x16xf32>
    %156 = arith.mulf %155, %154 : vector<8x16xf32>
    %157 = arith.addf %119, %156 : vector<8x16xf32>
    %158 = arith.subf %152, %123 : vector<8x16xf32>
    %159 = vector.broadcast %153 : vector<1x16xf32> to vector<8x16xf32>
    %160 = arith.mulf %159, %158 : vector<8x16xf32>
    %161 = arith.addf %123, %160 : vector<8x16xf32>
    %cst_27 = arith.constant dense<0.000000e+00> : vector<32x16xf32>
    %162 = tpu.matmul %2, %161, %cst_27 {dimension_numbers = #tpu.dot_dimension_numbers<[1], [0], [0], [1], [0, 0, 1, 1], [], []>} : vector<32x8xf32>, vector<8x16xf32>, vector<32x16xf32> -> vector<32x16xf32>
    %163 = vector.extract_strided_slice %7 {offsets = [0, 4], sizes = [32, 1], strides = [1, 1]} : vector<32x16xf32> to vector<32x1xf32>
    %164 = vector.broadcast %163 : vector<32x1xf32> to vector<32x16xf32>
    %165 = arith.addf %162, %164 : vector<32x16xf32>
    %166 = vector.extract_strided_slice %165 {offsets = [0, 0], sizes = [8, 16], strides = [1, 1]} : vector<32x16xf32> to vector<8x16xf32>
    %167 = arith.negf %166 : vector<8x16xf32>
    %168 = math.exp %167 : vector<8x16xf32>
    %cst_28 = arith.constant 1.000000e+00 : f32
    %169 = vector.broadcast %cst_28 : f32 to vector<8x16xf32>
    %170 = arith.addf %169, %168 : vector<8x16xf32>
    %171 = arith.divf %169, %170 : vector<8x16xf32>
    %172 = vector.extract_strided_slice %165 {offsets = [8, 0], sizes = [8, 16], strides = [1, 1]} : vector<32x16xf32> to vector<8x16xf32>
    %173 = arith.negf %172 : vector<8x16xf32>
    %174 = math.exp %173 : vector<8x16xf32>
    %cst_29 = arith.constant 1.000000e+00 : f32
    %175 = vector.broadcast %cst_29 : f32 to vector<8x16xf32>
    %176 = arith.addf %175, %174 : vector<8x16xf32>
    %177 = arith.divf %175, %176 : vector<8x16xf32>
    %178 = vector.extract_strided_slice %165 {offsets = [16, 0], sizes = [8, 16], strides = [1, 1]} : vector<32x16xf32> to vector<8x16xf32>
    %179 = math.tanh %178 : vector<8x16xf32>
    %180 = vector.extract_strided_slice %165 {offsets = [24, 0], sizes = [8, 16], strides = [1, 1]} : vector<32x16xf32> to vector<8x16xf32>
    %181 = arith.negf %180 : vector<8x16xf32>
    %182 = math.exp %181 : vector<8x16xf32>
    %cst_30 = arith.constant 1.000000e+00 : f32
    %183 = vector.broadcast %cst_30 : f32 to vector<8x16xf32>
    %184 = arith.addf %183, %182 : vector<8x16xf32>
    %185 = arith.divf %183, %184 : vector<8x16xf32>
    %186 = arith.mulf %177, %157 : vector<8x16xf32>
    %187 = arith.mulf %171, %179 : vector<8x16xf32>
    %188 = arith.addf %186, %187 : vector<8x16xf32>
    %189 = math.tanh %188 : vector<8x16xf32>
    %190 = arith.mulf %185, %189 : vector<8x16xf32>
    %191 = vector.extract_strided_slice %1 {offsets = [4, 0], sizes = [1, 16], strides = [1, 1]} : vector<16x16xf32> to vector<1x16xf32>
    %192 = arith.subf %188, %157 : vector<8x16xf32>
    %193 = vector.broadcast %191 : vector<1x16xf32> to vector<8x16xf32>
    %194 = arith.mulf %193, %192 : vector<8x16xf32>
    %195 = arith.addf %157, %194 : vector<8x16xf32>
    %196 = arith.subf %190, %161 : vector<8x16xf32>
    %197 = vector.broadcast %191 : vector<1x16xf32> to vector<8x16xf32>
    %198 = arith.mulf %197, %196 : vector<8x16xf32>
    %199 = arith.addf %161, %198 : vector<8x16xf32>
    %cst_31 = arith.constant dense<0.000000e+00> : vector<32x16xf32>
    %200 = tpu.matmul %2, %199, %cst_31 {dimension_numbers = #tpu.dot_dimension_numbers<[1], [0], [0], [1], [0, 0, 1, 1], [], []>} : vector<32x8xf32>, vector<8x16xf32>, vector<32x16xf32> -> vector<32x16xf32>
    %201 = vector.extract_strided_slice %7 {offsets = [0, 5], sizes = [32, 1], strides = [1, 1]} : vector<32x16xf32> to vector<32x1xf32>
    %202 = vector.broadcast %201 : vector<32x1xf32> to vector<32x16xf32>
    %203 = arith.addf %200, %202 : vector<32x16xf32>
    %204 = vector.extract_strided_slice %203 {offsets = [0, 0], sizes = [8, 16], strides = [1, 1]} : vector<32x16xf32> to vector<8x16xf32>
    %205 = arith.negf %204 : vector<8x16xf32>
    %206 = math.exp %205 : vector<8x16xf32>
    %cst_32 = arith.constant 1.000000e+00 : f32
    %207 = vector.broadcast %cst_32 : f32 to vector<8x16xf32>
    %208 = arith.addf %207, %206 : vector<8x16xf32>
    %209 = arith.divf %207, %208 : vector<8x16xf32>
    %210 = vector.extract_strided_slice %203 {offsets = [8, 0], sizes = [8, 16], strides = [1, 1]} : vector<32x16xf32> to vector<8x16xf32>
    %211 = arith.negf %210 : vector<8x16xf32>
    %212 = math.exp %211 : vector<8x16xf32>
    %cst_33 = arith.constant 1.000000e+00 : f32
    %213 = vector.broadcast %cst_33 : f32 to vector<8x16xf32>
    %214 = arith.addf %213, %212 : vector<8x16xf32>
    %215 = arith.divf %213, %214 : vector<8x16xf32>
    %216 = vector.extract_strided_slice %203 {offsets = [16, 0], sizes = [8, 16], strides = [1, 1]} : vector<32x16xf32> to vector<8x16xf32>
    %217 = math.tanh %216 : vector<8x16xf32>
    %218 = vector.extract_strided_slice %203 {offsets = [24, 0], sizes = [8, 16], strides = [1, 1]} : vector<32x16xf32> to vector<8x16xf32>
    %219 = arith.negf %218 : vector<8x16xf32>
    %220 = math.exp %219 : vector<8x16xf32>
    %cst_34 = arith.constant 1.000000e+00 : f32
    %221 = vector.broadcast %cst_34 : f32 to vector<8x16xf32>
    %222 = arith.addf %221, %220 : vector<8x16xf32>
    %223 = arith.divf %221, %222 : vector<8x16xf32>
    %224 = arith.mulf %215, %195 : vector<8x16xf32>
    %225 = arith.mulf %209, %217 : vector<8x16xf32>
    %226 = arith.addf %224, %225 : vector<8x16xf32>
    %227 = math.tanh %226 : vector<8x16xf32>
    %228 = arith.mulf %223, %227 : vector<8x16xf32>
    %229 = vector.extract_strided_slice %1 {offsets = [5, 0], sizes = [1, 16], strides = [1, 1]} : vector<16x16xf32> to vector<1x16xf32>
    %230 = arith.subf %226, %195 : vector<8x16xf32>
    %231 = vector.broadcast %229 : vector<1x16xf32> to vector<8x16xf32>
    %232 = arith.mulf %231, %230 : vector<8x16xf32>
    %233 = arith.addf %195, %232 : vector<8x16xf32>
    %234 = arith.subf %228, %199 : vector<8x16xf32>
    %235 = vector.broadcast %229 : vector<1x16xf32> to vector<8x16xf32>
    %236 = arith.mulf %235, %234 : vector<8x16xf32>
    %237 = arith.addf %199, %236 : vector<8x16xf32>
    %cst_35 = arith.constant dense<0.000000e+00> : vector<32x16xf32>
    %238 = tpu.matmul %2, %237, %cst_35 {dimension_numbers = #tpu.dot_dimension_numbers<[1], [0], [0], [1], [0, 0, 1, 1], [], []>} : vector<32x8xf32>, vector<8x16xf32>, vector<32x16xf32> -> vector<32x16xf32>
    %239 = vector.extract_strided_slice %7 {offsets = [0, 6], sizes = [32, 1], strides = [1, 1]} : vector<32x16xf32> to vector<32x1xf32>
    %240 = vector.broadcast %239 : vector<32x1xf32> to vector<32x16xf32>
    %241 = arith.addf %238, %240 : vector<32x16xf32>
    %242 = vector.extract_strided_slice %241 {offsets = [0, 0], sizes = [8, 16], strides = [1, 1]} : vector<32x16xf32> to vector<8x16xf32>
    %243 = arith.negf %242 : vector<8x16xf32>
    %244 = math.exp %243 : vector<8x16xf32>
    %cst_36 = arith.constant 1.000000e+00 : f32
    %245 = vector.broadcast %cst_36 : f32 to vector<8x16xf32>
    %246 = arith.addf %245, %244 : vector<8x16xf32>
    %247 = arith.divf %245, %246 : vector<8x16xf32>
    %248 = vector.extract_strided_slice %241 {offsets = [8, 0], sizes = [8, 16], strides = [1, 1]} : vector<32x16xf32> to vector<8x16xf32>
    %249 = arith.negf %248 : vector<8x16xf32>
    %250 = math.exp %249 : vector<8x16xf32>
    %cst_37 = arith.constant 1.000000e+00 : f32
    %251 = vector.broadcast %cst_37 : f32 to vector<8x16xf32>
    %252 = arith.addf %251, %250 : vector<8x16xf32>
    %253 = arith.divf %251, %252 : vector<8x16xf32>
    %254 = vector.extract_strided_slice %241 {offsets = [16, 0], sizes = [8, 16], strides = [1, 1]} : vector<32x16xf32> to vector<8x16xf32>
    %255 = math.tanh %254 : vector<8x16xf32>
    %256 = vector.extract_strided_slice %241 {offsets = [24, 0], sizes = [8, 16], strides = [1, 1]} : vector<32x16xf32> to vector<8x16xf32>
    %257 = arith.negf %256 : vector<8x16xf32>
    %258 = math.exp %257 : vector<8x16xf32>
    %cst_38 = arith.constant 1.000000e+00 : f32
    %259 = vector.broadcast %cst_38 : f32 to vector<8x16xf32>
    %260 = arith.addf %259, %258 : vector<8x16xf32>
    %261 = arith.divf %259, %260 : vector<8x16xf32>
    %262 = arith.mulf %253, %233 : vector<8x16xf32>
    %263 = arith.mulf %247, %255 : vector<8x16xf32>
    %264 = arith.addf %262, %263 : vector<8x16xf32>
    %265 = math.tanh %264 : vector<8x16xf32>
    %266 = arith.mulf %261, %265 : vector<8x16xf32>
    %267 = vector.extract_strided_slice %1 {offsets = [6, 0], sizes = [1, 16], strides = [1, 1]} : vector<16x16xf32> to vector<1x16xf32>
    %268 = arith.subf %264, %233 : vector<8x16xf32>
    %269 = vector.broadcast %267 : vector<1x16xf32> to vector<8x16xf32>
    %270 = arith.mulf %269, %268 : vector<8x16xf32>
    %271 = arith.addf %233, %270 : vector<8x16xf32>
    %272 = arith.subf %266, %237 : vector<8x16xf32>
    %273 = vector.broadcast %267 : vector<1x16xf32> to vector<8x16xf32>
    %274 = arith.mulf %273, %272 : vector<8x16xf32>
    %275 = arith.addf %237, %274 : vector<8x16xf32>
    %cst_39 = arith.constant dense<0.000000e+00> : vector<32x16xf32>
    %276 = tpu.matmul %2, %275, %cst_39 {dimension_numbers = #tpu.dot_dimension_numbers<[1], [0], [0], [1], [0, 0, 1, 1], [], []>} : vector<32x8xf32>, vector<8x16xf32>, vector<32x16xf32> -> vector<32x16xf32>
    %277 = vector.extract_strided_slice %7 {offsets = [0, 7], sizes = [32, 1], strides = [1, 1]} : vector<32x16xf32> to vector<32x1xf32>
    %278 = vector.broadcast %277 : vector<32x1xf32> to vector<32x16xf32>
    %279 = arith.addf %276, %278 : vector<32x16xf32>
    %280 = vector.extract_strided_slice %279 {offsets = [0, 0], sizes = [8, 16], strides = [1, 1]} : vector<32x16xf32> to vector<8x16xf32>
    %281 = arith.negf %280 : vector<8x16xf32>
    %282 = math.exp %281 : vector<8x16xf32>
    %cst_40 = arith.constant 1.000000e+00 : f32
    %283 = vector.broadcast %cst_40 : f32 to vector<8x16xf32>
    %284 = arith.addf %283, %282 : vector<8x16xf32>
    %285 = arith.divf %283, %284 : vector<8x16xf32>
    %286 = vector.extract_strided_slice %279 {offsets = [8, 0], sizes = [8, 16], strides = [1, 1]} : vector<32x16xf32> to vector<8x16xf32>
    %287 = arith.negf %286 : vector<8x16xf32>
    %288 = math.exp %287 : vector<8x16xf32>
    %cst_41 = arith.constant 1.000000e+00 : f32
    %289 = vector.broadcast %cst_41 : f32 to vector<8x16xf32>
    %290 = arith.addf %289, %288 : vector<8x16xf32>
    %291 = arith.divf %289, %290 : vector<8x16xf32>
    %292 = vector.extract_strided_slice %279 {offsets = [16, 0], sizes = [8, 16], strides = [1, 1]} : vector<32x16xf32> to vector<8x16xf32>
    %293 = math.tanh %292 : vector<8x16xf32>
    %294 = vector.extract_strided_slice %279 {offsets = [24, 0], sizes = [8, 16], strides = [1, 1]} : vector<32x16xf32> to vector<8x16xf32>
    %295 = arith.negf %294 : vector<8x16xf32>
    %296 = math.exp %295 : vector<8x16xf32>
    %cst_42 = arith.constant 1.000000e+00 : f32
    %297 = vector.broadcast %cst_42 : f32 to vector<8x16xf32>
    %298 = arith.addf %297, %296 : vector<8x16xf32>
    %299 = arith.divf %297, %298 : vector<8x16xf32>
    %300 = arith.mulf %291, %271 : vector<8x16xf32>
    %301 = arith.mulf %285, %293 : vector<8x16xf32>
    %302 = arith.addf %300, %301 : vector<8x16xf32>
    %303 = math.tanh %302 : vector<8x16xf32>
    %304 = arith.mulf %299, %303 : vector<8x16xf32>
    %305 = vector.extract_strided_slice %1 {offsets = [7, 0], sizes = [1, 16], strides = [1, 1]} : vector<16x16xf32> to vector<1x16xf32>
    %306 = arith.subf %302, %271 : vector<8x16xf32>
    %307 = vector.broadcast %305 : vector<1x16xf32> to vector<8x16xf32>
    %308 = arith.mulf %307, %306 : vector<8x16xf32>
    %309 = arith.addf %271, %308 : vector<8x16xf32>
    %310 = arith.subf %304, %275 : vector<8x16xf32>
    %311 = vector.broadcast %305 : vector<1x16xf32> to vector<8x16xf32>
    %312 = arith.mulf %311, %310 : vector<8x16xf32>
    %313 = arith.addf %275, %312 : vector<8x16xf32>
    %cst_43 = arith.constant dense<0.000000e+00> : vector<32x16xf32>
    %314 = tpu.matmul %2, %313, %cst_43 {dimension_numbers = #tpu.dot_dimension_numbers<[1], [0], [0], [1], [0, 0, 1, 1], [], []>} : vector<32x8xf32>, vector<8x16xf32>, vector<32x16xf32> -> vector<32x16xf32>
    %315 = vector.extract_strided_slice %7 {offsets = [0, 8], sizes = [32, 1], strides = [1, 1]} : vector<32x16xf32> to vector<32x1xf32>
    %316 = vector.broadcast %315 : vector<32x1xf32> to vector<32x16xf32>
    %317 = arith.addf %314, %316 : vector<32x16xf32>
    %318 = vector.extract_strided_slice %317 {offsets = [0, 0], sizes = [8, 16], strides = [1, 1]} : vector<32x16xf32> to vector<8x16xf32>
    %319 = arith.negf %318 : vector<8x16xf32>
    %320 = math.exp %319 : vector<8x16xf32>
    %cst_44 = arith.constant 1.000000e+00 : f32
    %321 = vector.broadcast %cst_44 : f32 to vector<8x16xf32>
    %322 = arith.addf %321, %320 : vector<8x16xf32>
    %323 = arith.divf %321, %322 : vector<8x16xf32>
    %324 = vector.extract_strided_slice %317 {offsets = [8, 0], sizes = [8, 16], strides = [1, 1]} : vector<32x16xf32> to vector<8x16xf32>
    %325 = arith.negf %324 : vector<8x16xf32>
    %326 = math.exp %325 : vector<8x16xf32>
    %cst_45 = arith.constant 1.000000e+00 : f32
    %327 = vector.broadcast %cst_45 : f32 to vector<8x16xf32>
    %328 = arith.addf %327, %326 : vector<8x16xf32>
    %329 = arith.divf %327, %328 : vector<8x16xf32>
    %330 = vector.extract_strided_slice %317 {offsets = [16, 0], sizes = [8, 16], strides = [1, 1]} : vector<32x16xf32> to vector<8x16xf32>
    %331 = math.tanh %330 : vector<8x16xf32>
    %332 = vector.extract_strided_slice %317 {offsets = [24, 0], sizes = [8, 16], strides = [1, 1]} : vector<32x16xf32> to vector<8x16xf32>
    %333 = arith.negf %332 : vector<8x16xf32>
    %334 = math.exp %333 : vector<8x16xf32>
    %cst_46 = arith.constant 1.000000e+00 : f32
    %335 = vector.broadcast %cst_46 : f32 to vector<8x16xf32>
    %336 = arith.addf %335, %334 : vector<8x16xf32>
    %337 = arith.divf %335, %336 : vector<8x16xf32>
    %338 = arith.mulf %329, %309 : vector<8x16xf32>
    %339 = arith.mulf %323, %331 : vector<8x16xf32>
    %340 = arith.addf %338, %339 : vector<8x16xf32>
    %341 = math.tanh %340 : vector<8x16xf32>
    %342 = arith.mulf %337, %341 : vector<8x16xf32>
    %343 = vector.extract_strided_slice %1 {offsets = [8, 0], sizes = [1, 16], strides = [1, 1]} : vector<16x16xf32> to vector<1x16xf32>
    %344 = arith.subf %340, %309 : vector<8x16xf32>
    %345 = vector.broadcast %343 : vector<1x16xf32> to vector<8x16xf32>
    %346 = arith.mulf %345, %344 : vector<8x16xf32>
    %347 = arith.addf %309, %346 : vector<8x16xf32>
    %348 = arith.subf %342, %313 : vector<8x16xf32>
    %349 = vector.broadcast %343 : vector<1x16xf32> to vector<8x16xf32>
    %350 = arith.mulf %349, %348 : vector<8x16xf32>
    %351 = arith.addf %313, %350 : vector<8x16xf32>
    %cst_47 = arith.constant dense<0.000000e+00> : vector<32x16xf32>
    %352 = tpu.matmul %2, %351, %cst_47 {dimension_numbers = #tpu.dot_dimension_numbers<[1], [0], [0], [1], [0, 0, 1, 1], [], []>} : vector<32x8xf32>, vector<8x16xf32>, vector<32x16xf32> -> vector<32x16xf32>
    %353 = vector.extract_strided_slice %7 {offsets = [0, 9], sizes = [32, 1], strides = [1, 1]} : vector<32x16xf32> to vector<32x1xf32>
    %354 = vector.broadcast %353 : vector<32x1xf32> to vector<32x16xf32>
    %355 = arith.addf %352, %354 : vector<32x16xf32>
    %356 = vector.extract_strided_slice %355 {offsets = [0, 0], sizes = [8, 16], strides = [1, 1]} : vector<32x16xf32> to vector<8x16xf32>
    %357 = arith.negf %356 : vector<8x16xf32>
    %358 = math.exp %357 : vector<8x16xf32>
    %cst_48 = arith.constant 1.000000e+00 : f32
    %359 = vector.broadcast %cst_48 : f32 to vector<8x16xf32>
    %360 = arith.addf %359, %358 : vector<8x16xf32>
    %361 = arith.divf %359, %360 : vector<8x16xf32>
    %362 = vector.extract_strided_slice %355 {offsets = [8, 0], sizes = [8, 16], strides = [1, 1]} : vector<32x16xf32> to vector<8x16xf32>
    %363 = arith.negf %362 : vector<8x16xf32>
    %364 = math.exp %363 : vector<8x16xf32>
    %cst_49 = arith.constant 1.000000e+00 : f32
    %365 = vector.broadcast %cst_49 : f32 to vector<8x16xf32>
    %366 = arith.addf %365, %364 : vector<8x16xf32>
    %367 = arith.divf %365, %366 : vector<8x16xf32>
    %368 = vector.extract_strided_slice %355 {offsets = [16, 0], sizes = [8, 16], strides = [1, 1]} : vector<32x16xf32> to vector<8x16xf32>
    %369 = math.tanh %368 : vector<8x16xf32>
    %370 = vector.extract_strided_slice %355 {offsets = [24, 0], sizes = [8, 16], strides = [1, 1]} : vector<32x16xf32> to vector<8x16xf32>
    %371 = arith.negf %370 : vector<8x16xf32>
    %372 = math.exp %371 : vector<8x16xf32>
    %cst_50 = arith.constant 1.000000e+00 : f32
    %373 = vector.broadcast %cst_50 : f32 to vector<8x16xf32>
    %374 = arith.addf %373, %372 : vector<8x16xf32>
    %375 = arith.divf %373, %374 : vector<8x16xf32>
    %376 = arith.mulf %367, %347 : vector<8x16xf32>
    %377 = arith.mulf %361, %369 : vector<8x16xf32>
    %378 = arith.addf %376, %377 : vector<8x16xf32>
    %379 = math.tanh %378 : vector<8x16xf32>
    %380 = arith.mulf %375, %379 : vector<8x16xf32>
    %381 = vector.extract_strided_slice %1 {offsets = [9, 0], sizes = [1, 16], strides = [1, 1]} : vector<16x16xf32> to vector<1x16xf32>
    %382 = arith.subf %378, %347 : vector<8x16xf32>
    %383 = vector.broadcast %381 : vector<1x16xf32> to vector<8x16xf32>
    %384 = arith.mulf %383, %382 : vector<8x16xf32>
    %385 = arith.addf %347, %384 : vector<8x16xf32>
    %386 = arith.subf %380, %351 : vector<8x16xf32>
    %387 = vector.broadcast %381 : vector<1x16xf32> to vector<8x16xf32>
    %388 = arith.mulf %387, %386 : vector<8x16xf32>
    %389 = arith.addf %351, %388 : vector<8x16xf32>
    %cst_51 = arith.constant dense<0.000000e+00> : vector<32x16xf32>
    %390 = tpu.matmul %2, %389, %cst_51 {dimension_numbers = #tpu.dot_dimension_numbers<[1], [0], [0], [1], [0, 0, 1, 1], [], []>} : vector<32x8xf32>, vector<8x16xf32>, vector<32x16xf32> -> vector<32x16xf32>
    %391 = vector.extract_strided_slice %7 {offsets = [0, 10], sizes = [32, 1], strides = [1, 1]} : vector<32x16xf32> to vector<32x1xf32>
    %392 = vector.broadcast %391 : vector<32x1xf32> to vector<32x16xf32>
    %393 = arith.addf %390, %392 : vector<32x16xf32>
    %394 = vector.extract_strided_slice %393 {offsets = [0, 0], sizes = [8, 16], strides = [1, 1]} : vector<32x16xf32> to vector<8x16xf32>
    %395 = arith.negf %394 : vector<8x16xf32>
    %396 = math.exp %395 : vector<8x16xf32>
    %cst_52 = arith.constant 1.000000e+00 : f32
    %397 = vector.broadcast %cst_52 : f32 to vector<8x16xf32>
    %398 = arith.addf %397, %396 : vector<8x16xf32>
    %399 = arith.divf %397, %398 : vector<8x16xf32>
    %400 = vector.extract_strided_slice %393 {offsets = [8, 0], sizes = [8, 16], strides = [1, 1]} : vector<32x16xf32> to vector<8x16xf32>
    %401 = arith.negf %400 : vector<8x16xf32>
    %402 = math.exp %401 : vector<8x16xf32>
    %cst_53 = arith.constant 1.000000e+00 : f32
    %403 = vector.broadcast %cst_53 : f32 to vector<8x16xf32>
    %404 = arith.addf %403, %402 : vector<8x16xf32>
    %405 = arith.divf %403, %404 : vector<8x16xf32>
    %406 = vector.extract_strided_slice %393 {offsets = [16, 0], sizes = [8, 16], strides = [1, 1]} : vector<32x16xf32> to vector<8x16xf32>
    %407 = math.tanh %406 : vector<8x16xf32>
    %408 = vector.extract_strided_slice %393 {offsets = [24, 0], sizes = [8, 16], strides = [1, 1]} : vector<32x16xf32> to vector<8x16xf32>
    %409 = arith.negf %408 : vector<8x16xf32>
    %410 = math.exp %409 : vector<8x16xf32>
    %cst_54 = arith.constant 1.000000e+00 : f32
    %411 = vector.broadcast %cst_54 : f32 to vector<8x16xf32>
    %412 = arith.addf %411, %410 : vector<8x16xf32>
    %413 = arith.divf %411, %412 : vector<8x16xf32>
    %414 = arith.mulf %405, %385 : vector<8x16xf32>
    %415 = arith.mulf %399, %407 : vector<8x16xf32>
    %416 = arith.addf %414, %415 : vector<8x16xf32>
    %417 = math.tanh %416 : vector<8x16xf32>
    %418 = arith.mulf %413, %417 : vector<8x16xf32>
    %419 = vector.extract_strided_slice %1 {offsets = [10, 0], sizes = [1, 16], strides = [1, 1]} : vector<16x16xf32> to vector<1x16xf32>
    %420 = arith.subf %416, %385 : vector<8x16xf32>
    %421 = vector.broadcast %419 : vector<1x16xf32> to vector<8x16xf32>
    %422 = arith.mulf %421, %420 : vector<8x16xf32>
    %423 = arith.addf %385, %422 : vector<8x16xf32>
    %424 = arith.subf %418, %389 : vector<8x16xf32>
    %425 = vector.broadcast %419 : vector<1x16xf32> to vector<8x16xf32>
    %426 = arith.mulf %425, %424 : vector<8x16xf32>
    %427 = arith.addf %389, %426 : vector<8x16xf32>
    %cst_55 = arith.constant dense<0.000000e+00> : vector<32x16xf32>
    %428 = tpu.matmul %2, %427, %cst_55 {dimension_numbers = #tpu.dot_dimension_numbers<[1], [0], [0], [1], [0, 0, 1, 1], [], []>} : vector<32x8xf32>, vector<8x16xf32>, vector<32x16xf32> -> vector<32x16xf32>
    %429 = vector.extract_strided_slice %7 {offsets = [0, 11], sizes = [32, 1], strides = [1, 1]} : vector<32x16xf32> to vector<32x1xf32>
    %430 = vector.broadcast %429 : vector<32x1xf32> to vector<32x16xf32>
    %431 = arith.addf %428, %430 : vector<32x16xf32>
    %432 = vector.extract_strided_slice %431 {offsets = [0, 0], sizes = [8, 16], strides = [1, 1]} : vector<32x16xf32> to vector<8x16xf32>
    %433 = arith.negf %432 : vector<8x16xf32>
    %434 = math.exp %433 : vector<8x16xf32>
    %cst_56 = arith.constant 1.000000e+00 : f32
    %435 = vector.broadcast %cst_56 : f32 to vector<8x16xf32>
    %436 = arith.addf %435, %434 : vector<8x16xf32>
    %437 = arith.divf %435, %436 : vector<8x16xf32>
    %438 = vector.extract_strided_slice %431 {offsets = [8, 0], sizes = [8, 16], strides = [1, 1]} : vector<32x16xf32> to vector<8x16xf32>
    %439 = arith.negf %438 : vector<8x16xf32>
    %440 = math.exp %439 : vector<8x16xf32>
    %cst_57 = arith.constant 1.000000e+00 : f32
    %441 = vector.broadcast %cst_57 : f32 to vector<8x16xf32>
    %442 = arith.addf %441, %440 : vector<8x16xf32>
    %443 = arith.divf %441, %442 : vector<8x16xf32>
    %444 = vector.extract_strided_slice %431 {offsets = [16, 0], sizes = [8, 16], strides = [1, 1]} : vector<32x16xf32> to vector<8x16xf32>
    %445 = math.tanh %444 : vector<8x16xf32>
    %446 = vector.extract_strided_slice %431 {offsets = [24, 0], sizes = [8, 16], strides = [1, 1]} : vector<32x16xf32> to vector<8x16xf32>
    %447 = arith.negf %446 : vector<8x16xf32>
    %448 = math.exp %447 : vector<8x16xf32>
    %cst_58 = arith.constant 1.000000e+00 : f32
    %449 = vector.broadcast %cst_58 : f32 to vector<8x16xf32>
    %450 = arith.addf %449, %448 : vector<8x16xf32>
    %451 = arith.divf %449, %450 : vector<8x16xf32>
    %452 = arith.mulf %443, %423 : vector<8x16xf32>
    %453 = arith.mulf %437, %445 : vector<8x16xf32>
    %454 = arith.addf %452, %453 : vector<8x16xf32>
    %455 = math.tanh %454 : vector<8x16xf32>
    %456 = arith.mulf %451, %455 : vector<8x16xf32>
    %457 = vector.extract_strided_slice %1 {offsets = [11, 0], sizes = [1, 16], strides = [1, 1]} : vector<16x16xf32> to vector<1x16xf32>
    %458 = arith.subf %454, %423 : vector<8x16xf32>
    %459 = vector.broadcast %457 : vector<1x16xf32> to vector<8x16xf32>
    %460 = arith.mulf %459, %458 : vector<8x16xf32>
    %461 = arith.addf %423, %460 : vector<8x16xf32>
    %462 = arith.subf %456, %427 : vector<8x16xf32>
    %463 = vector.broadcast %457 : vector<1x16xf32> to vector<8x16xf32>
    %464 = arith.mulf %463, %462 : vector<8x16xf32>
    %465 = arith.addf %427, %464 : vector<8x16xf32>
    %cst_59 = arith.constant dense<0.000000e+00> : vector<32x16xf32>
    %466 = tpu.matmul %2, %465, %cst_59 {dimension_numbers = #tpu.dot_dimension_numbers<[1], [0], [0], [1], [0, 0, 1, 1], [], []>} : vector<32x8xf32>, vector<8x16xf32>, vector<32x16xf32> -> vector<32x16xf32>
    %467 = vector.extract_strided_slice %7 {offsets = [0, 12], sizes = [32, 1], strides = [1, 1]} : vector<32x16xf32> to vector<32x1xf32>
    %468 = vector.broadcast %467 : vector<32x1xf32> to vector<32x16xf32>
    %469 = arith.addf %466, %468 : vector<32x16xf32>
    %470 = vector.extract_strided_slice %469 {offsets = [0, 0], sizes = [8, 16], strides = [1, 1]} : vector<32x16xf32> to vector<8x16xf32>
    %471 = arith.negf %470 : vector<8x16xf32>
    %472 = math.exp %471 : vector<8x16xf32>
    %cst_60 = arith.constant 1.000000e+00 : f32
    %473 = vector.broadcast %cst_60 : f32 to vector<8x16xf32>
    %474 = arith.addf %473, %472 : vector<8x16xf32>
    %475 = arith.divf %473, %474 : vector<8x16xf32>
    %476 = vector.extract_strided_slice %469 {offsets = [8, 0], sizes = [8, 16], strides = [1, 1]} : vector<32x16xf32> to vector<8x16xf32>
    %477 = arith.negf %476 : vector<8x16xf32>
    %478 = math.exp %477 : vector<8x16xf32>
    %cst_61 = arith.constant 1.000000e+00 : f32
    %479 = vector.broadcast %cst_61 : f32 to vector<8x16xf32>
    %480 = arith.addf %479, %478 : vector<8x16xf32>
    %481 = arith.divf %479, %480 : vector<8x16xf32>
    %482 = vector.extract_strided_slice %469 {offsets = [16, 0], sizes = [8, 16], strides = [1, 1]} : vector<32x16xf32> to vector<8x16xf32>
    %483 = math.tanh %482 : vector<8x16xf32>
    %484 = vector.extract_strided_slice %469 {offsets = [24, 0], sizes = [8, 16], strides = [1, 1]} : vector<32x16xf32> to vector<8x16xf32>
    %485 = arith.negf %484 : vector<8x16xf32>
    %486 = math.exp %485 : vector<8x16xf32>
    %cst_62 = arith.constant 1.000000e+00 : f32
    %487 = vector.broadcast %cst_62 : f32 to vector<8x16xf32>
    %488 = arith.addf %487, %486 : vector<8x16xf32>
    %489 = arith.divf %487, %488 : vector<8x16xf32>
    %490 = arith.mulf %481, %461 : vector<8x16xf32>
    %491 = arith.mulf %475, %483 : vector<8x16xf32>
    %492 = arith.addf %490, %491 : vector<8x16xf32>
    %493 = math.tanh %492 : vector<8x16xf32>
    %494 = arith.mulf %489, %493 : vector<8x16xf32>
    %495 = vector.extract_strided_slice %1 {offsets = [12, 0], sizes = [1, 16], strides = [1, 1]} : vector<16x16xf32> to vector<1x16xf32>
    %496 = arith.subf %492, %461 : vector<8x16xf32>
    %497 = vector.broadcast %495 : vector<1x16xf32> to vector<8x16xf32>
    %498 = arith.mulf %497, %496 : vector<8x16xf32>
    %499 = arith.addf %461, %498 : vector<8x16xf32>
    %500 = arith.subf %494, %465 : vector<8x16xf32>
    %501 = vector.broadcast %495 : vector<1x16xf32> to vector<8x16xf32>
    %502 = arith.mulf %501, %500 : vector<8x16xf32>
    %503 = arith.addf %465, %502 : vector<8x16xf32>
    %cst_63 = arith.constant dense<0.000000e+00> : vector<32x16xf32>
    %504 = tpu.matmul %2, %503, %cst_63 {dimension_numbers = #tpu.dot_dimension_numbers<[1], [0], [0], [1], [0, 0, 1, 1], [], []>} : vector<32x8xf32>, vector<8x16xf32>, vector<32x16xf32> -> vector<32x16xf32>
    %505 = vector.extract_strided_slice %7 {offsets = [0, 13], sizes = [32, 1], strides = [1, 1]} : vector<32x16xf32> to vector<32x1xf32>
    %506 = vector.broadcast %505 : vector<32x1xf32> to vector<32x16xf32>
    %507 = arith.addf %504, %506 : vector<32x16xf32>
    %508 = vector.extract_strided_slice %507 {offsets = [0, 0], sizes = [8, 16], strides = [1, 1]} : vector<32x16xf32> to vector<8x16xf32>
    %509 = arith.negf %508 : vector<8x16xf32>
    %510 = math.exp %509 : vector<8x16xf32>
    %cst_64 = arith.constant 1.000000e+00 : f32
    %511 = vector.broadcast %cst_64 : f32 to vector<8x16xf32>
    %512 = arith.addf %511, %510 : vector<8x16xf32>
    %513 = arith.divf %511, %512 : vector<8x16xf32>
    %514 = vector.extract_strided_slice %507 {offsets = [8, 0], sizes = [8, 16], strides = [1, 1]} : vector<32x16xf32> to vector<8x16xf32>
    %515 = arith.negf %514 : vector<8x16xf32>
    %516 = math.exp %515 : vector<8x16xf32>
    %cst_65 = arith.constant 1.000000e+00 : f32
    %517 = vector.broadcast %cst_65 : f32 to vector<8x16xf32>
    %518 = arith.addf %517, %516 : vector<8x16xf32>
    %519 = arith.divf %517, %518 : vector<8x16xf32>
    %520 = vector.extract_strided_slice %507 {offsets = [16, 0], sizes = [8, 16], strides = [1, 1]} : vector<32x16xf32> to vector<8x16xf32>
    %521 = math.tanh %520 : vector<8x16xf32>
    %522 = vector.extract_strided_slice %507 {offsets = [24, 0], sizes = [8, 16], strides = [1, 1]} : vector<32x16xf32> to vector<8x16xf32>
    %523 = arith.negf %522 : vector<8x16xf32>
    %524 = math.exp %523 : vector<8x16xf32>
    %cst_66 = arith.constant 1.000000e+00 : f32
    %525 = vector.broadcast %cst_66 : f32 to vector<8x16xf32>
    %526 = arith.addf %525, %524 : vector<8x16xf32>
    %527 = arith.divf %525, %526 : vector<8x16xf32>
    %528 = arith.mulf %519, %499 : vector<8x16xf32>
    %529 = arith.mulf %513, %521 : vector<8x16xf32>
    %530 = arith.addf %528, %529 : vector<8x16xf32>
    %531 = math.tanh %530 : vector<8x16xf32>
    %532 = arith.mulf %527, %531 : vector<8x16xf32>
    %533 = vector.extract_strided_slice %1 {offsets = [13, 0], sizes = [1, 16], strides = [1, 1]} : vector<16x16xf32> to vector<1x16xf32>
    %534 = arith.subf %530, %499 : vector<8x16xf32>
    %535 = vector.broadcast %533 : vector<1x16xf32> to vector<8x16xf32>
    %536 = arith.mulf %535, %534 : vector<8x16xf32>
    %537 = arith.addf %499, %536 : vector<8x16xf32>
    %538 = arith.subf %532, %503 : vector<8x16xf32>
    %539 = vector.broadcast %533 : vector<1x16xf32> to vector<8x16xf32>
    %540 = arith.mulf %539, %538 : vector<8x16xf32>
    %541 = arith.addf %503, %540 : vector<8x16xf32>
    %cst_67 = arith.constant dense<0.000000e+00> : vector<32x16xf32>
    %542 = tpu.matmul %2, %541, %cst_67 {dimension_numbers = #tpu.dot_dimension_numbers<[1], [0], [0], [1], [0, 0, 1, 1], [], []>} : vector<32x8xf32>, vector<8x16xf32>, vector<32x16xf32> -> vector<32x16xf32>
    %543 = vector.extract_strided_slice %7 {offsets = [0, 14], sizes = [32, 1], strides = [1, 1]} : vector<32x16xf32> to vector<32x1xf32>
    %544 = vector.broadcast %543 : vector<32x1xf32> to vector<32x16xf32>
    %545 = arith.addf %542, %544 : vector<32x16xf32>
    %546 = vector.extract_strided_slice %545 {offsets = [0, 0], sizes = [8, 16], strides = [1, 1]} : vector<32x16xf32> to vector<8x16xf32>
    %547 = arith.negf %546 : vector<8x16xf32>
    %548 = math.exp %547 : vector<8x16xf32>
    %cst_68 = arith.constant 1.000000e+00 : f32
    %549 = vector.broadcast %cst_68 : f32 to vector<8x16xf32>
    %550 = arith.addf %549, %548 : vector<8x16xf32>
    %551 = arith.divf %549, %550 : vector<8x16xf32>
    %552 = vector.extract_strided_slice %545 {offsets = [8, 0], sizes = [8, 16], strides = [1, 1]} : vector<32x16xf32> to vector<8x16xf32>
    %553 = arith.negf %552 : vector<8x16xf32>
    %554 = math.exp %553 : vector<8x16xf32>
    %cst_69 = arith.constant 1.000000e+00 : f32
    %555 = vector.broadcast %cst_69 : f32 to vector<8x16xf32>
    %556 = arith.addf %555, %554 : vector<8x16xf32>
    %557 = arith.divf %555, %556 : vector<8x16xf32>
    %558 = vector.extract_strided_slice %545 {offsets = [16, 0], sizes = [8, 16], strides = [1, 1]} : vector<32x16xf32> to vector<8x16xf32>
    %559 = math.tanh %558 : vector<8x16xf32>
    %560 = vector.extract_strided_slice %545 {offsets = [24, 0], sizes = [8, 16], strides = [1, 1]} : vector<32x16xf32> to vector<8x16xf32>
    %561 = arith.negf %560 : vector<8x16xf32>
    %562 = math.exp %561 : vector<8x16xf32>
    %cst_70 = arith.constant 1.000000e+00 : f32
    %563 = vector.broadcast %cst_70 : f32 to vector<8x16xf32>
    %564 = arith.addf %563, %562 : vector<8x16xf32>
    %565 = arith.divf %563, %564 : vector<8x16xf32>
    %566 = arith.mulf %557, %537 : vector<8x16xf32>
    %567 = arith.mulf %551, %559 : vector<8x16xf32>
    %568 = arith.addf %566, %567 : vector<8x16xf32>
    %569 = math.tanh %568 : vector<8x16xf32>
    %570 = arith.mulf %565, %569 : vector<8x16xf32>
    %571 = vector.extract_strided_slice %1 {offsets = [14, 0], sizes = [1, 16], strides = [1, 1]} : vector<16x16xf32> to vector<1x16xf32>
    %572 = arith.subf %568, %537 : vector<8x16xf32>
    %573 = vector.broadcast %571 : vector<1x16xf32> to vector<8x16xf32>
    %574 = arith.mulf %573, %572 : vector<8x16xf32>
    %575 = arith.addf %537, %574 : vector<8x16xf32>
    %576 = arith.subf %570, %541 : vector<8x16xf32>
    %577 = vector.broadcast %571 : vector<1x16xf32> to vector<8x16xf32>
    %578 = arith.mulf %577, %576 : vector<8x16xf32>
    %579 = arith.addf %541, %578 : vector<8x16xf32>
    %cst_71 = arith.constant dense<0.000000e+00> : vector<32x16xf32>
    %580 = tpu.matmul %2, %579, %cst_71 {dimension_numbers = #tpu.dot_dimension_numbers<[1], [0], [0], [1], [0, 0, 1, 1], [], []>} : vector<32x8xf32>, vector<8x16xf32>, vector<32x16xf32> -> vector<32x16xf32>
    %581 = vector.extract_strided_slice %7 {offsets = [0, 15], sizes = [32, 1], strides = [1, 1]} : vector<32x16xf32> to vector<32x1xf32>
    %582 = vector.broadcast %581 : vector<32x1xf32> to vector<32x16xf32>
    %583 = arith.addf %580, %582 : vector<32x16xf32>
    %584 = vector.extract_strided_slice %583 {offsets = [0, 0], sizes = [8, 16], strides = [1, 1]} : vector<32x16xf32> to vector<8x16xf32>
    %585 = arith.negf %584 : vector<8x16xf32>
    %586 = math.exp %585 : vector<8x16xf32>
    %cst_72 = arith.constant 1.000000e+00 : f32
    %587 = vector.broadcast %cst_72 : f32 to vector<8x16xf32>
    %588 = arith.addf %587, %586 : vector<8x16xf32>
    %589 = arith.divf %587, %588 : vector<8x16xf32>
    %590 = vector.extract_strided_slice %583 {offsets = [8, 0], sizes = [8, 16], strides = [1, 1]} : vector<32x16xf32> to vector<8x16xf32>
    %591 = arith.negf %590 : vector<8x16xf32>
    %592 = math.exp %591 : vector<8x16xf32>
    %cst_73 = arith.constant 1.000000e+00 : f32
    %593 = vector.broadcast %cst_73 : f32 to vector<8x16xf32>
    %594 = arith.addf %593, %592 : vector<8x16xf32>
    %595 = arith.divf %593, %594 : vector<8x16xf32>
    %596 = vector.extract_strided_slice %583 {offsets = [16, 0], sizes = [8, 16], strides = [1, 1]} : vector<32x16xf32> to vector<8x16xf32>
    %597 = math.tanh %596 : vector<8x16xf32>
    %598 = vector.extract_strided_slice %583 {offsets = [24, 0], sizes = [8, 16], strides = [1, 1]} : vector<32x16xf32> to vector<8x16xf32>
    %599 = arith.negf %598 : vector<8x16xf32>
    %600 = math.exp %599 : vector<8x16xf32>
    %cst_74 = arith.constant 1.000000e+00 : f32
    %601 = vector.broadcast %cst_74 : f32 to vector<8x16xf32>
    %602 = arith.addf %601, %600 : vector<8x16xf32>
    %603 = arith.divf %601, %602 : vector<8x16xf32>
    %604 = arith.mulf %595, %575 : vector<8x16xf32>
    %605 = arith.mulf %589, %597 : vector<8x16xf32>
    %606 = arith.addf %604, %605 : vector<8x16xf32>
    %607 = math.tanh %606 : vector<8x16xf32>
    %608 = arith.mulf %603, %607 : vector<8x16xf32>
    %609 = vector.extract_strided_slice %1 {offsets = [15, 0], sizes = [1, 16], strides = [1, 1]} : vector<16x16xf32> to vector<1x16xf32>
    %610 = arith.subf %608, %579 : vector<8x16xf32>
    %611 = vector.broadcast %609 : vector<1x16xf32> to vector<8x16xf32>
    %612 = arith.mulf %611, %610 : vector<8x16xf32>
    %613 = arith.addf %579, %612 : vector<8x16xf32>
    %c0_75 = arith.constant 0 : index
    %c0_76 = arith.constant 0 : index
    %614 = vector.load %arg5[%c0_75, %c0_76] : memref<32x8xf32, #tpu.memory_space<vmem>>, vector<32x8xf32>
    %cst_77 = arith.constant dense<0.000000e+00> : vector<32x16xf32>
    %615 = tpu.matmul %614, %0, %cst_77 {dimension_numbers = #tpu.dot_dimension_numbers<[1], [0], [0], [1], [0, 0, 1, 1], [], []>} : vector<32x8xf32>, vector<8x16xf32>, vector<32x16xf32> -> vector<32x16xf32>
    %c0_78 = arith.constant 0 : index
    %c0_79 = arith.constant 0 : index
    %616 = vector.load %arg6[%c0_78, %c0_79] : memref<32x8xf32, #tpu.memory_space<vmem>>, vector<32x8xf32>
    %cst_80 = arith.constant dense<0.000000e+00> : vector<32x16xf32>
    %617 = tpu.matmul %616, %613, %cst_80 {dimension_numbers = #tpu.dot_dimension_numbers<[1], [0], [0], [1], [0, 0, 1, 1], [], []>} : vector<32x8xf32>, vector<8x16xf32>, vector<32x16xf32> -> vector<32x16xf32>
    %618 = arith.addf %615, %617 : vector<32x16xf32>
    %c0_81 = arith.constant 0 : index
    %c0_82 = arith.constant 0 : index
    %619 = vector.load %arg7[%c0_81, %c0_82] : memref<32x1xf32, #tpu.memory_space<vmem>>, vector<32x1xf32>
    %620 = vector.broadcast %619 : vector<32x1xf32> to vector<32x16xf32>
    %621 = arith.addf %618, %620 : vector<32x16xf32>
    %cst_83 = arith.constant 0.000000e+00 : f32
    %622 = vector.broadcast %cst_83 : f32 to vector<32x16xf32>
    %623 = arith.maximumf %621, %622 : vector<32x16xf32>
    %cst_84 = arith.constant dense<0.000000e+00> : vector<16xf32>
    %624 = vector.multi_reduction <add>, %1, %cst_84 [1] : vector<16x16xf32> to vector<16xf32>
    %625 = vector.shape_cast %624 : vector<16xf32> to vector<16x1xf32>
    %cst_85 = arith.constant dense<0.000000e+00> : vector<16xf32>
    %626 = vector.multi_reduction <add>, %1, %cst_85 [0] : vector<16x16xf32> to vector<16xf32>
    %627 = vector.shape_cast %626 : vector<16xf32> to vector<1x16xf32>
    %cst_86 = arith.constant 0.000000e+00 : f32
    %628 = vector.broadcast %cst_86 : f32 to vector<16x1xf32>
    %629 = arith.cmpf ogt, %625, %628 : vector<16x1xf32>
    %630 = math.rsqrt %625 : vector<16x1xf32>
    %cst_87 = arith.constant 0.000000e+00 : f32
    %631 = vector.broadcast %cst_87 : f32 to vector<16x1xf32>
    %632 = arith.select %629, %630, %631 : vector<16x1xi1>, vector<16x1xf32>
    %cst_88 = arith.constant 0.000000e+00 : f32
    %633 = vector.broadcast %cst_88 : f32 to vector<1x16xf32>
    %634 = arith.cmpf ogt, %627, %633 : vector<1x16xf32>
    %635 = math.rsqrt %627 : vector<1x16xf32>
    %cst_89 = arith.constant 0.000000e+00 : f32
    %636 = vector.broadcast %cst_89 : f32 to vector<1x16xf32>
    %637 = arith.select %634, %635, %636 : vector<1x16xi1>, vector<1x16xf32>
    %638 = vector.broadcast %632 : vector<16x1xf32> to vector<16x16xf32>
    %639 = arith.mulf %1, %638 : vector<16x16xf32>
    %cst_90 = arith.constant dense<0.000000e+00> : vector<32x16xf32>
    %640 = tpu.matmul %623, %639, %cst_90 {dimension_numbers = #tpu.dot_dimension_numbers<[1], [0], [0], [1], [0, 0, 1, 1], [], []>} : vector<32x16xf32>, vector<16x16xf32>, vector<32x16xf32> -> vector<32x16xf32>
    %641 = vector.broadcast %637 : vector<1x16xf32> to vector<32x16xf32>
    %642 = arith.mulf %640, %641 : vector<32x16xf32>
    %c0_91 = arith.constant 0 : index
    %c0_92 = arith.constant 0 : index
    %643 = vector.load %arg8[%c0_91, %c0_92] : memref<32x32xf32, #tpu.memory_space<vmem>>, vector<32x32xf32>
    %cst_93 = arith.constant dense<0.000000e+00> : vector<32x16xf32>
    %644 = tpu.matmul %643, %642, %cst_93 {dimension_numbers = #tpu.dot_dimension_numbers<[1], [0], [0], [1], [0, 0, 1, 1], [], []>} : vector<32x32xf32>, vector<32x16xf32>, vector<32x16xf32> -> vector<32x16xf32>
    %c0_94 = arith.constant 0 : index
    %c0_95 = arith.constant 0 : index
    %645 = vector.load %arg9[%c0_94, %c0_95] : memref<32x1xf32, #tpu.memory_space<vmem>>, vector<32x1xf32>
    %646 = vector.broadcast %645 : vector<32x1xf32> to vector<32x16xf32>
    %647 = arith.addf %644, %646 : vector<32x16xf32>
    %cst_96 = arith.constant 0.000000e+00 : f32
    %648 = vector.broadcast %cst_96 : f32 to vector<32x16xf32>
    %649 = arith.maximumf %647, %648 : vector<32x16xf32>
    %c0_97 = arith.constant 0 : index
    %c0_98 = arith.constant 0 : index
    %650 = vector.load %arg10[%c0_97, %c0_98] : memref<96x32xf32, #tpu.memory_space<vmem>>, vector<96x32xf32>
    %cst_99 = arith.constant dense<0.000000e+00> : vector<96x16xf32>
    %651 = tpu.matmul %650, %649, %cst_99 {dimension_numbers = #tpu.dot_dimension_numbers<[1], [0], [0], [1], [0, 0, 1, 1], [], []>} : vector<96x32xf32>, vector<32x16xf32>, vector<96x16xf32> -> vector<96x16xf32>
    %c0_100 = arith.constant 0 : index
    %c0_101 = arith.constant 0 : index
    %652 = vector.load %arg11[%c0_100, %c0_101] : memref<96x1xf32, #tpu.memory_space<vmem>>, vector<96x1xf32>
    %653 = vector.broadcast %652 : vector<96x1xf32> to vector<96x16xf32>
    %654 = arith.addf %651, %653 : vector<96x16xf32>
    %c0_102 = arith.constant 0 : index
    %c0_103 = arith.constant 0 : index
    %655 = vector.load %arg12[%c0_102, %c0_103] : memref<96x1xf32, #tpu.memory_space<vmem>>, vector<96x1xf32>
    %656 = vector.extract_strided_slice %654 {offsets = [0, 0], sizes = [32, 16], strides = [1, 1]} : vector<96x16xf32> to vector<32x16xf32>
    %657 = vector.extract_strided_slice %655 {offsets = [0, 0], sizes = [32, 1], strides = [1, 1]} : vector<96x1xf32> to vector<32x1xf32>
    %658 = vector.broadcast %657 : vector<32x1xf32> to vector<32x16xf32>
    %659 = arith.addf %656, %658 : vector<32x16xf32>
    %660 = arith.negf %659 : vector<32x16xf32>
    %661 = math.exp %660 : vector<32x16xf32>
    %cst_104 = arith.constant 1.000000e+00 : f32
    %662 = vector.broadcast %cst_104 : f32 to vector<32x16xf32>
    %663 = arith.addf %662, %661 : vector<32x16xf32>
    %664 = arith.divf %662, %663 : vector<32x16xf32>
    %665 = vector.extract_strided_slice %654 {offsets = [32, 0], sizes = [32, 16], strides = [1, 1]} : vector<96x16xf32> to vector<32x16xf32>
    %666 = vector.extract_strided_slice %655 {offsets = [32, 0], sizes = [32, 1], strides = [1, 1]} : vector<96x1xf32> to vector<32x1xf32>
    %667 = vector.broadcast %666 : vector<32x1xf32> to vector<32x16xf32>
    %668 = arith.addf %665, %667 : vector<32x16xf32>
    %669 = arith.negf %668 : vector<32x16xf32>
    %670 = math.exp %669 : vector<32x16xf32>
    %cst_105 = arith.constant 1.000000e+00 : f32
    %671 = vector.broadcast %cst_105 : f32 to vector<32x16xf32>
    %672 = arith.addf %671, %670 : vector<32x16xf32>
    %673 = arith.divf %671, %672 : vector<32x16xf32>
    %674 = vector.extract_strided_slice %654 {offsets = [64, 0], sizes = [32, 16], strides = [1, 1]} : vector<96x16xf32> to vector<32x16xf32>
    %675 = vector.extract_strided_slice %655 {offsets = [64, 0], sizes = [32, 1], strides = [1, 1]} : vector<96x1xf32> to vector<32x1xf32>
    %676 = vector.broadcast %675 : vector<32x1xf32> to vector<32x16xf32>
    %677 = arith.mulf %664, %676 : vector<32x16xf32>
    %678 = arith.addf %674, %677 : vector<32x16xf32>
    %679 = math.tanh %678 : vector<32x16xf32>
    %cst_106 = arith.constant 1.000000e+00 : f32
    %680 = vector.broadcast %cst_106 : f32 to vector<32x16xf32>
    %681 = arith.subf %680, %673 : vector<32x16xf32>
    %682 = arith.mulf %681, %679 : vector<32x16xf32>
    %cst_107 = arith.constant dense<0.000000e+00> : vector<32xf32>
    %683 = vector.multi_reduction <add>, %682, %cst_107 [1] : vector<32x16xf32> to vector<32xf32>
    %684 = vector.shape_cast %683 : vector<32xf32> to vector<32x1xf32>
    %cst_108 = arith.constant 1.600000e+01 : f32
    %685 = vector.broadcast %cst_108 : f32 to vector<32x1xf32>
    %686 = arith.divf %684, %685 : vector<32x1xf32>
    %c0_109 = arith.constant 0 : index
    %c0_110 = arith.constant 0 : index
    %687 = vector.load %arg13[%c0_109, %c0_110] : memref<4x32xf32, #tpu.memory_space<vmem>>, vector<4x32xf32>
    %cst_111 = arith.constant dense<0.000000e+00> : vector<4x1xf32>
    %688 = tpu.matmul %687, %686, %cst_111 {dimension_numbers = #tpu.dot_dimension_numbers<[1], [0], [0], [1], [0, 0, 1, 1], [], []>} : vector<4x32xf32>, vector<32x1xf32>, vector<4x1xf32> -> vector<4x1xf32>
    %c0_112 = arith.constant 0 : index
    %c0_113 = arith.constant 0 : index
    %689 = vector.load %arg14[%c0_112, %c0_113] : memref<4x1xf32, #tpu.memory_space<vmem>>, vector<4x1xf32>
    %690 = arith.addf %688, %689 : vector<4x1xf32>
    %c0_114 = arith.constant 0 : index
    %c0_115 = arith.constant 0 : index
    %691 = vector.load %arg15[%c0_114, %c0_115] : memref<4x1xf32, #tpu.memory_space<vmem>>, vector<4x1xf32>
    tpu.vector_store %arg15[%c0_114, %c0_115], %690 {strides = array<i32>} : memref<4x1xf32, #tpu.memory_space<vmem>>, vector<4x1xf32>,
    return
  }
}

</mosaic_0001>

<bundles_post_ra>
// kernel: gcn_forward.1
= control target key start
LH: loop header
LB: loop body
LE: loop exit
PB: predicated region body
PF: predicated region fallthrough
CT: control target
= control target key end

     0   :  { %vm85_vm0 = vcmask 64512   ;;  %v4191_v3 = vmov 0   ;;  %v4192_v10 = vmov 0.0   ;;  %v4193_v27 = vmov 1   ;;  %s4876_s0 = inlined_call_operand.vmem [shape: f32[8,16], index: 0, kind: input, shape index: {}]   ;;  %s4877_s2 = inlined_call_operand.vmem [shape: f32[32,8], index: 2, kind: input, shape index: {}]   ;;  %s4878_s4 = inlined_call_operand.vmem [shape: f32[32,1], index: 4, kind: input, shape index: {}]   ;;  %s4879_s3 = inlined_call_operand.vmem [shape: f32[32,8], index: 3, kind: input, shape index: {}]   ;;  %s4880_s1 = inlined_call_operand.vmem [shape: f32[16,16], index: 1, kind: input, shape index: {}]   ;;  %s4881_s5 = inlined_call_operand.vmem [shape: f32[32,8], index: 5, kind: input, shape index: {}]   ;;  %s4882_s7 = inlined_call_operand.vmem [shape: f32[32,1], index: 7, kind: input, shape index: {}]   ;;  %s4883_s6 = inlined_call_operand.vmem [shape: f32[32,8], index: 6, kind: input, shape index: {}]   ;;  %s4884_s9 = inlined_call_operand.vmem [shape: f32[32,1], index: 9, kind: input, shape index: {}]   ;;  %s4885_s11 = inlined_call_operand.vmem [shape: f32[96,1], index: 11, kind: input, shape index: {}]   ;;  %s4886_s12 = inlined_call_operand.vmem [shape: f32[96,1], index: 12, kind: input, shape index: {}]   ;;  %s4887_s8 = inlined_call_operand.vmem [shape: f32[32,32], index: 8, kind: input, shape index: {}]   ;;  %s4888_s10 = inlined_call_operand.vmem [shape: f32[96,32], index: 10, kind: input, shape index: {}]   ;;  %s4889_s13 = inlined_call_operand.vmem [shape: f32[4,32], index: 13, kind: input, shape index: {}]   ;;  %s4890_s14 = inlined_call_operand.vmem [shape: f32[4,1], index: 14, kind: input, shape index: {}]   ;;  %s4891_s15 = inlined_call_operand.vmem [shape: f32[4,1], index: 15, kind: output, shape index: {}]  }
   0x1   :  { %v50_v0 = vld [vmem:[%s4876_s0] sm:$0xff]  ;;  %v58_v2 = vld [vmem:[%s4877_s2 + $0x8] sm:$0xff]  ;;  %3849 = vset.pattern.permute.xlu0 %v4191_v3  ;;  %3850 = vset.pattern.permute.xlu1 %v4191_v3  ;;  %v59_v4 = vld [vmem:[%s4877_s2 + $0x10] sm:$0xff]  ;;  %v4194_v28 = vmov 2   ;;  %v4195_v29 = vmov 3   ;;  %v4196_v30 = vmov 4   ;;  %v324_v61 = vlaneseq }
   0x2   :  { %v57_v1 = vld [vmem:[%s4877_s2] sm:$0xff]  ;;  %3618 = vmatprep.subr.mxu0 %v50_v0  ;;  %v63_v6 = vld [vmem:[%s4878_s4 + $0x10] sm:$0xff]  ;;  %v62_v7 = vld [vmem:[%s4878_s4 + $0x8] sm:$0xff]  ;;  %v4197_v31 = vmov 5   ;;  %v4198_v32 = vmov 6   ;;  %v4199_v33 = vmov 7  }
   0x3   :  { %3620 = vmatprep.mubr.msk.f32.mxu0 %vm85_vm0, %v57_v1  ;;  %v61_v5 = vld [vmem:[%s4878_s4] sm:$0xff]  ;;  %3619 = vmatpush3.msra.mxu0 %v50_v0  ;;  %v60_v8 = vld [vmem:[%s4877_s2 + $0x18] sm:$0xff]  ;;  %v4336_v12 = vld [vmem:[%s4879_s3 + $0x8] sm:$0xff]  ;;  %v4200_v34 = vmov 8   ;;  %v4201_v35 = vmov 9   ;;  %v4202_v36 = vmov 10  }
   0x4   :  { %67 = vperm.xlu0 %3849, %v61_v5   ;;  %3621 = vmatmul.mubr.msk.f32.vlgmr.msra.gmra.mxu0 %vm85_vm0, %v58_v2  ;;  %v64_v9 = vld [vmem:[%s4878_s4 + $0x18] sm:$0xff]  ;;  %v4325_v11 = vld [vmem:[%s4879_s3] sm:$0xff]  ;;  %v4341_v13 = vld [vmem:[%s4879_s3 + $0x10] sm:$0xff]  ;;  %v4203_v37 = vmov 11   ;;  %v4204_v38 = vmov 12   ;;  %v4205_v39 = vmov 13  }
   0x5   :  { %77 = vperm.xlu1 %3850, %v63_v6   ;;  %3623 = vmatprep.mubr.msk.f32.mxu0 %vm85_vm0, %v59_v4  ;;  %v4350_v14 = vld [vmem:[%s4879_s3 + $0x18] sm:$0xff]  ;;  %v4206_v40 = vmov 14   ;;  %v4207_v41 = vmov 15   ;;  %v4425_v62 = vshrl.u32 %v324_v61, 7  ;;  %v4432_v2 = vld [vmem:[%s4880_s1] sm:$0xff]  ;;  %vm2588_vm1 = vcmask 130048  }
   0x6   :  { %3626 = vmatprep.subr.mxu0 %v4192_v10  ;;  %3644 = vmatprep.mubr.msk.f32.mxu1 %vm85_vm0, %v4325_v11  ;;  %vm2742_vm4 = vcmask 261120   ;;  %vm4208_vm6 = vmmov 0   ;;  %vm3329_vm7 = vcmask 3072  }
   0x7   :  { %3627 = vmatpush3.msra.mxu0 %v4192_v10  ;;  %v326_v0 = vsub.s32 0, %v4425_v62 }
   0x8   :  { %72 = vperm.xlu0 %3849, %v62_v7   ;;  %3624 = vmatmul.mubr.msk.f32.gmra.mxu0 %vm85_vm0, %v60_v8 }
   0x9   :  { %82 = vperm.xlu1 %3850, %v64_v9   ;;  %3628 = vmatprep.mubr.msk.f32.mxu0 %vm85_vm0, %v4325_v11  ;;  %v327_v9 = vrot.slane %v4432_v2, %v326_v0 }
   0xc   :  { %3629 = vmatmul.mubr.msk.f32.vlgmr.msra.gmra.mxu0 %vm85_vm0, %v4336_v12 }
   0xd   :  { %3631 = vmatprep.mubr.msk.f32.mxu0 %vm85_vm0, %v4341_v13 }
  0x10   :  { %3632 = vmatmul.mubr.msk.f32.gmra.mxu0 %vm85_vm0, %v4350_v14 }
  0x11   :  { %3636 = vmatprep.mubr.msk.f32.mxu0 %vm85_vm0, %v4325_v11 }
  0x7f   :  { %v68_v15 = vpop.permute.xlu0 %67 }
  0x80   :  { %v78_v16 = vpop.permute.xlu1 %77 }
  0x83   :  { %v73_v17 = vpop.permute.xlu0 %72 }
  0x84   :  { %v83_v21 = vpop.permute.xlu1 %82 }
  0xc4   :  { %v3622_v18 = vpop.f32.mrf.mxu0 }
  0xc5   :  { %v4356_v19 = vadd.f32 %v3622_v18, %v73_v17 }
  0xc6   :  { %v164_v20 = vpop.f32.mrf.mxu0 }
  0xc7   :  { %v4358_v22 = vadd.f32 %v164_v20, %v68_v15  ;;  %190 = vperm.xlu1 %3850, %v4356_v19  }
  0xc8   :  { %v3625_v23 = vpop.f32.mrf.mxu0 }
  0xc9   :  { %v4361_v24 = vadd.f32 %v3625_v23, %v83_v21  ;;  %185 = vperm.xlu0 %3849, %v4358_v22  }
  0xca   :  { %v174_v25 = vpop.f32.mrf.mxu0 }
  0xcb   :  { %v4364_v26 = vadd.f32 %v174_v25, %v78_v16  ;;  %200 = vperm.xlu1 %3850, %v4361_v24  }
  0xcc   :  { %v3630_v42 = vpop.f32.mrf.mxu0 }
  0xcd   :  { %195 = vperm.xlu0 %3849, %v4364_v26  }
  0xce   :  { %v281_v45 = vpop.f32.mrf.mxu0 }
  0xcf   :  { %3852 = vset.pattern.permute.xlu1 %v4193_v27 }
  0xd0   :  { %337 = vperm.xlu1 %3852, %v4356_v19   ;;  %v3633_v51 = vpop.f32.mrf.mxu0 }
  0xd1   :  { %3851 = vset.pattern.permute.xlu0 %v4193_v27 }
  0xd2   :  { %333 = vperm.xlu0 %3851, %v4358_v22   ;;  %v291_v53 = vpop.f32.mrf.mxu0 }
  0xd4   :  { %341 = vperm.xlu1 %3852, %v4364_v26  }
  0xd6   :  { %345 = vperm.xlu0 %3851, %v4361_v24  }
  0xd8   :  { %3853 = vset.pattern.permute.xlu1 %v4194_v28 }
  0xd9   :  { %468 = vperm.xlu1 %3853, %v4358_v22  }
  0xda   :  { %3854 = vset.pattern.permute.xlu0 %v4194_v28 }
  0xdb   :  { %472 = vperm.xlu0 %3854, %v4356_v19  }
  0xdd   :  { %476 = vperm.xlu1 %3853, %v4364_v26  }
  0xdf   :  { %3855 = vset.pattern.permute.xlu0 %v4195_v29 }
  0xe0   :  { %603 = vperm.xlu0 %3855, %v4358_v22  }
  0xe1   :  { %480 = vperm.xlu1 %3853, %v4361_v24  }
  0xe4   :  { %615 = vperm.xlu0 %3855, %v4361_v24  }
  0xe5   :  { %3856 = vset.pattern.permute.xlu1 %v4195_v29 }
  0xe6   :  { %607 = vperm.xlu1 %3856, %v4356_v19  }
  0xe8   :  { %3858 = vset.pattern.permute.xlu0 %v4196_v30 }
  0xe9   :  { %742 = vperm.xlu0 %3858, %v4356_v19  }
  0xea   :  { %611 = vperm.xlu1 %3856, %v4364_v26  }
  0xed   :  { %3859 = vset.pattern.permute.xlu0 %v4197_v31 }
  0xee   :  { %3857 = vset.pattern.permute.xlu1 %v4196_v30  ;;  %873 = vperm.xlu0 %3859, %v4358_v22  }
  0xef   :  { %738 = vperm.xlu1 %3857, %v4358_v22  }
  0xf2   :  { %885 = vperm.xlu0 %3859, %v4361_v24  }
  0xf3   :  { %746 = vperm.xlu1 %3857, %v4364_v26  }
  0xf6   :  { %3862 = vset.pattern.permute.xlu0 %v4198_v32 }
  0xf7   :  { %750 = vperm.xlu1 %3857, %v4361_v24   ;;  %1012 = vperm.xlu0 %3862, %v4356_v19  }
  0xfb   :  { %3860 = vset.pattern.permute.xlu1 %v4197_v31  ;;  %3863 = vset.pattern.permute.xlu0 %v4199_v33 }
  0xfc   :  { %877 = vperm.xlu1 %3860, %v4356_v19   ;;  %1143 = vperm.xlu0 %3863, %v4358_v22  }
 0x100   :  { %881 = vperm.xlu1 %3860, %v4364_v26   ;;  %1155 = vperm.xlu0 %3863, %v4361_v24  }
 0x104   :  { %3861 = vset.pattern.permute.xlu1 %v4198_v32  ;;  %3866 = vset.pattern.permute.xlu0 %v4200_v34 }
 0x105   :  { %1008 = vperm.xlu1 %3861, %v4358_v22   ;;  %1282 = vperm.xlu0 %3866, %v4356_v19  }
 0x109   :  { %1016 = vperm.xlu1 %3861, %v4364_v26   ;;  %3867 = vset.pattern.permute.xlu0 %v4201_v35 }
 0x10a   :  { %1413 = vperm.xlu0 %3867, %v4358_v22  }
 0x10d   :  { %1020 = vperm.xlu1 %3861, %v4361_v24  }
 0x10e   :  { %1425 = vperm.xlu0 %3867, %v4361_v24  }
 0x111   :  { %3864 = vset.pattern.permute.xlu1 %v4199_v33 }
 0x112   :  { %1147 = vperm.xlu1 %3864, %v4356_v19   ;;  %3870 = vset.pattern.permute.xlu0 %v4202_v36 }
 0x113   :  { %1552 = vperm.xlu0 %3870, %v4356_v19  }
 0x116   :  { %1151 = vperm.xlu1 %3864, %v4364_v26  }
 0x117   :  { %3871 = vset.pattern.permute.xlu0 %v4203_v37 }
 0x118   :  { %1683 = vperm.xlu0 %3871, %v4358_v22  }
 0x11a   :  { %3865 = vset.pattern.permute.xlu1 %v4200_v34 }
 0x11b   :  { %1278 = vperm.xlu1 %3865, %v4358_v22  }
 0x11c   :  { %1695 = vperm.xlu0 %3871, %v4361_v24  }
 0x11f   :  { %1286 = vperm.xlu1 %3865, %v4364_v26  }
 0x120   :  { %3874 = vset.pattern.permute.xlu0 %v4204_v38 }
 0x121   :  { %1822 = vperm.xlu0 %3874, %v4356_v19  }
 0x123   :  { %1290 = vperm.xlu1 %3865, %v4361_v24  }
 0x125   :  { %3875 = vset.pattern.permute.xlu0 %v4205_v39 }
 0x126   :  { %1953 = vperm.xlu0 %3875, %v4358_v22  }
 0x127   :  { %3868 = vset.pattern.permute.xlu1 %v4201_v35 }
 0x128   :  { %1417 = vperm.xlu1 %3868, %v4356_v19  }
 0x12a   :  { %1965 = vperm.xlu0 %3875, %v4361_v24  }
 0x12c   :  { %1421 = vperm.xlu1 %3868, %v4364_v26  }
 0x12e   :  { %3878 = vset.pattern.permute.xlu0 %v4206_v40 }
 0x12f   :  { %2092 = vperm.xlu0 %3878, %v4356_v19  }
 0x130   :  { %3869 = vset.pattern.permute.xlu1 %v4202_v36 }
 0x131   :  { %1548 = vperm.xlu1 %3869, %v4358_v22  }
 0x133   :  { %3879 = vset.pattern.permute.xlu0 %v4207_v41 }
 0x134   :  { %2223 = vperm.xlu0 %3879, %v4358_v22  }
 0x135   :  { %1556 = vperm.xlu1 %3869, %v4364_v26  }
 0x138   :  { %2235 = vperm.xlu0 %3879, %v4361_v24  }
 0x139   :  { %1560 = vperm.xlu1 %3869, %v4361_v24  }
 0x13c   :  { %3881 = vset.pattern.permute.xlu0 %v4191_v3 }
 0x13d   :  { %3872 = vset.pattern.permute.xlu1 %v4203_v37 }
 0x13e   :  { %1687 = vperm.xlu1 %3872, %v4356_v19  }
 0x142   :  { %v191_v43 = vpop.permute.xlu1 %190  ;;  %1691 = vperm.xlu1 %3872, %v4364_v26  }
 0x143   :  { %v287_v44 = vadd.f32 %v3630_v42, %v191_v43  ;;  %v460_v42 = vsub.s32 1, %v4425_v62 }
 0x144   :  { %v186_v46 = vpop.permute.xlu0 %185 }
 0x145   :  { %v3344_v47 = vmul.f32 -1.442695, %v287_v44  ;;  %v282_v48 = vadd.f32 %v281_v45, %v186_v46 }
 0x146   :  { %3873 = vset.pattern.permute.xlu1 %v4204_v38  ;;  %v201_v50 = vpop.permute.xlu1 %200 }
 0x147   :  { %3883 = vpow2.f32 %v3344_v47  ;;  %v3343_v49 = vmul.f32 -1.442695, %v282_v48  ;;  %1818 = vperm.xlu1 %3873, %v4358_v22   ;;  %v297_v52 = vadd.f32 %v3633_v51, %v201_v50  ;;  %v461_v48 = vrot.slane %v4432_v2, %v460_v42 }
 0x148   :  { %v196_v54 = vpop.permute.xlu0 %195 }
 0x149   :  { %3885 = vpow2.f32 %v3343_v49  ;;  %v3345_v55 = vmul.f32 -1.442695, %v297_v52  ;;  %v292_v57 = vadd.f32 %v291_v53, %v196_v54 }
 0x14b   :  { %1826 = vperm.xlu1 %3873, %v4364_v26   ;;  %3887 = vpow2.f32 %v3345_v55 }
 0x14d   :  { %v334_v23 = vpop.permute.xlu0 %333 }
 0x14f   :  { %1830 = vperm.xlu1 %3873, %v4361_v24  }
 0x151   :  { %v346_v29 = vpop.permute.xlu0 %345 }
 0x153   :  { %3876 = vset.pattern.permute.xlu1 %v4205_v39 }
 0x154   :  { %v3884_v56 = vpop.eup %3883  ;;  %1957 = vperm.xlu1 %3876, %v4356_v19  }
 0x155   :  { %v309_v58 = vadd.f32 1.0, %v3884_v56 }
 0x156   :  { %v3886_v59 = vpop.eup %3885 }
 0x157   :  { %3889 = vrcp.f32 %v309_v58  ;;  %v303_v60 = vadd.f32 1.0, %v3886_v59  ;;  %v473_v59 = vpop.permute.xlu0 %472 }
 0x158   :  { %3891 = vtanh.f32 %v292_v57  ;;  %1961 = vperm.xlu1 %3876, %v4364_v26   ;;  %v3888_v63 = vpop.eup %3887 }
 0x159   :  { %3893 = vrcp.f32 %v303_v60  ;;  %v316_v6 = vadd.f32 1.0, %v3888_v63 }
 0x15b   :  { %3895 = vrcp.f32 %v316_v6 }
 0x15c   :  { %3877 = vset.pattern.permute.xlu1 %v4206_v40 }
 0x15d   :  { %2088 = vperm.xlu1 %3877, %v4358_v22  }
 0x161   :  { %2096 = vperm.xlu1 %3877, %v4364_v26  }
 0x164   :  { %v3890_v1 = vpop.eup %3889 }
 0x165   :  { %v3892_v4 = vpop.eup %3891  ;;  %2100 = vperm.xlu1 %3877, %v4361_v24   ;;  %v319_v7 = vmul.f32 0.0, %v3890_v1 }
 0x166   :  { %v3894_v5 = vpop.eup %3893 }
 0x167   :  { %v320_v8 = vmul.f32 %v3894_v5, %v3892_v4 }
 0x168   :  { %v3896_v17 = vpop.eup %3895 }
 0x169   :  { %3880 = vset.pattern.permute.xlu1 %v4207_v41  ;;  %v321_v15 = vadd.f32 %v320_v8, %v319_v7 }
 0x16a   :  { %2227 = vperm.xlu1 %3880, %v4356_v19   ;;  %v338_v19 = vpop.permute.xlu1 %337 }
 0x16b   :  { %3897 = vtanh.f32 %v321_v15  ;;  %v328_v16 = vmul.f32 %v327_v9, %v321_v15 }
 0x16e   :  { %2231 = vperm.xlu1 %3880, %v4364_v26   ;;  %v342_v33 = vpop.permute.xlu1 %341 }
 0x172   :  { %3882 = vset.pattern.permute.xlu1 %v4191_v3  ;;  %v469_v58 = vpop.permute.xlu1 %468 }
 0x176   :  { %v477_v5 = vpop.permute.xlu1 %476 }
 0x178   :  { %v3898_v18 = vpop.eup %3897 }
 0x179   :  { %v323_v20 = vmul.f32 %v3898_v18, %v3896_v17 }
 0x17a   :  { %v481_v8 = vpop.permute.xlu1 %480 }
 0x17b   :  { %v330_v21 = vmul.f32 %v327_v9, %v323_v20 }
 0x17d   :  { %3634 = vmatprep.subr.mxu0 %v330_v21 }
 0x17e   :  { %3635 = vmatpush3.msra.mxu0 %v330_v21 }
 0x17f   :  { %3637 = vmatmul.mubr.msk.f32.vlgmr.msra.gmra.mxu0 %vm85_vm0, %v4336_v12 }
 0x180   :  { %3639 = vmatprep.mubr.msk.f32.mxu0 %vm85_vm0, %v4341_v13 }
 0x183   :  { %3640 = vmatmul.mubr.msk.f32.gmra.mxu0 %vm85_vm0, %v4350_v14 }
 0x184   :  { %3652 = vmatprep.mubr.msk.f32.mxu0 %vm85_vm0, %v4325_v11 }
 0x23f   :  { %v3638_v3 = vpop.f32.mrf.mxu0 }
 0x240   :  { %v420_v22 = vadd.f32 %v3638_v3, %v338_v19 }
 0x241   :  { %v414_v24 = vpop.f32.mrf.mxu0 }
 0x242   :  { %v3351_v25 = vmul.f32 -1.442695, %v420_v22  ;;  %v415_v26 = vadd.f32 %v414_v24, %v334_v23  ;;  %v595_v24 = vsub.s32 2, %v4425_v62 }
 0x243   :  { %v3641_v28 = vpop.f32.mrf.mxu0 }
 0x244   :  { %3899 = vpow2.f32 %v3351_v25  ;;  %v3350_v27 = vmul.f32 -1.442695, %v415_v26  ;;  %v430_v30 = vadd.f32 %v3641_v28, %v346_v29 }
 0x245   :  { %v424_v31 = vpop.f32.mrf.mxu0 }
 0x246   :  { %3901 = vpow2.f32 %v3350_v27  ;;  %v3352_v32 = vmul.f32 -1.442695, %v430_v30  ;;  %v425_v35 = vadd.f32 %v424_v31, %v342_v33  ;;  %v596_v30 = vrot.slane %v4432_v2, %v595_v24 }
 0x248   :  { %3903 = vpow2.f32 %v3352_v32 }
 0x251   :  { %v3900_v34 = vpop.eup %3899 }
 0x252   :  { %v442_v36 = vadd.f32 1.0, %v3900_v34 }
 0x253   :  { %v3902_v37 = vpop.eup %3901 }
 0x254   :  { %3905 = vrcp.f32 %v442_v36  ;;  %v436_v38 = vadd.f32 1.0, %v3902_v37 }
 0x255   :  { %3907 = vtanh.f32 %v425_v35  ;;  %v3904_v39 = vpop.eup %3903 }
 0x256   :  { %3909 = vrcp.f32 %v436_v38  ;;  %v449_v44 = vadd.f32 1.0, %v3904_v39 }
 0x258   :  { %3911 = vrcp.f32 %v449_v44  ;;  %v604_v44 = vpop.permute.xlu0 %603 }
 0x261   :  { %v3906_v40 = vpop.eup %3905 }
 0x262   :  { %v3908_v41 = vpop.eup %3907  ;;  %v452_v45 = vmul.f32 %v3906_v40, %v328_v16  ;;  %v608_v40 = vpop.permute.xlu1 %607 }
 0x263   :  { %v3910_v43 = vpop.eup %3909 }
 0x264   :  { %v453_v46 = vmul.f32 %v3910_v43, %v3908_v41 }
 0x265   :  { %v3912_v52 = vpop.eup %3911 }
 0x266   :  { %v454_v47 = vadd.f32 %v453_v46, %v452_v45 }
 0x268   :  { %3913 = vtanh.f32 %v454_v47  ;;  %v457_v49 = vsub.f32 %v454_v47, %v328_v16 }
 0x26a   :  { %v462_v50 = vmul.f32 %v461_v48, %v457_v49 }
 0x26c   :  { %v463_v51 = vadd.f32 %v462_v50, %v328_v16  ;;  %v616_v50 = vpop.permute.xlu0 %615 }
 0x275   :  { %v3914_v53 = vpop.eup %3913 }
 0x276   :  { %v456_v54 = vmul.f32 %v3914_v53, %v3912_v52 }
 0x278   :  { %v464_v55 = vsub.f32 %v456_v54, %v330_v21  ;;  %v612_v54 = vpop.permute.xlu1 %611 }
 0x27a   :  { %v465_v56 = vmul.f32 %v464_v55, %v461_v48 }
 0x27c   :  { %v466_v57 = vadd.f32 %v465_v56, %v330_v21 }
 0x27e   :  { %3642 = vmatprep.subr.mxu1 %v466_v57 }
 0x27f   :  { %3643 = vmatpush3.msra.mxu1 %v466_v57 }
 0x280   :  { %3645 = vmatmul.mubr.msk.f32.vlgmr.msra.gmra.mxu1 %vm85_vm0, %v4336_v12 }
 0x281   :  { %3647 = vmatprep.mubr.msk.f32.mxu1 %vm85_vm0, %v4341_v13 }
 0x284   :  { %3648 = vmatmul.mubr.msk.f32.gmra.mxu1 %vm85_vm0, %v4350_v14 }
 0x285   :  { %3660 = vmatprep.mubr.msk.f32.mxu1 %vm85_vm0, %v4325_v11 }
 0x340   :  { %v3646_v60 = vpop.f32.mrf.mxu1 }
 0x341   :  { %v555_v61 = vadd.f32 %v3646_v60, %v473_v59 }
 0x342   :  { %v549_v63 = vpop.f32.mrf.mxu1 }
 0x343   :  { %v3358_v1 = vmul.f32 -1.442695, %v555_v61  ;;  %v550_v4 = vadd.f32 %v549_v63, %v469_v58 }
 0x344   :  { %v3649_v7 = vpop.f32.mrf.mxu1 }
 0x345   :  { %3915 = vpow2.f32 %v3358_v1  ;;  %v3357_v6 = vmul.f32 -1.442695, %v550_v4  ;;  %v565_v9 = vadd.f32 %v3649_v7, %v481_v8  ;;  %v730_v1 = vsub.s32 3, %v4425_v62 }
 0x346   :  { %v559_v15 = vpop.f32.mrf.mxu1 }
 0x347   :  { %3917 = vpow2.f32 %v3357_v6  ;;  %v3359_v16 = vmul.f32 -1.442695, %v565_v9  ;;  %v560_v18 = vadd.f32 %v559_v15, %v477_v5  ;;  %v731_v9 = vrot.slane %v4432_v2, %v730_v1 }
 0x349   :  { %3919 = vpow2.f32 %v3359_v16 }
 0x352   :  { %v3916_v17 = vpop.eup %3915 }
 0x353   :  { %v577_v20 = vadd.f32 1.0, %v3916_v17 }
 0x354   :  { %v3918_v21 = vpop.eup %3917 }
 0x355   :  { %3921 = vrcp.f32 %v577_v20  ;;  %v571_v19 = vadd.f32 1.0, %v3918_v21 }
 0x356   :  { %3923 = vtanh.f32 %v560_v18  ;;  %v3920_v3 = vpop.eup %3919 }
 0x357   :  { %3925 = vrcp.f32 %v571_v19  ;;  %v584_v26 = vadd.f32 1.0, %v3920_v3 }
 0x359   :  { %3927 = vrcp.f32 %v584_v26 }
 0x362   :  { %v3922_v22 = vpop.eup %3921 }
 0x363   :  { %v3924_v23 = vpop.eup %3923  ;;  %v587_v27 = vmul.f32 %v3922_v22, %v463_v51 }
 0x364   :  { %v3926_v25 = vpop.eup %3925 }
 0x365   :  { %v588_v28 = vmul.f32 %v3926_v25, %v3924_v23  ;;  %v739_v23 = vpop.permute.xlu1 %738  ;;  %v743_v25 = vpop.permute.xlu0 %742 }
 0x366   :  { %v3928_v34 = vpop.eup %3927 }
 0x367   :  { %v589_v29 = vadd.f32 %v588_v28, %v587_v27 }
 0x369   :  { %3929 = vtanh.f32 %v589_v29  ;;  %v592_v31 = vsub.f32 %v589_v29, %v463_v51 }
 0x36b   :  { %v597_v32 = vmul.f32 %v596_v30, %v592_v31  ;;  %v747_v31 = vpop.permute.xlu1 %746 }
 0x36d   :  { %v598_v33 = vadd.f32 %v597_v32, %v463_v51 }
 0x376   :  { %v3930_v35 = vpop.eup %3929 }
 0x377   :  { %v591_v36 = vmul.f32 %v3930_v35, %v3928_v34  ;;  %v751_v34 = vpop.permute.xlu1 %750 }
 0x379   :  { %v599_v37 = vsub.f32 %v591_v36, %v466_v57 }
 0x37b   :  { %v600_v38 = vmul.f32 %v599_v37, %v596_v30 }
 0x37d   :  { %v601_v39 = vadd.f32 %v600_v38, %v466_v57 }
 0x37f   :  { %3650 = vmatprep.subr.mxu0 %v601_v39 }
 0x380   :  { %3651 = vmatpush3.msra.mxu0 %v601_v39 }
 0x381   :  { %3653 = vmatmul.mubr.msk.f32.vlgmr.msra.gmra.mxu0 %vm85_vm0, %v4336_v12 }
 0x382   :  { %3655 = vmatprep.mubr.msk.f32.mxu0 %vm85_vm0, %v4341_v13 }
 0x385   :  { %3656 = vmatmul.mubr.msk.f32.gmra.mxu0 %vm85_vm0, %v4350_v14 }
 0x386   :  { %3668 = vmatprep.mubr.msk.f32.mxu0 %vm85_vm0, %v4325_v11 }
 0x441   :  { %v3654_v41 = vpop.f32.mrf.mxu0 }
 0x442   :  { %v690_v43 = vadd.f32 %v3654_v41, %v608_v40 }
 0x443   :  { %v684_v45 = vpop.f32.mrf.mxu0 }
 0x444   :  { %v3365_v46 = vmul.f32 -1.442695, %v690_v43  ;;  %v685_v47 = vadd.f32 %v684_v45, %v604_v44 }
 0x445   :  { %v3657_v49 = vpop.f32.mrf.mxu0 }
 0x446   :  { %3931 = vpow2.f32 %v3365_v46  ;;  %v3364_v48 = vmul.f32 -1.442695, %v685_v47  ;;  %v700_v51 = vadd.f32 %v3657_v49, %v616_v50  ;;  %v865_v47 = vsub.s32 4, %v4425_v62 }
 0x447   :  { %v694_v52 = vpop.f32.mrf.mxu0 }
 0x448   :  { %3933 = vpow2.f32 %v3364_v48  ;;  %v3366_v53 = vmul.f32 -1.442695, %v700_v51  ;;  %v695_v56 = vadd.f32 %v694_v52, %v612_v54 }
 0x44a   :  { %3935 = vpow2.f32 %v3366_v53  ;;  %v866_v53 = vrot.slane %v4432_v2, %v865_v47 }
 0x453   :  { %v3932_v55 = vpop.eup %3931 }
 0x454   :  { %v712_v57 = vadd.f32 1.0, %v3932_v55 }
 0x455   :  { %v3934_v58 = vpop.eup %3933 }
 0x456   :  { %3937 = vrcp.f32 %v712_v57  ;;  %v706_v59 = vadd.f32 1.0, %v3934_v58 }
 0x457   :  { %3939 = vtanh.f32 %v695_v56  ;;  %v3936_v60 = vpop.eup %3935 }
 0x458   :  { %3941 = vrcp.f32 %v706_v59  ;;  %v719_v5 = vadd.f32 1.0, %v3936_v60 }
 0x45a   :  { %3943 = vrcp.f32 %v719_v5 }
 0x463   :  { %v3938_v61 = vpop.eup %3937 }
 0x464   :  { %v3940_v63 = vpop.eup %3939  ;;  %v722_v6 = vmul.f32 %v3938_v61, %v598_v33 }
 0x465   :  { %v3942_v4 = vpop.eup %3941 }
 0x466   :  { %v723_v7 = vmul.f32 %v3942_v4, %v3940_v63  ;;  %v878_v4 = vpop.permute.xlu1 %877 }
 0x467   :  { %v3944_v18 = vpop.eup %3943 }
 0x468   :  { %v724_v8 = vadd.f32 %v723_v7, %v722_v6  ;;  %v874_v7 = vpop.permute.xlu0 %873 }
 0x46a   :  { %3945 = vtanh.f32 %v724_v8  ;;  %v727_v15 = vsub.f32 %v724_v8, %v598_v33 }
 0x46c   :  { %v732_v16 = vmul.f32 %v731_v9, %v727_v15 }
 0x46e   :  { %v733_v17 = vadd.f32 %v732_v16, %v598_v33 }
 0x477   :  { %v3946_v20 = vpop.eup %3945 }
 0x478   :  { %v726_v21 = vmul.f32 %v3946_v20, %v3944_v18  ;;  %v886_v18 = vpop.permute.xlu0 %885 }
 0x47a   :  { %v734_v19 = vsub.f32 %v726_v21, %v601_v39 }
 0x47c   :  { %v735_v3 = vmul.f32 %v734_v19, %v731_v9 }
 0x47e   :  { %v736_v22 = vadd.f32 %v735_v3, %v601_v39  ;;  %v882_v3 = vpop.permute.xlu1 %881 }
 0x480   :  { %3658 = vmatprep.subr.mxu1 %v736_v22 }
 0x481   :  { %3659 = vmatpush3.msra.mxu1 %v736_v22 }
 0x482   :  { %3661 = vmatmul.mubr.msk.f32.vlgmr.msra.gmra.mxu1 %vm85_vm0, %v4336_v12 }
 0x483   :  { %3663 = vmatprep.mubr.msk.f32.mxu1 %vm85_vm0, %v4341_v13 }
 0x486   :  { %3664 = vmatmul.mubr.msk.f32.gmra.mxu1 %vm85_vm0, %v4350_v14 }
 0x487   :  { %3676 = vmatprep.mubr.msk.f32.mxu1 %vm85_vm0, %v4325_v11 }
 0x542   :  { %v3662_v26 = vpop.f32.mrf.mxu1 }
 0x543   :  { %v825_v27 = vadd.f32 %v3662_v26, %v743_v25 }
 0x544   :  { %v819_v28 = vpop.f32.mrf.mxu1 }
 0x545   :  { %v3372_v29 = vmul.f32 -1.442695, %v825_v27  ;;  %v820_v30 = vadd.f32 %v819_v28, %v739_v23 }
 0x546   :  { %v3665_v33 = vpop.f32.mrf.mxu1 }
 0x547   :  { %3947 = vpow2.f32 %v3372_v29  ;;  %v3371_v32 = vmul.f32 -1.442695, %v820_v30  ;;  %v835_v35 = vadd.f32 %v3665_v33, %v751_v34 }
 0x548   :  { %v829_v36 = vpop.f32.mrf.mxu1 }
 0x549   :  { %3949 = vpow2.f32 %v3371_v32  ;;  %v3373_v37 = vmul.f32 -1.442695, %v835_v35  ;;  %v830_v39 = vadd.f32 %v829_v36, %v747_v31  ;;  %v1000_v31 = vsub.s32 5, %v4425_v62 }
 0x54b   :  { %3951 = vpow2.f32 %v3373_v37  ;;  %v1001_v37 = vrot.slane %v4432_v2, %v1000_v31 }
 0x554   :  { %v3948_v38 = vpop.eup %3947 }
 0x555   :  { %v847_v40 = vadd.f32 1.0, %v3948_v38 }
 0x556   :  { %v3950_v41 = vpop.eup %3949 }
 0x557   :  { %3953 = vrcp.f32 %v847_v40  ;;  %v841_v43 = vadd.f32 1.0, %v3950_v41 }
 0x558   :  { %3955 = vtanh.f32 %v830_v39  ;;  %v3952_v44 = vpop.eup %3951 }
 0x559   :  { %3957 = vrcp.f32 %v841_v43  ;;  %v854_v49 = vadd.f32 1.0, %v3952_v44 }
 0x55b   :  { %3959 = vrcp.f32 %v854_v49  ;;  %v1009_v49 = vpop.permute.xlu1 %1008 }
 0x564   :  { %v3954_v45 = vpop.eup %3953 }
 0x565   :  { %v3956_v46 = vpop.eup %3955  ;;  %v857_v50 = vmul.f32 %v3954_v45, %v733_v17 }
 0x566   :  { %v3958_v48 = vpop.eup %3957 }
 0x567   :  { %v858_v51 = vmul.f32 %v3958_v48, %v3956_v46 }
 0x568   :  { %v3960_v57 = vpop.eup %3959 }
 0x569   :  { %v859_v52 = vadd.f32 %v858_v51, %v857_v50  ;;  %v1013_v50 = vpop.permute.xlu0 %1012 }
 0x56b   :  { %3961 = vtanh.f32 %v859_v52  ;;  %v862_v54 = vsub.f32 %v859_v52, %v733_v17 }
 0x56d   :  { %v867_v55 = vmul.f32 %v866_v53, %v862_v54 }
 0x56f   :  { %v868_v56 = vadd.f32 %v867_v55, %v733_v17 }
 0x578   :  { %v3962_v58 = vpop.eup %3961 }
 0x579   :  { %v861_v59 = vmul.f32 %v3962_v58, %v3960_v57 }
 0x57b   :  { %v869_v60 = vsub.f32 %v861_v59, %v736_v22 }
 0x57d   :  { %v870_v61 = vmul.f32 %v869_v60, %v866_v53 }
 0x57f   :  { %v871_v63 = vadd.f32 %v870_v61, %v736_v22 }
 0x581   :  { %3666 = vmatprep.subr.mxu0 %v871_v63 }
 0x582   :  { %3667 = vmatpush3.msra.mxu0 %v871_v63 }
 0x583   :  { %3669 = vmatmul.mubr.msk.f32.vlgmr.msra.gmra.mxu0 %vm85_vm0, %v4336_v12 }
 0x584   :  { %3671 = vmatprep.mubr.msk.f32.mxu0 %vm85_vm0, %v4341_v13 }
 0x587   :  { %3672 = vmatmul.mubr.msk.f32.gmra.mxu0 %vm85_vm0, %v4350_v14 }
 0x588   :  { %3684 = vmatprep.mubr.msk.f32.mxu0 %vm85_vm0, %v4325_v11 }
 0x643   :  { %v3670_v5 = vpop.f32.mrf.mxu0 }
 0x644   :  { %v960_v6 = vadd.f32 %v3670_v5, %v878_v4 }
 0x645   :  { %v954_v8 = vpop.f32.mrf.mxu0 }
 0x646   :  { %v3379_v9 = vmul.f32 -1.442695, %v960_v6  ;;  %v955_v15 = vadd.f32 %v954_v8, %v874_v7 }
 0x647   :  { %v3673_v17 = vpop.f32.mrf.mxu0 }
 0x648   :  { %3963 = vpow2.f32 %v3379_v9  ;;  %v3378_v16 = vmul.f32 -1.442695, %v955_v15  ;;  %v970_v20 = vadd.f32 %v3673_v17, %v886_v18  ;;  %v1135_v17 = vsub.s32 6, %v4425_v62 }
 0x649   :  { %v964_v21 = vpop.f32.mrf.mxu0 }
 0x64a   :  { %3965 = vpow2.f32 %v3378_v16  ;;  %v3380_v19 = vmul.f32 -1.442695, %v970_v20  ;;  %v965_v23 = vadd.f32 %v964_v21, %v882_v3 }
 0x64c   :  { %3967 = vpow2.f32 %v3380_v19 }
 0x655   :  { %v3964_v22 = vpop.eup %3963 }
 0x656   :  { %v982_v25 = vadd.f32 1.0, %v3964_v22  ;;  %v1136_v22 = vrot.slane %v4432_v2, %v1135_v17 }
 0x657   :  { %v3966_v26 = vpop.eup %3965 }
 0x658   :  { %3969 = vrcp.f32 %v982_v25  ;;  %v976_v27 = vadd.f32 1.0, %v3966_v26 }
 0x659   :  { %3971 = vtanh.f32 %v965_v23  ;;  %v3968_v28 = vpop.eup %3967 }
 0x65a   :  { %3973 = vrcp.f32 %v976_v27  ;;  %v989_v33 = vadd.f32 1.0, %v3968_v28 }
 0x65c   :  { %3975 = vrcp.f32 %v989_v33 }
 0x665   :  { %v3970_v29 = vpop.eup %3969 }
 0x666   :  { %v3972_v30 = vpop.eup %3971  ;;  %v992_v34 = vmul.f32 %v3970_v29, %v868_v56 }
 0x667   :  { %v3974_v32 = vpop.eup %3973 }
 0x668   :  { %v993_v35 = vmul.f32 %v3974_v32, %v3972_v30 }
 0x669   :  { %v3976_v41 = vpop.eup %3975 }
 0x66a   :  { %v994_v36 = vadd.f32 %v993_v35, %v992_v34 }
 0x66c   :  { %3977 = vtanh.f32 %v994_v36  ;;  %v997_v38 = vsub.f32 %v994_v36, %v868_v56 }
 0x66e   :  { %v1002_v39 = vmul.f32 %v1001_v37, %v997_v38 }
 0x670   :  { %v1003_v40 = vadd.f32 %v1002_v39, %v868_v56  ;;  %v1017_v56 = vpop.permute.xlu1 %1016 }
 0x674   :  { %v1021_v59 = vpop.permute.xlu1 %1020 }
 0x678   :  { %v1148_v34 = vpop.permute.xlu1 %1147 }
 0x679   :  { %v3978_v43 = vpop.eup %3977 }
 0x67a   :  { %v996_v44 = vmul.f32 %v3978_v43, %v3976_v41 }
 0x67c   :  { %v1004_v45 = vsub.f32 %v996_v44, %v871_v63 }
 0x67e   :  { %v1005_v46 = vmul.f32 %v1004_v45, %v1001_v37  ;;  %v1144_v37 = vpop.permute.xlu0 %1143 }
 0x680   :  { %v1006_v48 = vadd.f32 %v1005_v46, %v871_v63  ;;  %v1152_v46 = vpop.permute.xlu1 %1151 }
 0x682   :  { %3674 = vmatprep.subr.mxu1 %v1006_v48  ;;  %v1156_v43 = vpop.permute.xlu0 %1155 }
 0x683   :  { %3675 = vmatpush3.msra.mxu1 %v1006_v48 }
 0x684   :  { %3677 = vmatmul.mubr.msk.f32.vlgmr.msra.gmra.mxu1 %vm85_vm0, %v4336_v12 }
 0x685   :  { %3679 = vmatprep.mubr.msk.f32.mxu1 %vm85_vm0, %v4341_v13 }
 0x688   :  { %3680 = vmatmul.mubr.msk.f32.gmra.mxu1 %vm85_vm0, %v4350_v14 }
 0x689   :  { %3692 = vmatprep.mubr.msk.f32.mxu1 %vm85_vm0, %v4325_v11 }
 0x744   :  { %v3678_v51 = vpop.f32.mrf.mxu1 }
 0x745   :  { %v1095_v52 = vadd.f32 %v3678_v51, %v1013_v50 }
 0x746   :  { %v1089_v53 = vpop.f32.mrf.mxu1 }
 0x747   :  { %v3386_v54 = vmul.f32 -1.442695, %v1095_v52  ;;  %v1090_v55 = vadd.f32 %v1089_v53, %v1009_v49 }
 0x748   :  { %v3681_v58 = vpop.f32.mrf.mxu1 }
 0x749   :  { %3979 = vpow2.f32 %v3386_v54  ;;  %v3385_v57 = vmul.f32 -1.442695, %v1090_v55  ;;  %v1105_v60 = vadd.f32 %v3681_v58, %v1021_v59  ;;  %v1270_v54 = vsub.s32 7, %v4425_v62 }
 0x74a   :  { %v1099_v61 = vpop.f32.mrf.mxu1 }
 0x74b   :  { %3981 = vpow2.f32 %v3385_v57  ;;  %v3387_v63 = vmul.f32 -1.442695, %v1105_v60  ;;  %v1100_v5 = vadd.f32 %v1099_v61, %v1017_v56  ;;  %v1271_v60 = vrot.slane %v4432_v2, %v1270_v54  ;;  %v4535_v2 = vld [vmem:[%s4879_s3 + $0x10] sm:$0xff] }
 0x74d   :  { %3983 = vpow2.f32 %v3387_v63 }
 0x756   :  { %v3980_v4 = vpop.eup %3979 }
 0x757   :  { %v1117_v6 = vadd.f32 1.0, %v3980_v4 }
 0x758   :  { %v3982_v7 = vpop.eup %3981 }
 0x759   :  { %3985 = vrcp.f32 %v1117_v6  ;;  %v1111_v8 = vadd.f32 1.0, %v3982_v7 }
 0x75a   :  { %3987 = vtanh.f32 %v1100_v5  ;;  %v3984_v9 = vpop.eup %3983 }
 0x75b   :  { %3989 = vrcp.f32 %v1111_v8  ;;  %v1124_v20 = vadd.f32 1.0, %v3984_v9 }
 0x75d   :  { %3991 = vrcp.f32 %v1124_v20  ;;  %v4549_v20 = vld [vmem:[%s4879_s3] sm:$0xff] }
 0x766   :  { %v3986_v15 = vpop.eup %3985 }
 0x767   :  { %v3988_v16 = vpop.eup %3987  ;;  %v1127_v21 = vmul.f32 %v3986_v15, %v1003_v40 }
 0x768   :  { %v3990_v18 = vpop.eup %3989 }
 0x769   :  { %v1128_v19 = vmul.f32 %v3990_v18, %v3988_v16  ;;  %v4528_v16 = vld [vmem:[%s4879_s3 + $0x8] sm:$0xff]  ;;  %v4542_v18 = vld [vmem:[%s4879_s3 + $0x18] sm:$0xff] }
 0x76a   :  { %v3992_v27 = vpop.eup %3991 }
 0x76b   :  { %v1129_v3 = vadd.f32 %v1128_v19, %v1127_v21  ;;  %v1279_v21 = vpop.permute.xlu1 %1278  ;;  %v1283_v19 = vpop.permute.xlu0 %1282 }
 0x76d   :  { %3993 = vtanh.f32 %v1129_v3  ;;  %v1132_v23 = vsub.f32 %v1129_v3, %v1003_v40 }
 0x76f   :  { %v1137_v25 = vmul.f32 %v1136_v22, %v1132_v23 }
 0x771   :  { %v1138_v26 = vadd.f32 %v1137_v25, %v1003_v40 }
 0x77a   :  { %v3994_v28 = vpop.eup %3993 }
 0x77b   :  { %v1131_v29 = vmul.f32 %v3994_v28, %v3992_v27  ;;  %v1287_v27 = vpop.permute.xlu1 %1286 }
 0x77d   :  { %v1139_v30 = vsub.f32 %v1131_v29, %v1006_v48 }
 0x77f   :  { %v1140_v32 = vmul.f32 %v1139_v30, %v1136_v22  ;;  %v1291_v30 = vpop.permute.xlu1 %1290 }
 0x781   :  { %v1141_v33 = vadd.f32 %v1140_v32, %v1006_v48 }
 0x783   :  { %3682 = vmatprep.subr.mxu0 %v1141_v33 }
 0x784   :  { %3683 = vmatpush3.msra.mxu0 %v1141_v33 }
 0x785   :  { %3685 = vmatmul.mubr.msk.f32.vlgmr.msra.gmra.mxu0 %vm85_vm0, %v4336_v12 }
 0x786   :  { %3687 = vmatprep.mubr.msk.f32.mxu0 %vm85_vm0, %v4341_v13 }
 0x789   :  { %3688 = vmatmul.mubr.msk.f32.gmra.mxu0 %vm85_vm0, %v4350_v14 }
 0x78a   :  { %3700 = vmatprep.mubr.msk.f32.mxu0 %vm85_vm0, %v4325_v11 }
 0x845   :  { %v3686_v35 = vpop.f32.mrf.mxu0 }
 0x846   :  { %v1230_v36 = vadd.f32 %v3686_v35, %v1148_v34 }
 0x847   :  { %v1224_v38 = vpop.f32.mrf.mxu0 }
 0x848   :  { %v3393_v39 = vmul.f32 -1.442695, %v1230_v36  ;;  %v1225_v40 = vadd.f32 %v1224_v38, %v1144_v37 }
 0x849   :  { %v3689_v12 = vpop.f32.mrf.mxu0 }
 0x84a   :  { %3995 = vpow2.f32 %v3393_v39  ;;  %v3392_v41 = vmul.f32 -1.442695, %v1225_v40  ;;  %v1240_v44 = vadd.f32 %v3689_v12, %v1156_v43 }
 0x84b   :  { %v1234_v13 = vpop.f32.mrf.mxu0 }
 0x84c   :  { %3997 = vpow2.f32 %v3392_v41  ;;  %v3394_v45 = vmul.f32 -1.442695, %v1240_v44  ;;  %v1235_v48 = vadd.f32 %v1234_v13, %v1152_v46  ;;  %v4556_v13 = vld [vmem:[%s4880_s1 + $0x8] sm:$0xff] }
 0x84e   :  { %3999 = vpow2.f32 %v3394_v45 }
 0x857   :  { %v3996_v14 = vpop.eup %3995 }
 0x858   :  { %v1252_v49 = vadd.f32 1.0, %v3996_v14 }
 0x859   :  { %v3998_v11 = vpop.eup %3997 }
 0x85a   :  { %4001 = vrcp.f32 %v1252_v49  ;;  %v1246_v50 = vadd.f32 1.0, %v3998_v11 }
 0x85b   :  { %4003 = vtanh.f32 %v1235_v48  ;;  %v4000_v51 = vpop.eup %3999  ;;  %v1406_v48 = vrot.slane %v4556_v13, %v326_v0  ;;  %v1418_v0 = vpop.permute.xlu1 %1417 }
 0x85c   :  { %4005 = vrcp.f32 %v1246_v50  ;;  %v1259_v56 = vadd.f32 1.0, %v4000_v51 }
 0x85e   :  { %4007 = vrcp.f32 %v1259_v56 }
 0x867   :  { %v4002_v52 = vpop.eup %4001 }
 0x868   :  { %v4004_v53 = vpop.eup %4003  ;;  %v1262_v57 = vmul.f32 %v4002_v52, %v1138_v26 }
 0x869   :  { %v4006_v55 = vpop.eup %4005 }
 0x86a   :  { %v1263_v58 = vmul.f32 %v4006_v55, %v4004_v53 }
 0x86b   :  { %v4008_v5 = vpop.eup %4007 }
 0x86c   :  { %v1264_v59 = vadd.f32 %v1263_v58, %v1262_v57 }
 0x86e   :  { %4009 = vtanh.f32 %v1264_v59  ;;  %v1267_v61 = vsub.f32 %v1264_v59, %v1138_v26 }
 0x870   :  { %v1272_v63 = vmul.f32 %v1271_v60, %v1267_v61 }
 0x872   :  { %v1273_v4 = vadd.f32 %v1272_v63, %v1138_v26 }
 0x87b   :  { %v4010_v6 = vpop.eup %4009 }
 0x87c   :  { %v1266_v7 = vmul.f32 %v4010_v6, %v4008_v5 }
 0x87e   :  { %v1274_v8 = vsub.f32 %v1266_v7, %v1141_v33 }
 0x880   :  { %v1275_v9 = vmul.f32 %v1274_v8, %v1271_v60  ;;  %v1414_v60 = vpop.permute.xlu0 %1413 }
 0x882   :  { %v1276_v15 = vadd.f32 %v1275_v9, %v1141_v33 }
 0x884   :  { %3690 = vmatprep.subr.mxu1 %v1276_v15  ;;  %v1426_v7 = vpop.permute.xlu0 %1425 }
 0x885   :  { %3691 = vmatpush3.msra.mxu1 %v1276_v15 }
 0x886   :  { %3693 = vmatmul.mubr.msk.f32.vlgmr.msra.gmra.mxu1 %vm85_vm0, %v4528_v16 }
 0x887   :  { %3695 = vmatprep.mubr.msk.f32.mxu1 %vm85_vm0, %v4535_v2 }
 0x88a   :  { %3696 = vmatmul.mubr.msk.f32.gmra.mxu1 %vm85_vm0, %v4542_v18 }
 0x88b   :  { %3708 = vmatprep.mubr.msk.f32.mxu1 %vm85_vm0, %v4549_v20 }
 0x946   :  { %v3694_v3 = vpop.f32.mrf.mxu1 }
 0x947   :  { %v1365_v22 = vadd.f32 %v3694_v3, %v1283_v19 }
 0x948   :  { %v1359_v23 = vpop.f32.mrf.mxu1 }
 0x949   :  { %v3400_v25 = vmul.f32 -1.442695, %v1365_v22  ;;  %v1360_v26 = vadd.f32 %v1359_v23, %v1279_v21  ;;  %v1422_v21 = vpop.permute.xlu1 %1421 }
 0x94a   :  { %v3697_v29 = vpop.f32.mrf.mxu1 }
 0x94b   :  { %4011 = vpow2.f32 %v3400_v25  ;;  %v3399_v28 = vmul.f32 -1.442695, %v1360_v26  ;;  %v1375_v32 = vadd.f32 %v3697_v29, %v1291_v30 }
 0x94c   :  { %v1369_v33 = vpop.f32.mrf.mxu1 }
 0x94d   :  { %4013 = vpow2.f32 %v3399_v28  ;;  %v3401_v34 = vmul.f32 -1.442695, %v1375_v32  ;;  %v1370_v36 = vadd.f32 %v1369_v33, %v1287_v27 }
 0x94f   :  { %4015 = vpow2.f32 %v3401_v34 }
 0x958   :  { %v4012_v35 = vpop.eup %4011 }
 0x959   :  { %v1387_v37 = vadd.f32 1.0, %v4012_v35  ;;  %v1541_v35 = vrot.slane %v4556_v13, %v460_v42  ;;  %v1549_v42 = vpop.permute.xlu1 %1548 }
 0x95a   :  { %v4014_v38 = vpop.eup %4013 }
 0x95b   :  { %4017 = vrcp.f32 %v1387_v37  ;;  %v1381_v39 = vadd.f32 1.0, %v4014_v38 }
 0x95c   :  { %4019 = vtanh.f32 %v1370_v36  ;;  %v4016_v40 = vpop.eup %4015 }
 0x95d   :  { %4021 = vrcp.f32 %v1381_v39  ;;  %v1394_v44 = vadd.f32 1.0, %v4016_v40 }
 0x95f   :  { %4023 = vrcp.f32 %v1394_v44 }
 0x968   :  { %v4018_v41 = vpop.eup %4017 }
 0x969   :  { %v4020_v12 = vpop.eup %4019  ;;  %v1397_v45 = vmul.f32 %v4018_v41, %v1273_v4 }
 0x96a   :  { %v4022_v43 = vpop.eup %4021 }
 0x96b   :  { %v1398_v46 = vmul.f32 %v4022_v43, %v4020_v12 }
 0x96c   :  { %v4024_v51 = vpop.eup %4023 }
 0x96d   :  { %v1399_v14 = vadd.f32 %v1398_v46, %v1397_v45  ;;  %v1553_v45 = vpop.permute.xlu0 %1552 }
 0x96f   :  { %4025 = vtanh.f32 %v1399_v14  ;;  %v1402_v49 = vsub.f32 %v1399_v14, %v1273_v4 }
 0x971   :  { %v1407_v11 = vmul.f32 %v1406_v48, %v1402_v49 }
 0x973   :  { %v1408_v50 = vadd.f32 %v1407_v11, %v1273_v4 }
 0x97c   :  { %v4026_v52 = vpop.eup %4025 }
 0x97d   :  { %v1401_v53 = vmul.f32 %v4026_v52, %v4024_v51 }
 0x97f   :  { %v1409_v55 = vsub.f32 %v1401_v53, %v1276_v15 }
 0x981   :  { %v1410_v56 = vmul.f32 %v1409_v55, %v1406_v48 }
 0x983   :  { %v1411_v57 = vadd.f32 %v1410_v56, %v1276_v15 }
 0x985   :  { %3698 = vmatprep.subr.mxu0 %v1411_v57 }
 0x986   :  { %3699 = vmatpush3.msra.mxu0 %v1411_v57 }
 0x987   :  { %3701 = vmatmul.mubr.msk.f32.vlgmr.msra.gmra.mxu0 %vm85_vm0, %v4528_v16 }
 0x988   :  { %3703 = vmatprep.mubr.msk.f32.mxu0 %vm85_vm0, %v4535_v2 }
 0x98b   :  { %3704 = vmatmul.mubr.msk.f32.gmra.mxu0 %vm85_vm0, %v4542_v18 }
 0x98c   :  { %3716 = vmatprep.mubr.msk.f32.mxu0 %vm85_vm0, %v4549_v20 }
 0xa47   :  { %v3702_v58 = vpop.f32.mrf.mxu0 }
 0xa48   :  { %v1500_v59 = vadd.f32 %v3702_v58, %v1418_v0 }
 0xa49   :  { %v1494_v61 = vpop.f32.mrf.mxu0 }
 0xa4a   :  { %v3407_v63 = vmul.f32 -1.442695, %v1500_v59  ;;  %v1495_v4 = vadd.f32 %v1494_v61, %v1414_v60 }
 0xa4b   :  { %v3705_v6 = vpop.f32.mrf.mxu0 }
 0xa4c   :  { %4027 = vpow2.f32 %v3407_v63  ;;  %v3406_v5 = vmul.f32 -1.442695, %v1495_v4  ;;  %v1510_v8 = vadd.f32 %v3705_v6, %v1426_v7 }
 0xa4d   :  { %v1504_v9 = vpop.f32.mrf.mxu0 }
 0xa4e   :  { %4029 = vpow2.f32 %v3406_v5  ;;  %v3408_v15 = vmul.f32 -1.442695, %v1510_v8  ;;  %v1505_v3 = vadd.f32 %v1504_v9, %v1422_v21  ;;  %v1676_v21 = vrot.slane %v4556_v13, %v595_v24 }
 0xa50   :  { %4031 = vpow2.f32 %v3408_v15 }
 0xa59   :  { %v4028_v19 = vpop.eup %4027 }
 0xa5a   :  { %v1522_v22 = vadd.f32 1.0, %v4028_v19 }
 0xa5b   :  { %v4030_v23 = vpop.eup %4029 }
 0xa5c   :  { %4033 = vrcp.f32 %v1522_v22  ;;  %v1516_v25 = vadd.f32 1.0, %v4030_v23 }
 0xa5d   :  { %4035 = vtanh.f32 %v1505_v3  ;;  %v4032_v26 = vpop.eup %4031 }
 0xa5e   :  { %4037 = vrcp.f32 %v1516_v25  ;;  %v1529_v30 = vadd.f32 1.0, %v4032_v26 }
 0xa60   :  { %4039 = vrcp.f32 %v1529_v30 }
 0xa69   :  { %v4034_v27 = vpop.eup %4033 }
 0xa6a   :  { %v4036_v28 = vpop.eup %4035  ;;  %v1532_v32 = vmul.f32 %v4034_v27, %v1408_v50 }
 0xa6b   :  { %v4038_v29 = vpop.eup %4037 }
 0xa6c   :  { %v1533_v33 = vmul.f32 %v4038_v29, %v4036_v28 }
 0xa6d   :  { %v4040_v39 = vpop.eup %4039 }
 0xa6e   :  { %v1534_v34 = vadd.f32 %v1533_v33, %v1532_v32  ;;  %v1684_v33 = vpop.permute.xlu0 %1683 }
 0xa70   :  { %4041 = vtanh.f32 %v1534_v34  ;;  %v1537_v36 = vsub.f32 %v1534_v34, %v1408_v50 }
 0xa72   :  { %v1542_v37 = vmul.f32 %v1541_v35, %v1537_v36 }
 0xa74   :  { %v1543_v38 = vadd.f32 %v1542_v37, %v1408_v50  ;;  %v1557_v50 = vpop.permute.xlu1 %1556 }
 0xa78   :  { %v1561_v53 = vpop.permute.xlu1 %1560 }
 0xa7c   :  { %v1688_v24 = vpop.permute.xlu1 %1687 }
 0xa7d   :  { %v4042_v40 = vpop.eup %4041 }
 0xa7e   :  { %v1536_v41 = vmul.f32 %v4042_v40, %v4040_v39  ;;  %v1696_v39 = vpop.permute.xlu0 %1695 }
 0xa80   :  { %v1544_v12 = vsub.f32 %v1536_v41, %v1411_v57 }
 0xa82   :  { %v1545_v43 = vmul.f32 %v1544_v12, %v1541_v35 }
 0xa84   :  { %v1546_v44 = vadd.f32 %v1545_v43, %v1411_v57  ;;  %v1692_v43 = vpop.permute.xlu1 %1691 }
 0xa86   :  { %3706 = vmatprep.subr.mxu1 %v1546_v44 }
 0xa87   :  { %3707 = vmatpush3.msra.mxu1 %v1546_v44 }
 0xa88   :  { %3709 = vmatmul.mubr.msk.f32.vlgmr.msra.gmra.mxu1 %vm85_vm0, %v4528_v16 }
 0xa89   :  { %3711 = vmatprep.mubr.msk.f32.mxu1 %vm85_vm0, %v4535_v2 }
 0xa8c   :  { %3712 = vmatmul.mubr.msk.f32.gmra.mxu1 %vm85_vm0, %v4542_v18 }
 0xa8d   :  { %3724 = vmatprep.mubr.msk.f32.mxu1 %vm85_vm0, %v4549_v20 }
 0xb48   :  { %v3710_v46 = vpop.f32.mrf.mxu1 }
 0xb49   :  { %v1635_v14 = vadd.f32 %v3710_v46, %v1553_v45 }
 0xb4a   :  { %v1629_v48 = vpop.f32.mrf.mxu1 }
 0xb4b   :  { %v3414_v49 = vmul.f32 -1.442695, %v1635_v14  ;;  %v1630_v11 = vadd.f32 %v1629_v48, %v1549_v42 }
 0xb4c   :  { %v3713_v52 = vpop.f32.mrf.mxu1 }
 0xb4d   :  { %4043 = vpow2.f32 %v3414_v49  ;;  %v3413_v51 = vmul.f32 -1.442695, %v1630_v11  ;;  %v1645_v55 = vadd.f32 %v3713_v52, %v1561_v53 }
 0xb4e   :  { %v1639_v56 = vpop.f32.mrf.mxu1 }
 0xb4f   :  { %4045 = vpow2.f32 %v3413_v51  ;;  %v3415_v57 = vmul.f32 -1.442695, %v1645_v55  ;;  %v1640_v58 = vadd.f32 %v1639_v56, %v1557_v50  ;;  %v1811_v56 = vrot.slane %v4556_v13, %v730_v1  ;;  %v1819_v1 = vpop.permute.xlu1 %1818 }
 0xb51   :  { %4047 = vpow2.f32 %v3415_v57 }
 0xb5a   :  { %v4044_v0 = vpop.eup %4043 }
 0xb5b   :  { %v1657_v59 = vadd.f32 1.0, %v4044_v0 }
 0xb5c   :  { %v4046_v60 = vpop.eup %4045 }
 0xb5d   :  { %4049 = vrcp.f32 %v1657_v59  ;;  %v1651_v61 = vadd.f32 1.0, %v4046_v60 }
 0xb5e   :  { %4051 = vtanh.f32 %v1640_v58  ;;  %v4048_v63 = vpop.eup %4047 }
 0xb5f   :  { %4053 = vrcp.f32 %v1651_v61  ;;  %v1664_v7 = vadd.f32 1.0, %v4048_v63 }
 0xb61   :  { %4055 = vrcp.f32 %v1664_v7 }
 0xb6a   :  { %v4050_v4 = vpop.eup %4049 }
 0xb6b   :  { %v4052_v5 = vpop.eup %4051  ;;  %v1667_v8 = vmul.f32 %v4050_v4, %v1543_v38 }
 0xb6c   :  { %v4054_v6 = vpop.eup %4053 }
 0xb6d   :  { %v1668_v9 = vmul.f32 %v4054_v6, %v4052_v5  ;;  %v1823_v6 = vpop.permute.xlu0 %1822 }
 0xb6e   :  { %v4056_v23 = vpop.eup %4055 }
 0xb6f   :  { %v1669_v15 = vadd.f32 %v1668_v9, %v1667_v8 }
 0xb71   :  { %4057 = vtanh.f32 %v1669_v15  ;;  %v1672_v19 = vsub.f32 %v1669_v15, %v1543_v38 }
 0xb73   :  { %v1677_v3 = vmul.f32 %v1676_v21, %v1672_v19  ;;  %v1827_v19 = vpop.permute.xlu1 %1826 }
 0xb75   :  { %v1678_v22 = vadd.f32 %v1677_v3, %v1543_v38 }
 0xb7e   :  { %v4058_v25 = vpop.eup %4057 }
 0xb7f   :  { %v1671_v26 = vmul.f32 %v4058_v25, %v4056_v23  ;;  %v1831_v23 = vpop.permute.xlu1 %1830 }
 0xb81   :  { %v1679_v27 = vsub.f32 %v1671_v26, %v1546_v44 }
 0xb83   :  { %v1680_v28 = vmul.f32 %v1679_v27, %v1676_v21 }
 0xb85   :  { %v1681_v29 = vadd.f32 %v1680_v28, %v1546_v44 }
 0xb87   :  { %3714 = vmatprep.subr.mxu0 %v1681_v29 }
 0xb88   :  { %3715 = vmatpush3.msra.mxu0 %v1681_v29 }
 0xb89   :  { %3717 = vmatmul.mubr.msk.f32.vlgmr.msra.gmra.mxu0 %vm85_vm0, %v4528_v16 }
 0xb8a   :  { %3719 = vmatprep.mubr.msk.f32.mxu0 %vm85_vm0, %v4535_v2 }
 0xb8d   :  { %3720 = vmatmul.mubr.msk.f32.gmra.mxu0 %vm85_vm0, %v4542_v18 }
 0xb8e   :  { %3732 = vmatprep.mubr.msk.f32.mxu0 %vm85_vm0, %v4549_v20 }
 0xc49   :  { %v3718_v30 = vpop.f32.mrf.mxu0 }
 0xc4a   :  { %v1770_v32 = vadd.f32 %v3718_v30, %v1688_v24 }
 0xc4b   :  { %v1764_v34 = vpop.f32.mrf.mxu0 }
 0xc4c   :  { %v3421_v35 = vmul.f32 -1.442695, %v1770_v32  ;;  %v1765_v36 = vadd.f32 %v1764_v34, %v1684_v33 }
 0xc4d   :  { %v3721_v38 = vpop.f32.mrf.mxu0 }
 0xc4e   :  { %4059 = vpow2.f32 %v3421_v35  ;;  %v3420_v37 = vmul.f32 -1.442695, %v1765_v36  ;;  %v1780_v40 = vadd.f32 %v3721_v38, %v1696_v39 }
 0xc4f   :  { %v1774_v41 = vpop.f32.mrf.mxu0 }
 0xc50   :  { %4061 = vpow2.f32 %v3420_v37  ;;  %v3422_v12 = vmul.f32 -1.442695, %v1780_v40  ;;  %v1775_v42 = vadd.f32 %v1774_v41, %v1692_v43  ;;  %v1946_v41 = vrot.slane %v4556_v13, %v865_v47  ;;  %v1958_v47 = vpop.permute.xlu1 %1957 }
 0xc52   :  { %4063 = vpow2.f32 %v3422_v12 }
 0xc5b   :  { %v4060_v44 = vpop.eup %4059 }
 0xc5c   :  { %v1792_v45 = vadd.f32 1.0, %v4060_v44 }
 0xc5d   :  { %v4062_v46 = vpop.eup %4061 }
 0xc5e   :  { %4065 = vrcp.f32 %v1792_v45  ;;  %v1786_v14 = vadd.f32 1.0, %v4062_v46 }
 0xc5f   :  { %4067 = vtanh.f32 %v1775_v42  ;;  %v4064_v48 = vpop.eup %4063 }
 0xc60   :  { %4069 = vrcp.f32 %v1786_v14  ;;  %v1799_v51 = vadd.f32 1.0, %v4064_v48 }
 0xc62   :  { %4071 = vrcp.f32 %v1799_v51  ;;  %v1954_v51 = vpop.permute.xlu0 %1953 }
 0xc6b   :  { %v4066_v49 = vpop.eup %4065 }
 0xc6c   :  { %v4068_v11 = vpop.eup %4067  ;;  %v1802_v52 = vmul.f32 %v4066_v49, %v1678_v22 }
 0xc6d   :  { %v4070_v50 = vpop.eup %4069 }
 0xc6e   :  { %v1803_v53 = vmul.f32 %v4070_v50, %v4068_v11 }
 0xc6f   :  { %v4072_v59 = vpop.eup %4071 }
 0xc70   :  { %v1804_v55 = vadd.f32 %v1803_v53, %v1802_v52 }
 0xc72   :  { %4073 = vtanh.f32 %v1804_v55  ;;  %v1807_v57 = vsub.f32 %v1804_v55, %v1678_v22 }
 0xc74   :  { %v1812_v0 = vmul.f32 %v1811_v56, %v1807_v57 }
 0xc76   :  { %v1813_v58 = vadd.f32 %v1812_v0, %v1678_v22  ;;  %v1966_v0 = vpop.permute.xlu0 %1965 }
 0xc7f   :  { %v4074_v60 = vpop.eup %4073 }
 0xc80   :  { %v1806_v61 = vmul.f32 %v4074_v60, %v4072_v59 }
 0xc82   :  { %v1814_v63 = vsub.f32 %v1806_v61, %v1681_v29  ;;  %v1962_v61 = vpop.permute.xlu1 %1961 }
 0xc84   :  { %v1815_v4 = vmul.f32 %v1814_v63, %v1811_v56 }
 0xc86   :  { %v1816_v5 = vadd.f32 %v1815_v4, %v1681_v29 }
 0xc88   :  { %3722 = vmatprep.subr.mxu1 %v1816_v5 }
 0xc89   :  { %3723 = vmatpush3.msra.mxu1 %v1816_v5 }
 0xc8a   :  { %3725 = vmatmul.mubr.msk.f32.vlgmr.msra.gmra.mxu1 %vm85_vm0, %v4528_v16 }
 0xc8b   :  { %3727 = vmatprep.mubr.msk.f32.mxu1 %vm85_vm0, %v4535_v2 }
 0xc8e   :  { %3728 = vmatmul.mubr.msk.f32.gmra.mxu1 %vm85_vm0, %v4542_v18 }
 0xc8f   :  { %3740 = vmatprep.mubr.msk.f32.mxu1 %vm85_vm0, %v4549_v20 }
 0xd4a   :  { %v3726_v7 = vpop.f32.mrf.mxu1 }
 0xd4b   :  { %v1905_v8 = vadd.f32 %v3726_v7, %v1823_v6 }
 0xd4c   :  { %v1899_v9 = vpop.f32.mrf.mxu1 }
 0xd4d   :  { %v3428_v15 = vmul.f32 -1.442695, %v1905_v8  ;;  %v1900_v21 = vadd.f32 %v1899_v9, %v1819_v1 }
 0xd4e   :  { %v3729_v22 = vpop.f32.mrf.mxu1 }
 0xd4f   :  { %4075 = vpow2.f32 %v3428_v15  ;;  %v3427_v3 = vmul.f32 -1.442695, %v1900_v21  ;;  %v1915_v25 = vadd.f32 %v3729_v22, %v1831_v23  ;;  %v2081_v22 = vrot.slane %v4556_v13, %v1000_v31  ;;  %v2089_v31 = vpop.permute.xlu1 %2088 }
 0xd50   :  { %v1909_v26 = vpop.f32.mrf.mxu1 }
 0xd51   :  { %4077 = vpow2.f32 %v3427_v3  ;;  %v3429_v27 = vmul.f32 -1.442695, %v1915_v25  ;;  %v1910_v29 = vadd.f32 %v1909_v26, %v1827_v19 }
 0xd53   :  { %4079 = vpow2.f32 %v3429_v27 }
 0xd5c   :  { %v4076_v28 = vpop.eup %4075 }
 0xd5d   :  { %v1927_v24 = vadd.f32 1.0, %v4076_v28 }
 0xd5e   :  { %v4078_v30 = vpop.eup %4077 }
 0xd5f   :  { %4081 = vrcp.f32 %v1927_v24  ;;  %v1921_v32 = vadd.f32 1.0, %v4078_v30 }
 0xd60   :  { %4083 = vtanh.f32 %v1910_v29  ;;  %v4080_v33 = vpop.eup %4079 }
 0xd61   :  { %4085 = vrcp.f32 %v1921_v32  ;;  %v1934_v37 = vadd.f32 1.0, %v4080_v33  ;;  %v2093_v33 = vpop.permute.xlu0 %2092 }
 0xd63   :  { %4087 = vrcp.f32 %v1934_v37 }
 0xd6c   :  { %v4082_v34 = vpop.eup %4081 }
 0xd6d   :  { %v4084_v35 = vpop.eup %4083  ;;  %v1937_v38 = vmul.f32 %v4082_v34, %v1813_v58 }
 0xd6e   :  { %v4086_v36 = vpop.eup %4085 }
 0xd6f   :  { %v1938_v39 = vmul.f32 %v4086_v36, %v4084_v35 }
 0xd70   :  { %v4088_v42 = vpop.eup %4087 }
 0xd71   :  { %v1939_v40 = vadd.f32 %v1938_v39, %v1937_v38  ;;  %v2097_v39 = vpop.permute.xlu1 %2096 }
 0xd73   :  { %4089 = vtanh.f32 %v1939_v40  ;;  %v1942_v12 = vsub.f32 %v1939_v40, %v1813_v58 }
 0xd75   :  { %v1947_v43 = vmul.f32 %v1946_v41, %v1942_v12  ;;  %v2101_v12 = vpop.permute.xlu1 %2100 }
 0xd77   :  { %v1948_v44 = vadd.f32 %v1947_v43, %v1813_v58 }
 0xd80   :  { %v4090_v45 = vpop.eup %4089 }
 0xd81   :  { %v1941_v46 = vmul.f32 %v4090_v45, %v4088_v42 }
 0xd83   :  { %v1949_v14 = vsub.f32 %v1941_v46, %v1816_v5 }
 0xd85   :  { %v1950_v48 = vmul.f32 %v1949_v14, %v1946_v41 }
 0xd87   :  { %v1951_v49 = vadd.f32 %v1950_v48, %v1816_v5 }
 0xd89   :  { %3730 = vmatprep.subr.mxu0 %v1951_v49 }
 0xd8a   :  { %3731 = vmatpush3.msra.mxu0 %v1951_v49 }
 0xd8b   :  { %3733 = vmatmul.mubr.msk.f32.vlgmr.msra.gmra.mxu0 %vm85_vm0, %v4528_v16 }
 0xd8c   :  { %3735 = vmatprep.mubr.msk.f32.mxu0 %vm85_vm0, %v4535_v2 }
 0xd8f   :  { %3736 = vmatmul.mubr.msk.f32.gmra.mxu0 %vm85_vm0, %v4542_v18 }
 0xd90   :  { %3748 = vmatprep.mubr.msk.f32.mxu0 %vm85_vm0, %v4549_v20 }
 0xe4b   :  { %v3734_v11 = vpop.f32.mrf.mxu0 }
 0xe4c   :  { %v2040_v50 = vadd.f32 %v3734_v11, %v1958_v47 }
 0xe4d   :  { %v2034_v52 = vpop.f32.mrf.mxu0 }
 0xe4e   :  { %v3435_v53 = vmul.f32 -1.442695, %v2040_v50  ;;  %v2035_v55 = vadd.f32 %v2034_v52, %v1954_v51 }
 0xe4f   :  { %v3737_v57 = vpop.f32.mrf.mxu0 }
 0xe50   :  { %4091 = vpow2.f32 %v3435_v53  ;;  %v3434_v56 = vmul.f32 -1.442695, %v2035_v55  ;;  %v2050_v58 = vadd.f32 %v3737_v57, %v1966_v0  ;;  %v2216_v57 = vrot.slane %v4556_v13, %v1135_v17  ;;  %v4189_v17 = vld [vmem:[%s4876_s0] sm:$0xff] }
 0xe51   :  { %v2044_v59 = vpop.f32.mrf.mxu0 }
 0xe52   :  { %4093 = vpow2.f32 %v3434_v56  ;;  %v3436_v60 = vmul.f32 -1.442695, %v2050_v58  ;;  %v2045_v4 = vadd.f32 %v2044_v59, %v1962_v61 }
 0xe54   :  { %4095 = vpow2.f32 %v3436_v60 }
 0xe5d   :  { %v4092_v63 = vpop.eup %4091 }
 0xe5e   :  { %v2062_v5 = vadd.f32 1.0, %v4092_v63 }
 0xe5f   :  { %v4094_v20 = vpop.eup %4093 }
 0xe60   :  { %4097 = vrcp.f32 %v2062_v5  ;;  %v2056_v1 = vadd.f32 1.0, %v4094_v20 }
 0xe61   :  { %4099 = vtanh.f32 %v2045_v4  ;;  %v4096_v6 = vpop.eup %4095 }
 0xe62   :  { %4101 = vrcp.f32 %v2056_v1  ;;  %v2069_v15 = vadd.f32 1.0, %v4096_v6  ;;  %v2592_v1 = vsel %vm2588_vm1, %v4556_v13, 0.0  ;;  %v2355_v6 = vld [vmem:[%s4881_s5 + $0x8] sm:$0xff] }
 0xe63   :  { %2593 = vadd.xlane.f32.xlu1 %v2592_v1 }
 0xe64   :  { %4103 = vrcp.f32 %v2069_v15  ;;  %v4671_v15 = vld [vmem:[%s4880_s1] sm:$0xff] }
 0xe6d   :  { %v4098_v7 = vpop.eup %4097 }
 0xe6e   :  { %v4100_v8 = vpop.eup %4099  ;;  %v2072_v21 = vmul.f32 %v4098_v7, %v1948_v44  ;;  %v2356_v7 = vld [vmem:[%s4881_s5 + $0x10] sm:$0xff] }
 0xe6f   :  { %v4102_v9 = vpop.eup %4101 }
 0xe70   :  { %v2073_v19 = vmul.f32 %v4102_v9, %v4100_v8  ;;  %v2357_v8 = vld [vmem:[%s4881_s5 + $0x18] sm:$0xff]  ;;  %v2558_v9 = vld [vmem:[%s4882_s7 + $0x10] sm:$0xff] }
 0xe71   :  { %v4104_v27 = vpop.eup %4103 }
 0xe72   :  { %v2074_v3 = vadd.f32 %v2073_v19, %v2072_v21  ;;  %v2589_v21 = vsel %vm2588_vm1, %v4671_v15, 0.0 }
 0xe73   :  { %v4675_v19 = vadd.f32 %v2592_v1, %v2589_v21  ;;  %2590 = vadd.xlane.f32.xlu0 %v2589_v21 }
 0xe74   :  { %4105 = vtanh.f32 %v2074_v3  ;;  %v2077_v23 = vsub.f32 %v2074_v3, %v1948_v44  ;;  %v2559_v3 = vld [vmem:[%s4882_s7 + $0x18] sm:$0xff] }
 0xe76   :  { %v2082_v25 = vmul.f32 %v2081_v22, %v2077_v23  ;;  %v2720_v23 = vld [vmem:[%s4884_s9 + $0x10] sm:$0xff] }
 0xe78   :  { %v2083_v26 = vadd.f32 %v2082_v25, %v1948_v44  ;;  %v2719_v25 = vld [vmem:[%s4884_s9 + $0x8] sm:$0xff] }
 0xe81   :  { %v4106_v28 = vpop.eup %4105 }
 0xe82   :  { %v2076_v29 = vmul.f32 %v4106_v28, %v4104_v27  ;;  %v2556_v27 = vld [vmem:[%s4882_s7] sm:$0xff]  ;;  %v2859_v28 = vld [vmem:[%s4885_s11 + $0x18] sm:$0xff] }
 0xe84   :  { %v2084_v24 = vsub.f32 %v2076_v29, %v1951_v49  ;;  %v2858_v29 = vld [vmem:[%s4885_s11 + $0x10] sm:$0xff] }
 0xe86   :  { %v2085_v30 = vmul.f32 %v2084_v24, %v2081_v22  ;;  %v2721_v22 = vld [vmem:[%s4884_s9 + $0x18] sm:$0xff] }
 0xe87   :  { %v3092_v24 = vld [vmem:[%s4886_s12 + $0x18] sm:$0xff] }
 0xe88   :  { %v2086_v32 = vadd.f32 %v2085_v30, %v1951_v49  ;;  %v2857_v30 = vld [vmem:[%s4885_s11 + $0x8] sm:$0xff] }
 0xe89   :  { %2562 = vperm.xlu0 %3881, %v2556_v27   ;;  %v2351_v27 = vrot.slane %v4556_v13, %v1270_v54  ;;  %v2361_v54 = vld [vmem:[%s4883_s6 + $0x18] sm:$0xff] }
 0xe8a   :  { %3738 = vmatprep.subr.mxu1 %v2086_v32 }
 0xe8b   :  { %3739 = vmatpush3.msra.mxu1 %v2086_v32 }
 0xe8c   :  { %3741 = vmatmul.mubr.msk.f32.vlgmr.msra.gmra.mxu1 %vm85_vm0, %v4528_v16 }
 0xe8d   :  { %3743 = vmatprep.mubr.msk.f32.mxu1 %vm85_vm0, %v4535_v2  ;;  %2880 = vperm.xlu0 %3881, %v2858_v29  }
 0xe90   :  { %3744 = vmatmul.mubr.msk.f32.gmra.mxu1 %vm85_vm0, %v4542_v18 }
 0xe91   :  { %2875 = vperm.xlu0 %3881, %v2857_v30   ;;  %v2360_v30 = vld [vmem:[%s4883_s6 + $0x10] sm:$0xff] }
 0xf4c   :  { %v3742_v34 = vpop.f32.mrf.mxu1 }
 0xf4d   :  { %v2175_v35 = vadd.f32 %v3742_v34, %v2093_v33  ;;  %v3090_v33 = vld [vmem:[%s4886_s12 + $0x8] sm:$0xff]  ;;  %v3089_v34 = vld [vmem:[%s4886_s12] sm:$0xff] }
 0xf4e   :  { %v2169_v36 = vpop.f32.mrf.mxu1 }
 0xf4f   :  { %v3442_v37 = vmul.f32 -1.442695, %v2175_v35  ;;  %v2170_v38 = vadd.f32 %v2169_v36, %v2089_v31  ;;  %v2856_v31 = vld [vmem:[%s4885_s11] sm:$0xff]  ;;  %v2863_v35 = vld [vmem:[%s4885_s11 + $0x38] sm:$0xff]  ;;  %v2862_v36 = vld [vmem:[%s4885_s11 + $0x30] sm:$0xff] }
 0xf50   :  { %v3745_v41 = vpop.f32.mrf.mxu1  ;;  %2870 = vperm.xlu0 %3881, %v2856_v31  }
 0xf51   :  { %4107 = vpow2.f32 %v3442_v37  ;;  %v3441_v40 = vmul.f32 -1.442695, %v2170_v38  ;;  %v2185_v43 = vadd.f32 %v3745_v41, %v2101_v12  ;;  %v3096_v37 = vld [vmem:[%s4886_s12 + $0x38] sm:$0xff]  ;;  %v2861_v38 = vld [vmem:[%s4885_s11 + $0x28] sm:$0xff]  ;;  %v3093_v12 = vld [vmem:[%s4886_s12 + $0x20] sm:$0xff] }
 0xf52   :  { %v2179_v44 = vpop.f32.mrf.mxu1  ;;  %v3094_v41 = vld [vmem:[%s4886_s12 + $0x28] sm:$0xff] }
 0xf53   :  { %4109 = vpow2.f32 %v3441_v40  ;;  %v3443_v42 = vmul.f32 -1.442695, %v2185_v43  ;;  %v2180_v46 = vadd.f32 %v2179_v44, %v2097_v39  ;;  %v3095_v39 = vld [vmem:[%s4886_s12 + $0x30] sm:$0xff]  ;;  %v2860_v40 = vld [vmem:[%s4885_s11 + $0x20] sm:$0xff]  ;;  %v2867_v43 = vld [vmem:[%s4885_s11 + $0x58] sm:$0xff] }
 0xf54   :  { %3103 = vperm.xlu0 %3881, %v3089_v34   ;;  %v3100_v44 = vld [vmem:[%s4886_s12 + $0x58] sm:$0xff] }
 0xf55   :  { %4111 = vpow2.f32 %v3443_v42  ;;  %v2866_v42 = vld [vmem:[%s4885_s11 + $0x50] sm:$0xff] }
 0xf58   :  { %2900 = vperm.xlu0 %3881, %v2862_v36  }
 0xf5c   :  { %2895 = vperm.xlu0 %3881, %v2861_v38  }
 0xf5e   :  { %v4108_v45 = vpop.eup %4107 }
 0xf5f   :  { %v2197_v14 = vadd.f32 1.0, %v4108_v45  ;;  %v2228_v45 = vpop.permute.xlu1 %2227 }
 0xf60   :  { %v4110_v48 = vpop.eup %4109  ;;  %2890 = vperm.xlu0 %3881, %v2860_v40  }
 0xf61   :  { %4113 = vrcp.f32 %v2197_v14  ;;  %v2191_v49 = vadd.f32 1.0, %v4110_v48  ;;  %v3099_v14 = vld [vmem:[%s4886_s12 + $0x50] sm:$0xff] }
 0xf62   :  { %4115 = vtanh.f32 %v2180_v46  ;;  %v4112_v47 = vpop.eup %4111 }
 0xf63   :  { %4117 = vrcp.f32 %v2191_v49  ;;  %v2204_v52 = vadd.f32 1.0, %v4112_v47  ;;  %v2865_v49 = vld [vmem:[%s4885_s11 + $0x48] sm:$0xff]  ;;  %v2224_v47 = vpop.permute.xlu0 %2223 }
 0xf64   :  { %3151 = vperm.xlu0 %3881, %v3093_v12  }
 0xf65   :  { %4119 = vrcp.f32 %v2204_v52  ;;  %v3098_v52 = vld [vmem:[%s4886_s12 + $0x48] sm:$0xff] }
 0xf68   :  { %3214 = vperm.xlu0 %3881, %v3100_v44  }
 0xf6c   :  { %3209 = vperm.xlu0 %3881, %v3099_v14  }
 0xf6e   :  { %v4114_v11 = vpop.eup %4113 }
 0xf6f   :  { %v4116_v50 = vpop.eup %4115  ;;  %v2207_v53 = vmul.f32 %v4114_v11, %v2083_v26 }
 0xf70   :  { %v4118_v51 = vpop.eup %4117  ;;  %3204 = vperm.xlu0 %3881, %v3098_v52  }
 0xf71   :  { %v2208_v55 = vmul.f32 %v4118_v51, %v4116_v50 }
 0xf72   :  { %v4120_v60 = vpop.eup %4119 }
 0xf73   :  { %v2209_v56 = vadd.f32 %v2208_v55, %v2207_v53  ;;  %v2864_v55 = vld [vmem:[%s4885_s11 + $0x40] sm:$0xff] }
 0xf75   :  { %4121 = vtanh.f32 %v2209_v56  ;;  %v2212_v0 = vsub.f32 %v2209_v56, %v2083_v26  ;;  %v3097_v56 = vld [vmem:[%s4886_s12 + $0x40] sm:$0xff] }
 0xf76   :  { %3199 = vperm.xlu0 %3881, %v3097_v56   ;;  %v2714_v56 = vld [vmem:[%s4887_s8] sm:$0xff] }
 0xf77   :  { %v2217_v58 = vmul.f32 %v2216_v57, %v2212_v0  ;;  %v2236_v0 = vpop.permute.xlu0 %2235 }
 0xf79   :  { %v4625_v59 = vadd.f32 %v2217_v58, %v2083_v26  ;;  %v2718_v26 = vld [vmem:[%s4884_s9] sm:$0xff] }
 0xf7b   :  { %v2591_v31 = vpop.xlane.xlu0 %2590 }
 0xf7c   :  { %vm2602_vm3 = vcmp.gt.f32.partialorder %v2591_v31, 0.0 }
 0xf7f   :  { %v2563_v44 = vpop.permute.xlu0 %2562 }
 0xf82   :  { %v4122_v61 = vpop.eup %4121 }
 0xf83   :  { %v2211_v63 = vmul.f32 %v4122_v61, %v4120_v60 }
 0xf85   :  { %v2219_v4 = vsub.f32 %v2211_v63, %v2086_v32  ;;  %v2232_v63 = vpop.permute.xlu1 %2231 }
 0xf87   :  { %v2220_v5 = vmul.f32 %v2219_v4, %v2216_v57 }
 0xf89   :  { %v4627_v20 = vadd.f32 %v2220_v5, %v2086_v32  ;;  %v3091_v32 = vld [vmem:[%s4886_s12 + $0x10] sm:$0xff] }
 0xf8b   :  { %3746 = vmatprep.subr.mxu0 %v4627_v20 }
 0xf8c   :  { %3747 = vmatpush3.msra.mxu0 %v4627_v20 }
 0xf8d   :  { %3749 = vmatmul.mubr.msk.f32.vlgmr.msra.gmra.mxu0 %vm85_vm0, %v4528_v16  ;;  %3762 = vmatprep.subr.mxu0 %v4189_v17  ;;  %v2354_v16 = vld [vmem:[%s4881_s5] sm:$0xff] }
 0xf8e   :  { %3751 = vmatprep.mubr.msk.f32.mxu0 %vm85_vm0, %v4535_v2  ;;  %3763 = vmatpush3.msra.mxu0 %v4189_v17  ;;  %v2557_v2 = vld [vmem:[%s4882_s7 + $0x8] sm:$0xff] }
 0xf8f   :  { %2567 = vperm.xlu1 %3882, %v2557_v2  }
 0xf91   :  { %3752 = vmatmul.mubr.msk.f32.gmra.mxu0 %vm85_vm0, %v4542_v18  ;;  %v2358_v18 = vld [vmem:[%s4883_s6] sm:$0xff] }
 0xf92   :  { %3764 = vmatprep.mubr.msk.f32.mxu0 %vm85_vm0, %v2354_v16  ;;  %3756 = vmatprep.mubr.msk.f32.mxu1 %vm85_vm0, %v2358_v18 }
 0xf93   :  { %2572 = vperm.xlu1 %3882, %v2558_v9  }
 0xf95   :  { %3765 = vmatmul.mubr.msk.f32.vlgmr.msra.gmra.mxu0 %vm85_vm0, %v2355_v6 }
 0xf96   :  { %3767 = vmatprep.mubr.msk.f32.mxu0 %vm85_vm0, %v2356_v7 }
 0xf97   :  { %2577 = vperm.xlu1 %3882, %v2559_v3  }
 0xf99   :  { %3768 = vmatmul.mubr.msk.f32.gmra.mxu0 %vm85_vm0, %v2357_v8 }
 0xf9a   :  { %3788 = vmatprep.mubr.msk.f32.mxu0 %vm2742_vm4, %v2714_v56 }
 0xf9b   :  { %2739 = vperm.xlu1 %3882, %v2721_v22   ;;  %v2594_v22 = vpop.xlane.xlu1 %2593 }
 0xf9c   :  { %vm2603_vm2 = vcmp.gt.f32.partialorder %v2594_v22, 0.0 }
 0xf9f   :  { %2734 = vperm.xlu1 %3882, %v2720_v23  }
 0xfa3   :  { %2729 = vperm.xlu1 %3882, %v2719_v25  }
 0xfa7   :  { %2724 = vperm.xlu1 %3882, %v2718_v26  }
 0xfab   :  { %2885 = vperm.xlu1 %3882, %v2859_v28  }
 0xfaf   :  { %3118 = vperm.xlu1 %3882, %v3092_v24  }
 0xfb3   :  { %3113 = vperm.xlu1 %3882, %v3091_v32  }
 0xfb7   :  { %3108 = vperm.xlu1 %3882, %v3090_v33  }
 0xfbb   :  { %2905 = vperm.xlu1 %3882, %v2863_v35  }
 0xfbf   :  { %3166 = vperm.xlu1 %3882, %v3096_v37  }
 0xfc3   :  { %3161 = vperm.xlu1 %3882, %v3095_v39  }
 0xfc7   :  { %3156 = vperm.xlu1 %3882, %v3094_v41  }
 0xfcb   :  { %2925 = vperm.xlu1 %3882, %v2867_v43  }
 0xfcf   :  { %2920 = vperm.xlu1 %3882, %v2866_v42  }
 0xfd3   :  { %2915 = vperm.xlu1 %3882, %v2865_v49  }
 0xfd7   :  { %2910 = vperm.xlu1 %3882, %v2864_v55  }
0x100a   :  { %v2568_v37 = vpop.permute.xlu1 %2567 }
0x100e   :  { %v2573_v40 = vpop.permute.xlu1 %2572 }
0x104d   :  { %v3750_v46 = vpop.f32.mrf.mxu0 }
0x104e   :  { %v2310_v48 = vadd.f32 %v3750_v46, %v2228_v45 }
0x104f   :  { %v2304_v11 = vpop.f32.mrf.mxu0 }
0x1050   :  { %v3449_v50 = vmul.f32 -1.442695, %v2310_v48  ;;  %v2305_v51 = vadd.f32 %v2304_v11, %v2224_v47  ;;  %v2578_v47 = vpop.permute.xlu1 %2577 }
0x1051   :  { %v3753_v57 = vpop.f32.mrf.mxu0 }
0x1052   :  { %4123 = vpow2.f32 %v3449_v50  ;;  %v3448_v53 = vmul.f32 -1.442695, %v2305_v51  ;;  %v2320_v58 = vadd.f32 %v3753_v57, %v2236_v0  ;;  %v2596_v57 = vrot.slane %v4675_v19, 4 }
0x1053   :  { %v2314_v60 = vpop.f32.mrf.mxu0 }
0x1054   :  { %4125 = vpow2.f32 %v3448_v53  ;;  %v3450_v61 = vmul.f32 -1.442695, %v2320_v58  ;;  %v2315_v5 = vadd.f32 %v2314_v60, %v2232_v63  ;;  %v2597_v0 = vadd.f32 %v2596_v57, %v4675_v19 }
0x1055   :  { %v3766_v36 = vpop.f32.mrf.mxu0 }
0x1056   :  { %4127 = vpow2.f32 %v3450_v61  ;;  %v2598_v58 = vrot.slane %v2597_v0, 2 }
0x1057   :  { %v2537_v38 = vpop.f32.mrf.mxu0 }
0x1058   :  { %v2599_v60 = vadd.f32 %v2598_v58, %v2597_v0 }
0x1059   :  { %v3769_v12 = vpop.f32.mrf.mxu0 }
0x105a   :  { %v2600_v61 = vrot.slane %v2599_v60, 1 }
0x105b   :  { %v2547_v49 = vpop.f32.mrf.mxu0 }
0x105c   :  { %v2601_v63 = vadd.f32 %v2600_v61, %v2599_v60 }
0x105e   :  { %vm2608_vm5 = vcmp.gt.f32.partialorder %v2601_v63, 0.0 }
0x105f   :  { %v4124_v4 = vpop.eup %4123 }
0x1060   :  { %v2332_v17 = vadd.f32 1.0, %v4124_v4 }
0x1061   :  { %v4126_v1 = vpop.eup %4125 }
0x1062   :  { %4129 = vrcp.f32 %v2332_v17  ;;  %v2326_v16 = vadd.f32 1.0, %v4126_v1 }
0x1063   :  { %4131 = vtanh.f32 %v2315_v5  ;;  %v4128_v6 = vpop.eup %4127 }
0x1064   :  { %4133 = vrcp.f32 %v2326_v16  ;;  %v2339_v8 = vadd.f32 1.0, %v4128_v6 }
0x1066   :  { %4135 = vrcp.f32 %v2339_v8  ;;  %v2715_v8 = vld [vmem:[%s4887_s8 + $0x8] sm:$0xff] }
0x106f   :  { %v4130_v2 = vpop.eup %4129 }
0x1070   :  { %v4132_v18 = vpop.eup %4131  ;;  %v2342_v9 = vmul.f32 %v4130_v2, %v4625_v59  ;;  %v2359_v59 = vld [vmem:[%s4883_s6 + $0x8] sm:$0xff] }
0x1071   :  { %v4134_v7 = vpop.eup %4133 }
0x1072   :  { %v2343_v21 = vmul.f32 %v4134_v7, %v4132_v18 }
0x1073   :  { %v4136_v23 = vpop.eup %4135 }
0x1074   :  { %v2344_v3 = vadd.f32 %v2343_v21, %v2342_v9  ;;  %v2716_v9 = vld [vmem:[%s4887_s8 + $0x10] sm:$0xff]  ;;  %v2717_v21 = vld [vmem:[%s4887_s8 + $0x18] sm:$0xff] }
0x1076   :  { %4137 = vtanh.f32 %v2344_v3  ;;  %v2844_v3 = vld [vmem:[%s4888_s10] sm:$0xff] }
0x1077   :  { %4139 = vrsqrt.f32 %v2594_v22  ;;  %v2740_v22 = vpop.permute.xlu1 %2739 }
0x1078   :  { %4141 = vrsqrt.f32 %v2591_v31 }
0x1079   :  { %4143 = vrsqrt.f32 %v2601_v63 }
0x1083   :  { %v4138_v25 = vpop.eup %4137 }
0x1084   :  { %v2346_v26 = vmul.f32 %v4138_v25, %v4136_v23  ;;  %v4140_v62 = vpop.eup %4139  ;;  %v2735_v23 = vpop.permute.xlu1 %2734 }
0x1085   :  { %v4142_v33 = vpop.eup %4141 }
0x1086   :  { %v2347_v28 = vsub.f32 %v2346_v26, %v4627_v20  ;;  %v2606_v34 = vsel %vm2602_vm3, %v4142_v33, 0.0  ;;  %v4144_v5 = vpop.eup %4143 }
0x1087   :  { %v2611_v35 = vmul.f32 %v4671_v15, %v2606_v34  ;;  %v2610_v1 = vsel %vm2608_vm5, %v4144_v5, 0.0  ;;  %v2845_v34 = vld [vmem:[%s4888_s10 + $0x8] sm:$0xff] }
0x1088   :  { %v2352_v29 = vmul.f32 %v2351_v27, %v2347_v28  ;;  %v2730_v26 = vpop.permute.xlu1 %2729 }
0x108a   :  { %v2353_v24 = vadd.f32 %v2352_v29, %v4627_v20  ;;  %v2607_v20 = vsel %vm2603_vm2, %v4140_v62, 0.0 }
0x108b   :  { %v2612_v32 = vmul.f32 %v2607_v20, %v4556_v13 }
0x108c   :  { %3754 = vmatprep.subr.mxu1 %v2353_v24 }
0x108d   :  { %3755 = vmatpush3.msra.mxu1 %v2353_v24 }
0x108e   :  { %3757 = vmatmul.mubr.msk.f32.vlgmr.msra.gmra.mxu1 %vm85_vm0, %v2359_v59  ;;  %3770 = vmatprep.subr.mxu1 %v2612_v32 }
0x108f   :  { %3759 = vmatprep.mubr.msk.f32.mxu1 %vm85_vm0, %v2360_v30  ;;  %3771 = vmatpush3.msra.mxu1 %v2612_v32 }
0x1090   :  { %3772 = vmatprep.subr.mxu1 %v2611_v35 }
0x1091   :  { %3773 = vmatpush3.msra.mxu1 %v2611_v35  ;;  %v2846_v35 = vld [vmem:[%s4888_s10 + $0x10] sm:$0xff] }
0x1092   :  { %3760 = vmatmul.mubr.msk.f32.gmra.mxu1 %vm85_vm0, %v2361_v54  ;;  %v2725_v54 = vpop.permute.xlu1 %2724 }
0x114e   :  { %v3758_v39 = vpop.f32.mrf.mxu1 }
0x114f   :  { %v2543_v41 = vadd.f32 %v3766_v36, %v3758_v39  ;;  %v2847_v36 = vld [vmem:[%s4888_s10 + $0x18] sm:$0xff]  ;;  %v2850_v39 = vld [vmem:[%s4888_s10 + $0x30] sm:$0xff] }
0x1150   :  { %v2440_v13 = vpop.f32.mrf.mxu1 }
0x1151   :  { %v2538_v43 = vadd.f32 %v2537_v38, %v2440_v13  ;;  %v2581_v42 = vadd.f32 %v2568_v37, %v2543_v41  ;;  %v2848_v37 = vld [vmem:[%s4888_s10 + $0x20] sm:$0xff]  ;;  %v2849_v38 = vld [vmem:[%s4888_s10 + $0x28] sm:$0xff] }
0x1152   :  { %v3761_v45 = vpop.f32.mrf.mxu1  ;;  %v2852_v41 = vld [vmem:[%s4888_s10 + $0x40] sm:$0xff]  ;;  %v2853_v13 = vld [vmem:[%s4888_s10 + $0x48] sm:$0xff] }
0x1153   :  { %v2580_v46 = vadd.f32 %v2563_v44, %v2538_v43  ;;  %v2553_v14 = vadd.f32 %v3769_v12, %v3761_v45  ;;  %v2585_v50 = vmax.f32 %v2581_v42, 0.0  ;;  %v2854_v12 = vld [vmem:[%s4888_s10 + $0x50] sm:$0xff]  ;;  %v2855_v43 = vld [vmem:[%s4888_s10 + $0x58] sm:$0xff]  ;;  %v2886_v44 = vpop.permute.xlu1 %2885  ;;  %v2881_v42 = vpop.permute.xlu0 %2880 }
0x1154   :  { %v2450_v48 = vpop.f32.mrf.mxu1 }
0x1155   :  { %v2584_v15 = vmax.f32 %v2580_v46, 0.0  ;;  %v2548_v11 = vadd.f32 %v2547_v49, %v2450_v48  ;;  %v2583_v51 = vadd.f32 %v2578_v47, %v2553_v14 }
0x1157   :  { %v2582_v52 = vadd.f32 %v2573_v40, %v2548_v11  ;;  %3774 = vmatprep.mubr.msk.f32.mxu1 %vm2588_vm1, %v2584_v15  ;;  %v2587_v55 = vmax.f32 %v2583_v51, 0.0  ;;  %v2851_v40 = vld [vmem:[%s4888_s10 + $0x38] sm:$0xff]  ;;  %v3119_v45 = vpop.permute.xlu1 %3118  ;;  %v2876_v46 = vpop.permute.xlu0 %2875 }
0x1158   :  { %3775 = vmatmul.mubr.msk.f32.vlgmr.msra.gmra.mxu1 %vm2588_vm1, %v2585_v50 }
0x1159   :  { %v2586_v53 = vmax.f32 %v2582_v52, 0.0 }
0x115b   :  { %3777 = vmatprep.mubr.msk.f32.mxu1 %vm2588_vm1, %v2586_v53  ;;  %v3114_v14 = vpop.permute.xlu1 %3113  ;;  %v2871_v48 = vpop.permute.xlu0 %2870 }
0x115c   :  { %3778 = vmatmul.mubr.msk.f32.gmra.mxu1 %vm2588_vm1, %v2587_v55 }
0x115d   :  { %3802 = vmatprep.mubr.msk.f32.mxu1 %vm2742_vm4, %v2844_v3 }
0x115f   :  { %v3109_v49 = vpop.permute.xlu1 %3108  ;;  %v3104_v47 = vpop.permute.xlu0 %3103 }
0x1163   :  { %v2906_v15 = vpop.permute.xlu1 %2905  ;;  %v2901_v11 = vpop.permute.xlu0 %2900 }
0x1167   :  { %v3167_v50 = vpop.permute.xlu1 %3166  ;;  %v2896_v51 = vpop.permute.xlu0 %2895 }
0x116b   :  { %v3162_v0 = vpop.permute.xlu1 %3161 }
0x1218   :  { %v3776_v4 = vpop.f32.mrf.mxu1 }
0x1219   :  { %v2711_v7 = vmul.f32 %v3776_v4, %v2610_v1  ;;  %v2891_v4 = vpop.permute.xlu0 %2890 }
0x121a   :  { %v2691_v17 = vpop.f32.mrf.mxu1 }
0x121b   :  { %v2710_v19 = vmul.f32 %v2691_v17, %v2610_v1 }
0x121c   :  { %v3779_v16 = vpop.f32.mrf.mxu1 }
0x121d   :  { %v2713_v6 = vmul.f32 %v3779_v16, %v2610_v1 }
0x121e   :  { %v2701_v2 = vpop.f32.mrf.mxu1 }
0x121f   :  { %v2712_v18 = vmul.f32 %v2701_v2, %v2610_v1  ;;  %3780 = vmatprep.subr.mxu0 %v2713_v6 }
0x1220   :  { %3781 = vmatpush3.msra.mxu0 %v2713_v6 }
0x1221   :  { %3782 = vmatprep.subr.mxu0 %v2712_v18 }
0x1222   :  { %3783 = vmatpush3.msra.mxu0 %v2712_v18 }
0x1223   :  { %3784 = vmatprep.subr.mxu0 %v2711_v7 }
0x1224   :  { %3785 = vmatpush3.msra.mxu0 %v2711_v7 }
0x1225   :  { %3786 = vmatprep.subr.mxu0 %v2710_v19 }
0x1226   :  { %3787 = vmatpush3.msra.mxu0 %v2710_v19  ;;  %v3157_v19 = vpop.permute.xlu1 %3156 }
0x1227   :  { %3789 = vmatmul.mubr.msk.f32.vlgmr.msra.gmra.mxu0 %vm2742_vm4, %v2715_v8  ;;  %3820 = vmatprep.subr.mxu0 %v4192_v10 }
0x1228   :  { %3791 = vmatprep.mubr.msk.f32.mxu0 %vm2742_vm4, %v2716_v9 }
0x122b   :  { %3792 = vmatmul.mubr.msk.f32.gmra.mxu0 %vm2742_vm4, %v2717_v21 }
0x122c   :  { %3828 = vmatprep.mubr.msk.f32.mxu0 %vm4208_vm6, %v4192_v10 }
0x12e7   :  { %v3790_v25 = vpop.f32.mrf.mxu0 }
0x12e8   :  { %v2827_v59 = vadd.f32 %v3790_v25, %v2730_v26 }
0x12e9   :  { %v2821_v27 = vpop.f32.mrf.mxu0 }
0x12ea   :  { %v2822_v20 = vadd.f32 %v2821_v27, %v2725_v54  ;;  %v2841_v31 = vmax.f32 %v2827_v59, 0.0  ;;  %v2926_v54 = vpop.permute.xlu1 %2925 }
0x12eb   :  { %v3793_v28 = vpop.f32.mrf.mxu0 }
0x12ec   :  { %v2837_v29 = vadd.f32 %v3793_v28, %v2740_v22  ;;  %v2840_v33 = vmax.f32 %v2822_v20, 0.0  ;;  %v3152_v22 = vpop.permute.xlu0 %3151 }
0x12ed   :  { %v2831_v24 = vpop.f32.mrf.mxu0 }
0x12ee   :  { %v2843_v30 = vmax.f32 %v2837_v29, 0.0  ;;  %v2832_v62 = vadd.f32 %v2831_v24, %v2735_v23 }
0x12f0   :  { %v2842_v32 = vmax.f32 %v2832_v62, 0.0  ;;  %3794 = vmatprep.subr.mxu1 %v2843_v30 }
0x12f1   :  { %3795 = vmatpush3.msra.mxu1 %v2843_v30 }
0x12f2   :  { %3796 = vmatprep.subr.mxu1 %v2842_v32 }
0x12f3   :  { %3797 = vmatpush3.msra.mxu1 %v2842_v32 }
0x12f4   :  { %3798 = vmatprep.subr.mxu1 %v2841_v31 }
0x12f5   :  { %3799 = vmatpush3.msra.mxu1 %v2841_v31  ;;  %v3215_v31 = vpop.permute.xlu0 %3214 }
0x12f6   :  { %3800 = vmatprep.subr.mxu1 %v2840_v33 }
0x12f7   :  { %3801 = vmatpush3.msra.mxu1 %v2840_v33 }
0x12f8   :  { %3803 = vmatmul.mubr.msk.f32.vlgmr.msra.gmra.mxu1 %vm2742_vm4, %v2845_v34 }
0x12f9   :  { %3805 = vmatprep.mubr.msk.f32.mxu1 %vm2742_vm4, %v2846_v35 }
0x12fc   :  { %3806 = vmatmul.mubr.msk.f32.gmra.mxu1 %vm2742_vm4, %v2847_v36 }
0x12fd   :  { %3808 = vmatprep.mubr.msk.f32.mxu1 %vm2742_vm4, %v2848_v37  ;;  %v2921_v37 = vpop.permute.xlu1 %2920 }
0x1300   :  { %3809 = vmatmul.mubr.msk.f32.gmra.mxu1 %vm2742_vm4, %v2849_v38 }
0x1301   :  { %3811 = vmatprep.mubr.msk.f32.mxu1 %vm2742_vm4, %v2850_v39 }
0x1304   :  { %3812 = vmatmul.mubr.msk.f32.gmra.mxu1 %vm2742_vm4, %v2851_v40  ;;  %v3210_v40 = vpop.permute.xlu0 %3209 }
0x1305   :  { %3814 = vmatprep.mubr.msk.f32.mxu1 %vm2742_vm4, %v2852_v41 }
0x1308   :  { %3815 = vmatmul.mubr.msk.f32.gmra.mxu1 %vm2742_vm4, %v2853_v13 }
0x1309   :  { %3817 = vmatprep.mubr.msk.f32.mxu1 %vm2742_vm4, %v2854_v12  ;;  %v2916_v12 = vpop.permute.xlu1 %2915 }
0x130c   :  { %3818 = vmatmul.mubr.msk.f32.gmra.mxu1 %vm2742_vm4, %v2855_v43 }
0x13b8   :  { %v3804_v52 = vpop.f32.mrf.mxu1 }
0x13b9   :  { %v3036_v53 = vadd.f32 %v3804_v52, %v2876_v46 }
0x13ba   :  { %v3030_v55 = vpop.f32.mrf.mxu1 }
0x13bb   :  { %v3122_v56 = vadd.f32 %v3109_v49, %v3036_v53  ;;  %v3031_v57 = vadd.f32 %v3030_v55, %v2871_v48 }
0x13bc   :  { %v3807_v58 = vpop.f32.mrf.mxu1 }
0x13bd   :  { %v3480_v60 = vmul.f32 -1.442695, %v3122_v56  ;;  %v3121_v61 = vadd.f32 %v3104_v47, %v3031_v57  ;;  %v3046_v63 = vadd.f32 %v3807_v58, %v2886_v44  ;;  %v3205_v44 = vpop.permute.xlu0 %3204 }
0x13be   :  { %v3040_v5 = vpop.f32.mrf.mxu1 }
0x13bf   :  { %4145 = vpow2.f32 %v3480_v60  ;;  %v3479_v17 = vmul.f32 -1.442695, %v3121_v61  ;;  %v3124_v1 = vadd.f32 %v3119_v45, %v3046_v63  ;;  %v3041_v16 = vadd.f32 %v3040_v5, %v2881_v42 }
0x13c0   :  { %v3810_v6 = vpop.f32.mrf.mxu1 }
0x13c1   :  { %4147 = vpow2.f32 %v3479_v17  ;;  %v3482_v2 = vmul.f32 -1.442695, %v3124_v1  ;;  %v3123_v18 = vadd.f32 %v3114_v14, %v3041_v16  ;;  %v3056_v7 = vadd.f32 %v3810_v6, %v2896_v51  ;;  %v3200_v51 = vpop.permute.xlu0 %3199 }
0x13c2   :  { %v3050_v8 = vpop.f32.mrf.mxu1 }
0x13c3   :  { %4149 = vpow2.f32 %v3482_v2  ;;  %v3481_v9 = vmul.f32 -1.442695, %v3123_v18  ;;  %v3170_v21 = vadd.f32 %v3157_v19, %v3056_v7  ;;  %v3051_v3 = vadd.f32 %v3050_v8, %v2891_v4 }
0x13c4   :  { %v3813_v23 = vpop.f32.mrf.mxu1 }
0x13c5   :  { %4151 = vpow2.f32 %v3481_v9  ;;  %v3169_v25 = vadd.f32 %v3152_v22, %v3051_v3  ;;  %v3066_v26 = vadd.f32 %v3813_v23, %v2906_v15  ;;  %v3484_v28 = vmul.f32 -1.442695, %v3170_v21 }
0x13c6   :  { %v3060_v27 = vpop.f32.mrf.mxu1 }
0x13c7   :  { %v3172_v29 = vadd.f32 %v3167_v50, %v3066_v26  ;;  %v3061_v24 = vadd.f32 %v3060_v27, %v2901_v11  ;;  %v3483_v59 = vmul.f32 -1.442695, %v3169_v25  ;;  %4153 = vpow2.f32 %v3484_v28  ;;  %v2911_v50 = vpop.permute.xlu1 %2910 }
0x13c8   :  { %v3816_v13 = vpop.f32.mrf.mxu1 }
0x13c9   :  { %v3486_v30 = vmul.f32 -1.442695, %v3172_v29  ;;  %v3171_v62 = vadd.f32 %v3162_v0, %v3061_v24  ;;  %4155 = vpow2.f32 %v3483_v59  ;;  %v3076_v58 = vadd.f32 %v3816_v13, %v2916_v12 }
0x13ca   :  { %v3070_v42 = vpop.f32.mrf.mxu1 }
0x13cb   :  { %v3485_v20 = vmul.f32 -1.442695, %v3171_v62  ;;  %4157 = vpow2.f32 %v3486_v30  ;;  %v3071_v56 = vadd.f32 %v3070_v42, %v2911_v50 }
0x13cc   :  { %v4146_v32 = vpop.eup %4145  ;;  %v3819_v47 = vpop.f32.mrf.mxu1 }
0x13cd   :  { %v3138_v33 = vadd.f32 1.0, %v4146_v32  ;;  %4159 = vpow2.f32 %v3485_v20  ;;  %v3086_v63 = vadd.f32 %v3819_v47, %v2926_v54 }
0x13ce   :  { %v4148_v34 = vpop.eup %4147  ;;  %v3080_v60 = vpop.f32.mrf.mxu1 }
0x13cf   :  { %4161 = vrcp.f32 %v3138_v33  ;;  %v3137_v35 = vadd.f32 1.0, %v4148_v34  ;;  %v3081_v16 = vadd.f32 %v3080_v60, %v2921_v37 }
0x13d0   :  { %v4150_v36 = vpop.eup %4149 }
0x13d1   :  { %4163 = vrcp.f32 %v3137_v35  ;;  %v3140_v38 = vadd.f32 1.0, %v4150_v36 }
0x13d2   :  { %v4152_v39 = vpop.eup %4151 }
0x13d3   :  { %4165 = vrcp.f32 %v3140_v38  ;;  %v3139_v41 = vadd.f32 1.0, %v4152_v39  ;;  %v3254_v39 = vld [vmem:[%s4889_s13] sm:$0xf] }
0x13d4   :  { %v4154_v43 = vpop.eup %4153 }
0x13d5   :  { %4167 = vrcp.f32 %v3139_v41  ;;  %v3186_v49 = vadd.f32 1.0, %v4154_v43 }
0x13d6   :  { %v4156_v45 = vpop.eup %4155 }
0x13d7   :  { %v3185_v52 = vadd.f32 1.0, %v4156_v45  ;;  %4169 = vrcp.f32 %v3186_v49 }
0x13d8   :  { %v4158_v46 = vpop.eup %4157 }
0x13d9   :  { %v3188_v15 = vadd.f32 1.0, %v4158_v46 }
0x13da   :  { %v4160_v14 = vpop.eup %4159 }
0x13db   :  { %v3187_v55 = vadd.f32 1.0, %v4160_v14  ;;  %4171 = vrcp.f32 %v3188_v15 }
0x13dc   :  { %v4162_v48 = vpop.eup %4161  ;;  %4173 = vrcp.f32 %v3185_v52 }
0x13dd   :  { %v3218_v53 = vmul.f32 %v4162_v48, %v3205_v44  ;;  %4175 = vrcp.f32 %v3187_v55 }
0x13de   :  { %v4164_v11 = vpop.eup %4163 }
0x13df   :  { %v3217_v57 = vmul.f32 %v4164_v11, %v3200_v51  ;;  %v3222_v17 = vadd.f32 %v3218_v53, %v3076_v58 }
0x13e0   :  { %v4166_v0 = vpop.eup %4165 }
0x13e1   :  { %v3221_v61 = vadd.f32 %v3217_v57, %v3071_v56  ;;  %v3220_v4 = vmul.f32 %v4166_v0, %v3215_v31 }
0x13e2   :  { %v4168_v5 = vpop.eup %4167 }
0x13e3   :  { %v3224_v1 = vadd.f32 %v3220_v4, %v3086_v63  ;;  %v3219_v6 = vmul.f32 %v4168_v5, %v3210_v40  ;;  %4177 = vtanh.f32 %v3221_v61  ;;  %v3255_v40 = vld [vmem:[%s4890_s14] sm:$0xf] }
0x13e4   :  { %v4170_v18 = vpop.eup %4169 }
0x13e5   :  { %4179 = vtanh.f32 %v3224_v1  ;;  %v3223_v2 = vadd.f32 %v3219_v6, %v3081_v16  ;;  %v3230_v59 = vsub.f32 1.0, %v4170_v18 }
0x13e6   :  { %4181 = vtanh.f32 %v3222_v17 }
0x13e7   :  { %4183 = vtanh.f32 %v3223_v2 }
0x13e8   :  { %v4172_v7 = vpop.eup %4171 }
0x13e9   :  { %v4174_v19 = vpop.eup %4173  ;;  %v3232_v21 = vsub.f32 1.0, %v4172_v7 }
0x13ea   :  { %v4176_v8 = vpop.eup %4175  ;;  %v3229_v26 = vsub.f32 1.0, %v4174_v19 }
0x13eb   :  { %v3231_v25 = vsub.f32 1.0, %v4176_v8 }
0x13f0   :  { %v4178_v9 = vpop.eup %4177 }
0x13f1   :  { %v3233_v24 = vmul.f32 %v4178_v9, %v3229_v26 }
0x13f2   :  { %v4180_v3 = vpop.eup %4179 }
0x13f3   :  { %v4182_v22 = vpop.eup %4181  ;;  %v3236_v23 = vmul.f32 %v4180_v3, %v3232_v21  ;;  %v3237_v54 = vsel %vm2588_vm1, %v3233_v24, 0.0 }
0x13f4   :  { %v4184_v27 = vpop.eup %4183  ;;  %v3234_v62 = vmul.f32 %v4182_v22, %v3230_v59 }
0x13f5   :  { %v3246_v28 = vsel %vm2588_vm1, %v3236_v23, 0.0  ;;  %v3235_v29 = vmul.f32 %v4184_v27, %v3231_v25 }
0x13f6   :  { %3247 = vadd.xlane.f32.xlu1 %v3246_v28  ;;  %v3240_v20 = vsel %vm2588_vm1, %v3234_v62, 0.0 }
0x13f7   :  { %v3243_v30 = vsel %vm2588_vm1, %v3235_v29, 0.0 }
0x13f8   :  { %3244 = vadd.xlane.f32.xlu0 %v3243_v30 }
0x13fa   :  { %3238 = vadd.xlane.f32.xlu1 %v3237_v54 }
0x13fc   :  { %3241 = vadd.xlane.f32.xlu0 %v3240_v20 }
0x147f   :  { %v3248_v32 = vpop.xlane.xlu1 %3247 }
0x1480   :  { %v3253_v31 = vmul.f32 0.0625, %v3248_v32 }
0x1481   :  { %v3245_v33 = vpop.xlane.xlu0 %3244 }
0x1482   :  { %v3252_v34 = vmul.f32 0.0625, %v3245_v33  ;;  %3821 = vmatpush3.msra.mxu0 %v3253_v31 }
0x1483   :  { %3822 = vmatprep.subr.mxu0 %v4192_v10  ;;  %v3239_v35 = vpop.xlane.xlu1 %3238 }
0x1484   :  { %3823 = vmatpush3.msra.mxu0 %v3252_v34  ;;  %v3250_v38 = vmul.f32 0.0625, %v3239_v35 }
0x1485   :  { %v3242_v36 = vpop.xlane.xlu0 %3241  ;;  %3824 = vmatprep.subr.mxu0 %v4192_v10 }
0x1486   :  { %v3251_v37 = vmul.f32 0.0625, %v3242_v36 }
0x1488   :  { %3825 = vmatpush3.msra.mxu0 %v3251_v37 }
0x1489   :  { %3826 = vmatprep.subr.mxu0 %v4192_v10 }
0x148a   :  { %3827 = vmatpush3.msra.mxu0 %v3250_v38 }
0x148b   :  { %3829 = vmatmul.mubr.msk.f32.vlgmr.msra.gmra.mxu0 %vm2742_vm4, %v3254_v39 }
0x154b   :  { %v3325_v41 = vpop.f32.mrf.mxu0 }
0x154c   :  { %v3326_v13 = vadd.f32 %v3325_v41, %v3255_v40 }
0x154d   :  { %v3830_v12 = vpop.f32.mrf.mxu0 }
0x154e   :  { %3330 = vst.msk [vmem:[%s4891_s15] sm:$0xf] %vm3329_vm7, %v3326_v13 }

</bundles_post_ra>
